<compile_context>
chip_gen: v5e
topology: v5e:2x2
jax: 0.10.0
libtpu: 0.0.40
codegen_flags: <defaults>
</compile_context>

<pallas_src>
import functools

import jax
import jax.numpy as jnp
from jax.experimental import pallas as pl
from jax.experimental.pallas import tpu as pltpu


# -----------------------------------------------------------------------------
# Pallas kernel: hoisted input projection + unrolled 2-layer LSTM + FC head.
# -----------------------------------------------------------------------------
def tramit_kernel(emb_ref,             # (T*Bp, E)   bf16, time-major rows
                  wih1_ref,            # (E, 4Hp)    bf16
                  whh1_ref,            # (Hp, 4Hp)   bf16
                  b1_ref,              # (1, 4Hp)    f32   (b_ih+b_hh, layer 0)
                  w2cat_ref,           # (2Hp, 4Hp)  bf16  ([Wih_l1; Whh_l1])
                  b2_ref,              # (1, 4Hp)    f32   (b_ih+b_hh, layer 1)
                  wf1_ref,             # (Hp, Hp)    bf16
                  bf1_ref,             # (1, Hp)     f32
                  wf2_ref,             # (Hp, Vp)    bf16
                  bf2_ref,             # (1, Vp)     f32
                  out_ref,             # (Bp, Vp)    f32
                  *, T, B):
    Hp4 = whh1_ref.shape[1]
    Hp = Hp4 // 4

    # ---- Hoisted layer-1 input projection: one matmul, bias folded in. -----
    xproj = (jnp.dot(emb_ref[...], wih1_ref[...],
                     preferred_element_type=jnp.float32)
             + b1_ref[...])                                   # (T*Bp, 4Hp) f32

    whh1 = whh1_ref[...]                                      # bf16
    w2cat = w2cat_ref[...]                                    # bf16
    b2 = jnp.broadcast_to(b2_ref[...], (B, Hp4))              # hoisted bcast

    def gates_to_hc(gates, c):
        # PyTorch gate order i, f, g, o; every slice is a full 128-lane group.
        i = jax.nn.sigmoid(gates[:, 0 * Hp:1 * Hp])
        f = jax.nn.sigmoid(gates[:, 1 * Hp:2 * Hp])
        g = jnp.tanh(gates[:, 2 * Hp:3 * Hp])
        o = jax.nn.sigmoid(gates[:, 3 * Hp:4 * Hp])
        c_new = f * c + i * g
        h_new = o * jnp.tanh(c_new)
        return h_new, c_new

    h1 = c1 = h2 = c2 = jnp.zeros((B, Hp), jnp.float32)
    # Fully unrolled: T is small and static, so the scheduler can overlap the
    # EUP (sigmoid/tanh) latency with the next MXU push.
    for t in range(T):
        g1 = xproj[t * B:(t + 1) * B, :] + jnp.dot(
            h1.astype(jnp.bfloat16), whh1, preferred_element_type=jnp.float32)
        h1, c1 = gates_to_hc(g1, c1)
        hcat = jnp.concatenate([h1, h2], axis=-1).astype(jnp.bfloat16)
        g2 = b2 + jnp.dot(hcat, w2cat, preferred_element_type=jnp.float32)
        h2, c2 = gates_to_hc(g2, c2)

    # ---- Head: fc1 -> ReLU -> (dropout = identity in eval) -> fc2 ----------
    y = (jnp.dot(h2.astype(jnp.bfloat16), wf1_ref[...],
                 preferred_element_type=jnp.float32) + bf1_ref[...])
    y = jnp.maximum(y, 0.0)
    out_ref[...] = (jnp.dot(y.astype(jnp.bfloat16), wf2_ref[...],
                            preferred_element_type=jnp.float32) + bf2_ref[...])


# -----------------------------------------------------------------------------
# Parameter construction (deterministic, PyTorch-like uniform init).
# -----------------------------------------------------------------------------
def init_params(key, num_tramits, embedding_dim, hidden_dim):
    E, H, V = embedding_dim, hidden_dim, num_tramits
    ks = jax.random.split(key, 16)
    k_lstm = 1.0 / jnp.sqrt(H)
    k_fc = 1.0 / jnp.sqrt(H)

    def u(k, shape, scale):
        return jax.random.uniform(k, shape, jnp.float32, -scale, scale)

    return {
        "embedding": jax.random.normal(ks[0], (V, E), jnp.float32),
        # LSTM layer 0 (E -> H), PyTorch shapes (4H, E)/(4H, H)/(4H,)
        "w_ih_l0": u(ks[1], (4 * H, E), k_lstm),
        "w_hh_l0": u(ks[2], (4 * H, H), k_lstm),
        "b_ih_l0": u(ks[3], (4 * H,), k_lstm),
        "b_hh_l0": u(ks[4], (4 * H,), k_lstm),
        # LSTM layer 1 (H -> H)
        "w_ih_l1": u(ks[5], (4 * H, H), k_lstm),
        "w_hh_l1": u(ks[6], (4 * H, H), k_lstm),
        "b_ih_l1": u(ks[7], (4 * H,), k_lstm),
        "b_hh_l1": u(ks[8], (4 * H,), k_lstm),
        # fc1: (H, H), fc2: (V, H)
        "fc1_w": u(ks[9], (H, H), k_fc),
        "fc1_b": u(ks[10], (H,), k_fc),
        "fc2_w": u(ks[11], (V, H), k_fc),
        "fc2_b": u(ks[12], (V,), k_fc),
    }


# -----------------------------------------------------------------------------
# Weight packing helpers: lane-aligned (padded) gate layout, (in, out) layout.
# -----------------------------------------------------------------------------
def _pad_to(a, axis, size):
    pad = [(0, 0)] * a.ndim
    pad[axis] = (0, size - a.shape[axis])
    return jnp.pad(a, pad)


def _pack_gates(w_t, H, Hp):
    """(in, 4H) -> (in, 4Hp): zero-pad each of the 4 gate blocks to Hp lanes."""
    in_dim = w_t.shape[0]
    return _pad_to(w_t.reshape(in_dim, 4, H), 2, Hp).reshape(in_dim, 4 * Hp)


def _pack_gate_bias(b, H, Hp):
    return _pad_to(b.reshape(4, H), 1, Hp).reshape(1, 4 * Hp)


# -----------------------------------------------------------------------------
# Wrapper: embedding gather (glue), weight re-layout, pallas_call.
# -----------------------------------------------------------------------------
@jax.jit
def tramit_predictor_forward(x_tokens, params):
    B, T = x_tokens.shape
    V, E = params["embedding"].shape
    H = params["w_hh_l0"].shape[1]
    Hp = 128                       # lane-aligned hidden (pad 64 -> 128)
    Vp = 128                       # lane-dense output   (pad 16 -> 128)
    Bp = max(8, ((B + 7) // 8) * 8)  # sublane-aligned batch (pad 2 -> 8)

    # Pad batch with token 0 rows; padded rows are computed and discarded.
    x_pad = jnp.pad(x_tokens, ((0, Bp - B), (0, 0)))

    # Time-major gather straight from the table (no separate transpose HLO),
    # flattened to (T*Bp, E) rows for the hoisted layer-1 projection matmul.
    emb = params["embedding"][x_pad.T].astype(jnp.bfloat16)       # (T, Bp, E)
    emb2d = emb.reshape(T * Bp, E)

    # ---- LSTM layer 0 (weights -> (in, out), gates lane-padded, bf16) ------
    wih1 = _pack_gates(params["w_ih_l0"].T, H, Hp).astype(jnp.bfloat16)
    whh1 = _pack_gates(_pad_to(params["w_hh_l0"].T, 0, Hp),
                       H, Hp).astype(jnp.bfloat16)
    b1 = _pack_gate_bias(params["b_ih_l0"] + params["b_hh_l0"], H, Hp)  # f32

    # ---- LSTM layer 1: fuse Wih/Whh into one (2Hp, 4Hp) matrix -------------
    wih2 = _pack_gates(_pad_to(params["w_ih_l1"].T, 0, Hp), H, Hp)
    whh2 = _pack_gates(_pad_to(params["w_hh_l1"].T, 0, Hp), H, Hp)
    w2cat = jnp.concatenate([wih2, whh2], axis=0).astype(jnp.bfloat16)
    b2 = _pack_gate_bias(params["b_ih_l1"] + params["b_hh_l1"], H, Hp)  # f32

    # ---- FC head (padded, bf16 weights / f32 biases) -----------------------
    wf1 = _pad_to(_pad_to(params["fc1_w"].T, 0, Hp), 1, Hp).astype(jnp.bfloat16)
    bf1 = _pad_to(params["fc1_b"][None, :], 1, Hp)
    wf2 = _pad_to(_pad_to(params["fc2_w"].T, 0, Hp), 1, Vp).astype(jnp.bfloat16)
    bf2 = _pad_to(params["fc2_b"][None, :], 1, Vp)

    vmem = pl.BlockSpec(memory_space=pltpu.MemorySpace.VMEM)
    kernel = functools.partial(tramit_kernel, T=T, B=Bp)
    # TODO(synk): if T or B grows, move emb to memory_space=pl.ANY with a
    # manual double-buffer (or a grid over T), and add a batch grid with
    # dimension_semantics=("parallel",) so both v7x TensorCores are used.
    out_p = pl.pallas_call(
        kernel,
        out_shape=jax.ShapeDtypeStruct((Bp, Vp), jnp.float32),
        in_specs=[vmem] * 10,
        out_specs=vmem,
    )(emb2d, wih1, whh1, b1, w2cat, b2, wf1, bf1, wf2, bf2)
    return out_p[:B, :V]


# -----------------------------------------------------------------------------
# Pure-JAX f32 reference (same math as PyTorch) for a correctness check.
# -----------------------------------------------------------------------------
def reference_forward(x_tokens, params):
    B, T = x_tokens.shape
    H = params["w_hh_l0"].shape[1]
    emb = params["embedding"][x_tokens].astype(jnp.float32)   # (B, T, E)

    def cell(x_t, h, c, wih, whh, b_ih, b_hh):
        gates = x_t @ wih.T + b_ih + h @ whh.T + b_hh
        i = jax.nn.sigmoid(gates[:, 0 * H:1 * H])
        f = jax.nn.sigmoid(gates[:, 1 * H:2 * H])
        g = jnp.tanh(gates[:, 2 * H:3 * H])
        o = jax.nn.sigmoid(gates[:, 3 * H:4 * H])
        c = f * c + i * g
        return o * jnp.tanh(c), c

    h1 = c1 = h2 = c2 = jnp.zeros((B, H), jnp.float32)
    for t in range(T):
        h1, c1 = cell(emb[:, t, :], h1, c1, params["w_ih_l0"],
                      params["w_hh_l0"], params["b_ih_l0"], params["b_hh_l0"])
        h2, c2 = cell(h1, h2, c2, params["w_ih_l1"], params["w_hh_l1"],
                      params["b_ih_l1"], params["b_hh_l1"])
    y = jnp.maximum(h2 @ params["fc1_w"].T + params["fc1_b"], 0.0)
    return y @ params["fc2_w"].T + params["fc2_b"]


if __name__ == "__main__":
    num_tramits = 16
    embedding_dim = 32
    hidden_dim = 64
    batch = 2
    seq = 8

    key = jax.random.PRNGKey(0)
    k_x, k_p = jax.random.split(key)
    x_tokens = jax.random.randint(k_x, (batch, seq), 0, num_tramits, jnp.int32)
    params = init_params(k_p, num_tramits, embedding_dim, hidden_dim)

    out = tramit_predictor_forward(x_tokens, params)
    out = jax.block_until_ready(out)

    ref = reference_forward(x_tokens, params)
    assert out.shape == (batch, num_tramits)
    # bf16 MXU operands (f32 accumulation / gate math) -> relaxed tolerance.
    assert jnp.allclose(out, ref, atol=2e-2, rtol=2e-2), "mismatch vs reference"

    print("KERNEL_OK")
</pallas_src>

<mosaic_0001>
module attributes {stable_mosaic.version = 11 : i64} {
  func.func @tramit_kernel(%arg0: memref<64x32xbf16, #tpu.memory_space<vmem>>, %arg1: memref<32x512xbf16, #tpu.memory_space<vmem>>, %arg2: memref<128x512xbf16, #tpu.memory_space<vmem>>, %arg3: memref<1x512xf32, #tpu.memory_space<vmem>>, %arg4: memref<256x512xbf16, #tpu.memory_space<vmem>>, %arg5: memref<1x512xf32, #tpu.memory_space<vmem>>, %arg6: memref<128x128xbf16, #tpu.memory_space<vmem>>, %arg7: memref<1x128xf32, #tpu.memory_space<vmem>>, %arg8: memref<128x128xbf16, #tpu.memory_space<vmem>>, %arg9: memref<1x128xf32, #tpu.memory_space<vmem>>, %arg10: memref<8x128xf32, #tpu.memory_space<vmem>>) attributes {dimension_semantics = [], scalar_prefetch = 0 : i64, scratch_operands = 0 : i64, tpu.core_type = #tpu.core_type<tc>} {
    %c0 = arith.constant 0 : index
    %c0_0 = arith.constant 0 : index
    %0 = vector.load %arg0[%c0, %c0_0] : memref<64x32xbf16, #tpu.memory_space<vmem>>, vector<64x32xbf16>
    %c0_1 = arith.constant 0 : index
    %c0_2 = arith.constant 0 : index
    %1 = vector.load %arg1[%c0_1, %c0_2] : memref<32x512xbf16, #tpu.memory_space<vmem>>, vector<32x512xbf16>
    %cst = arith.constant dense<0.000000e+00> : vector<64x512xf32>
    %2 = tpu.matmul %0, %1, %cst {dimension_numbers = #tpu.dot_dimension_numbers<[1], [0], [0], [1], [0, 0, 1, 1], [], []>} : vector<64x32xbf16>, vector<32x512xbf16>, vector<64x512xf32> -> vector<64x512xf32>
    %c0_3 = arith.constant 0 : index
    %c0_4 = arith.constant 0 : index
    %3 = vector.load %arg3[%c0_3, %c0_4] : memref<1x512xf32, #tpu.memory_space<vmem>>, vector<1x512xf32>
    %4 = vector.broadcast %3 : vector<1x512xf32> to vector<64x512xf32>
    %5 = arith.addf %2, %4 : vector<64x512xf32>
    %c0_5 = arith.constant 0 : index
    %c0_6 = arith.constant 0 : index
    %6 = vector.load %arg2[%c0_5, %c0_6] : memref<128x512xbf16, #tpu.memory_space<vmem>>, vector<128x512xbf16>
    %c0_7 = arith.constant 0 : index
    %c0_8 = arith.constant 0 : index
    %7 = vector.load %arg4[%c0_7, %c0_8] : memref<256x512xbf16, #tpu.memory_space<vmem>>, vector<256x512xbf16>
    %c0_9 = arith.constant 0 : index
    %c0_10 = arith.constant 0 : index
    %8 = vector.load %arg5[%c0_9, %c0_10] : memref<1x512xf32, #tpu.memory_space<vmem>>, vector<1x512xf32>
    %9 = vector.shape_cast %8 : vector<1x512xf32> to vector<1x512xf32>
    %10 = vector.broadcast %9 : vector<1x512xf32> to vector<8x512xf32>
    %cst_11 = arith.constant 0.000000e+00 : f32
    %11 = vector.broadcast %cst_11 : f32 to vector<8x128xf32>
    %12 = vector.extract_strided_slice %5 {offsets = [0, 0], sizes = [8, 512], strides = [1, 1]} : vector<64x512xf32> to vector<8x512xf32>
    %13 = arith.truncf %11 : vector<8x128xf32> to vector<8x128xbf16>
    %cst_12 = arith.constant dense<0.000000e+00> : vector<8x512xf32>
    %14 = tpu.matmul %13, %6, %cst_12 {dimension_numbers = #tpu.dot_dimension_numbers<[1], [0], [0], [1], [0, 0, 1, 1], [], []>} : vector<8x128xbf16>, vector<128x512xbf16>, vector<8x512xf32> -> vector<8x512xf32>
    %15 = arith.addf %12, %14 : vector<8x512xf32>
    %16 = vector.extract_strided_slice %15 {offsets = [0, 0], sizes = [8, 128], strides = [1, 1]} : vector<8x512xf32> to vector<8x128xf32>
    %17 = arith.negf %16 : vector<8x128xf32>
    %18 = math.exp %17 : vector<8x128xf32>
    %cst_13 = arith.constant 1.000000e+00 : f32
    %19 = vector.broadcast %cst_13 : f32 to vector<8x128xf32>
    %20 = arith.addf %19, %18 : vector<8x128xf32>
    %21 = arith.divf %19, %20 : vector<8x128xf32>
    %22 = vector.extract_strided_slice %15 {offsets = [0, 128], sizes = [8, 128], strides = [1, 1]} : vector<8x512xf32> to vector<8x128xf32>
    %23 = arith.negf %22 : vector<8x128xf32>
    %24 = math.exp %23 : vector<8x128xf32>
    %cst_14 = arith.constant 1.000000e+00 : f32
    %25 = vector.broadcast %cst_14 : f32 to vector<8x128xf32>
    %26 = arith.addf %25, %24 : vector<8x128xf32>
    %27 = arith.divf %25, %26 : vector<8x128xf32>
    %28 = vector.extract_strided_slice %15 {offsets = [0, 256], sizes = [8, 128], strides = [1, 1]} : vector<8x512xf32> to vector<8x128xf32>
    %29 = math.tanh %28 : vector<8x128xf32>
    %30 = vector.extract_strided_slice %15 {offsets = [0, 384], sizes = [8, 128], strides = [1, 1]} : vector<8x512xf32> to vector<8x128xf32>
    %31 = arith.negf %30 : vector<8x128xf32>
    %32 = math.exp %31 : vector<8x128xf32>
    %cst_15 = arith.constant 1.000000e+00 : f32
    %33 = vector.broadcast %cst_15 : f32 to vector<8x128xf32>
    %34 = arith.addf %33, %32 : vector<8x128xf32>
    %35 = arith.divf %33, %34 : vector<8x128xf32>
    %36 = arith.mulf %27, %11 : vector<8x128xf32>
    %37 = arith.mulf %21, %29 : vector<8x128xf32>
    %38 = arith.addf %36, %37 : vector<8x128xf32>
    %39 = math.tanh %38 : vector<8x128xf32>
    %40 = arith.mulf %35, %39 : vector<8x128xf32>
    %41 = tpu.concatenate %40, %11 in 1 : vector<8x128xf32>, vector<8x128xf32> -> vector<8x256xf32>
    %42 = arith.truncf %41 : vector<8x256xf32> to vector<8x256xbf16>
    %cst_16 = arith.constant dense<0.000000e+00> : vector<8x512xf32>
    %43 = tpu.matmul %42, %7, %cst_16 {dimension_numbers = #tpu.dot_dimension_numbers<[1], [0], [0], [1], [0, 0, 1, 1], [], []>} : vector<8x256xbf16>, vector<256x512xbf16>, vector<8x512xf32> -> vector<8x512xf32>
    %44 = arith.addf %10, %43 : vector<8x512xf32>
    %45 = vector.extract_strided_slice %44 {offsets = [0, 0], sizes = [8, 128], strides = [1, 1]} : vector<8x512xf32> to vector<8x128xf32>
    %46 = arith.negf %45 : vector<8x128xf32>
    %47 = math.exp %46 : vector<8x128xf32>
    %cst_17 = arith.constant 1.000000e+00 : f32
    %48 = vector.broadcast %cst_17 : f32 to vector<8x128xf32>
    %49 = arith.addf %48, %47 : vector<8x128xf32>
    %50 = arith.divf %48, %49 : vector<8x128xf32>
    %51 = vector.extract_strided_slice %44 {offsets = [0, 128], sizes = [8, 128], strides = [1, 1]} : vector<8x512xf32> to vector<8x128xf32>
    %52 = arith.negf %51 : vector<8x128xf32>
    %53 = math.exp %52 : vector<8x128xf32>
    %cst_18 = arith.constant 1.000000e+00 : f32
    %54 = vector.broadcast %cst_18 : f32 to vector<8x128xf32>
    %55 = arith.addf %54, %53 : vector<8x128xf32>
    %56 = arith.divf %54, %55 : vector<8x128xf32>
    %57 = vector.extract_strided_slice %44 {offsets = [0, 256], sizes = [8, 128], strides = [1, 1]} : vector<8x512xf32> to vector<8x128xf32>
    %58 = math.tanh %57 : vector<8x128xf32>
    %59 = vector.extract_strided_slice %44 {offsets = [0, 384], sizes = [8, 128], strides = [1, 1]} : vector<8x512xf32> to vector<8x128xf32>
    %60 = arith.negf %59 : vector<8x128xf32>
    %61 = math.exp %60 : vector<8x128xf32>
    %cst_19 = arith.constant 1.000000e+00 : f32
    %62 = vector.broadcast %cst_19 : f32 to vector<8x128xf32>
    %63 = arith.addf %62, %61 : vector<8x128xf32>
    %64 = arith.divf %62, %63 : vector<8x128xf32>
    %65 = arith.mulf %56, %11 : vector<8x128xf32>
    %66 = arith.mulf %50, %58 : vector<8x128xf32>
    %67 = arith.addf %65, %66 : vector<8x128xf32>
    %68 = math.tanh %67 : vector<8x128xf32>
    %69 = arith.mulf %64, %68 : vector<8x128xf32>
    %70 = vector.extract_strided_slice %5 {offsets = [8, 0], sizes = [8, 512], strides = [1, 1]} : vector<64x512xf32> to vector<8x512xf32>
    %71 = arith.truncf %40 : vector<8x128xf32> to vector<8x128xbf16>
    %cst_20 = arith.constant dense<0.000000e+00> : vector<8x512xf32>
    %72 = tpu.matmul %71, %6, %cst_20 {dimension_numbers = #tpu.dot_dimension_numbers<[1], [0], [0], [1], [0, 0, 1, 1], [], []>} : vector<8x128xbf16>, vector<128x512xbf16>, vector<8x512xf32> -> vector<8x512xf32>
    %73 = arith.addf %70, %72 : vector<8x512xf32>
    %74 = vector.extract_strided_slice %73 {offsets = [0, 0], sizes = [8, 128], strides = [1, 1]} : vector<8x512xf32> to vector<8x128xf32>
    %75 = arith.negf %74 : vector<8x128xf32>
    %76 = math.exp %75 : vector<8x128xf32>
    %cst_21 = arith.constant 1.000000e+00 : f32
    %77 = vector.broadcast %cst_21 : f32 to vector<8x128xf32>
    %78 = arith.addf %77, %76 : vector<8x128xf32>
    %79 = arith.divf %77, %78 : vector<8x128xf32>
    %80 = vector.extract_strided_slice %73 {offsets = [0, 128], sizes = [8, 128], strides = [1, 1]} : vector<8x512xf32> to vector<8x128xf32>
    %81 = arith.negf %80 : vector<8x128xf32>
    %82 = math.exp %81 : vector<8x128xf32>
    %cst_22 = arith.constant 1.000000e+00 : f32
    %83 = vector.broadcast %cst_22 : f32 to vector<8x128xf32>
    %84 = arith.addf %83, %82 : vector<8x128xf32>
    %85 = arith.divf %83, %84 : vector<8x128xf32>
    %86 = vector.extract_strided_slice %73 {offsets = [0, 256], sizes = [8, 128], strides = [1, 1]} : vector<8x512xf32> to vector<8x128xf32>
    %87 = math.tanh %86 : vector<8x128xf32>
    %88 = vector.extract_strided_slice %73 {offsets = [0, 384], sizes = [8, 128], strides = [1, 1]} : vector<8x512xf32> to vector<8x128xf32>
    %89 = arith.negf %88 : vector<8x128xf32>
    %90 = math.exp %89 : vector<8x128xf32>
    %cst_23 = arith.constant 1.000000e+00 : f32
    %91 = vector.broadcast %cst_23 : f32 to vector<8x128xf32>
    %92 = arith.addf %91, %90 : vector<8x128xf32>
    %93 = arith.divf %91, %92 : vector<8x128xf32>
    %94 = arith.mulf %85, %38 : vector<8x128xf32>
    %95 = arith.mulf %79, %87 : vector<8x128xf32>
    %96 = arith.addf %94, %95 : vector<8x128xf32>
    %97 = math.tanh %96 : vector<8x128xf32>
    %98 = arith.mulf %93, %97 : vector<8x128xf32>
    %99 = tpu.concatenate %98, %69 in 1 : vector<8x128xf32>, vector<8x128xf32> -> vector<8x256xf32>
    %100 = arith.truncf %99 : vector<8x256xf32> to vector<8x256xbf16>
    %cst_24 = arith.constant dense<0.000000e+00> : vector<8x512xf32>
    %101 = tpu.matmul %100, %7, %cst_24 {dimension_numbers = #tpu.dot_dimension_numbers<[1], [0], [0], [1], [0, 0, 1, 1], [], []>} : vector<8x256xbf16>, vector<256x512xbf16>, vector<8x512xf32> -> vector<8x512xf32>
    %102 = arith.addf %10, %101 : vector<8x512xf32>
    %103 = vector.extract_strided_slice %102 {offsets = [0, 0], sizes = [8, 128], strides = [1, 1]} : vector<8x512xf32> to vector<8x128xf32>
    %104 = arith.negf %103 : vector<8x128xf32>
    %105 = math.exp %104 : vector<8x128xf32>
    %cst_25 = arith.constant 1.000000e+00 : f32
    %106 = vector.broadcast %cst_25 : f32 to vector<8x128xf32>
    %107 = arith.addf %106, %105 : vector<8x128xf32>
    %108 = arith.divf %106, %107 : vector<8x128xf32>
    %109 = vector.extract_strided_slice %102 {offsets = [0, 128], sizes = [8, 128], strides = [1, 1]} : vector<8x512xf32> to vector<8x128xf32>
    %110 = arith.negf %109 : vector<8x128xf32>
    %111 = math.exp %110 : vector<8x128xf32>
    %cst_26 = arith.constant 1.000000e+00 : f32
    %112 = vector.broadcast %cst_26 : f32 to vector<8x128xf32>
    %113 = arith.addf %112, %111 : vector<8x128xf32>
    %114 = arith.divf %112, %113 : vector<8x128xf32>
    %115 = vector.extract_strided_slice %102 {offsets = [0, 256], sizes = [8, 128], strides = [1, 1]} : vector<8x512xf32> to vector<8x128xf32>
    %116 = math.tanh %115 : vector<8x128xf32>
    %117 = vector.extract_strided_slice %102 {offsets = [0, 384], sizes = [8, 128], strides = [1, 1]} : vector<8x512xf32> to vector<8x128xf32>
    %118 = arith.negf %117 : vector<8x128xf32>
    %119 = math.exp %118 : vector<8x128xf32>
    %cst_27 = arith.constant 1.000000e+00 : f32
    %120 = vector.broadcast %cst_27 : f32 to vector<8x128xf32>
    %121 = arith.addf %120, %119 : vector<8x128xf32>
    %122 = arith.divf %120, %121 : vector<8x128xf32>
    %123 = arith.mulf %114, %67 : vector<8x128xf32>
    %124 = arith.mulf %108, %116 : vector<8x128xf32>
    %125 = arith.addf %123, %124 : vector<8x128xf32>
    %126 = math.tanh %125 : vector<8x128xf32>
    %127 = arith.mulf %122, %126 : vector<8x128xf32>
    %128 = vector.extract_strided_slice %5 {offsets = [16, 0], sizes = [8, 512], strides = [1, 1]} : vector<64x512xf32> to vector<8x512xf32>
    %129 = arith.truncf %98 : vector<8x128xf32> to vector<8x128xbf16>
    %cst_28 = arith.constant dense<0.000000e+00> : vector<8x512xf32>
    %130 = tpu.matmul %129, %6, %cst_28 {dimension_numbers = #tpu.dot_dimension_numbers<[1], [0], [0], [1], [0, 0, 1, 1], [], []>} : vector<8x128xbf16>, vector<128x512xbf16>, vector<8x512xf32> -> vector<8x512xf32>
    %131 = arith.addf %128, %130 : vector<8x512xf32>
    %132 = vector.extract_strided_slice %131 {offsets = [0, 0], sizes = [8, 128], strides = [1, 1]} : vector<8x512xf32> to vector<8x128xf32>
    %133 = arith.negf %132 : vector<8x128xf32>
    %134 = math.exp %133 : vector<8x128xf32>
    %cst_29 = arith.constant 1.000000e+00 : f32
    %135 = vector.broadcast %cst_29 : f32 to vector<8x128xf32>
    %136 = arith.addf %135, %134 : vector<8x128xf32>
    %137 = arith.divf %135, %136 : vector<8x128xf32>
    %138 = vector.extract_strided_slice %131 {offsets = [0, 128], sizes = [8, 128], strides = [1, 1]} : vector<8x512xf32> to vector<8x128xf32>
    %139 = arith.negf %138 : vector<8x128xf32>
    %140 = math.exp %139 : vector<8x128xf32>
    %cst_30 = arith.constant 1.000000e+00 : f32
    %141 = vector.broadcast %cst_30 : f32 to vector<8x128xf32>
    %142 = arith.addf %141, %140 : vector<8x128xf32>
    %143 = arith.divf %141, %142 : vector<8x128xf32>
    %144 = vector.extract_strided_slice %131 {offsets = [0, 256], sizes = [8, 128], strides = [1, 1]} : vector<8x512xf32> to vector<8x128xf32>
    %145 = math.tanh %144 : vector<8x128xf32>
    %146 = vector.extract_strided_slice %131 {offsets = [0, 384], sizes = [8, 128], strides = [1, 1]} : vector<8x512xf32> to vector<8x128xf32>
    %147 = arith.negf %146 : vector<8x128xf32>
    %148 = math.exp %147 : vector<8x128xf32>
    %cst_31 = arith.constant 1.000000e+00 : f32
    %149 = vector.broadcast %cst_31 : f32 to vector<8x128xf32>
    %150 = arith.addf %149, %148 : vector<8x128xf32>
    %151 = arith.divf %149, %150 : vector<8x128xf32>
    %152 = arith.mulf %143, %96 : vector<8x128xf32>
    %153 = arith.mulf %137, %145 : vector<8x128xf32>
    %154 = arith.addf %152, %153 : vector<8x128xf32>
    %155 = math.tanh %154 : vector<8x128xf32>
    %156 = arith.mulf %151, %155 : vector<8x128xf32>
    %157 = tpu.concatenate %156, %127 in 1 : vector<8x128xf32>, vector<8x128xf32> -> vector<8x256xf32>
    %158 = arith.truncf %157 : vector<8x256xf32> to vector<8x256xbf16>
    %cst_32 = arith.constant dense<0.000000e+00> : vector<8x512xf32>
    %159 = tpu.matmul %158, %7, %cst_32 {dimension_numbers = #tpu.dot_dimension_numbers<[1], [0], [0], [1], [0, 0, 1, 1], [], []>} : vector<8x256xbf16>, vector<256x512xbf16>, vector<8x512xf32> -> vector<8x512xf32>
    %160 = arith.addf %10, %159 : vector<8x512xf32>
    %161 = vector.extract_strided_slice %160 {offsets = [0, 0], sizes = [8, 128], strides = [1, 1]} : vector<8x512xf32> to vector<8x128xf32>
    %162 = arith.negf %161 : vector<8x128xf32>
    %163 = math.exp %162 : vector<8x128xf32>
    %cst_33 = arith.constant 1.000000e+00 : f32
    %164 = vector.broadcast %cst_33 : f32 to vector<8x128xf32>
    %165 = arith.addf %164, %163 : vector<8x128xf32>
    %166 = arith.divf %164, %165 : vector<8x128xf32>
    %167 = vector.extract_strided_slice %160 {offsets = [0, 128], sizes = [8, 128], strides = [1, 1]} : vector<8x512xf32> to vector<8x128xf32>
    %168 = arith.negf %167 : vector<8x128xf32>
    %169 = math.exp %168 : vector<8x128xf32>
    %cst_34 = arith.constant 1.000000e+00 : f32
    %170 = vector.broadcast %cst_34 : f32 to vector<8x128xf32>
    %171 = arith.addf %170, %169 : vector<8x128xf32>
    %172 = arith.divf %170, %171 : vector<8x128xf32>
    %173 = vector.extract_strided_slice %160 {offsets = [0, 256], sizes = [8, 128], strides = [1, 1]} : vector<8x512xf32> to vector<8x128xf32>
    %174 = math.tanh %173 : vector<8x128xf32>
    %175 = vector.extract_strided_slice %160 {offsets = [0, 384], sizes = [8, 128], strides = [1, 1]} : vector<8x512xf32> to vector<8x128xf32>
    %176 = arith.negf %175 : vector<8x128xf32>
    %177 = math.exp %176 : vector<8x128xf32>
    %cst_35 = arith.constant 1.000000e+00 : f32
    %178 = vector.broadcast %cst_35 : f32 to vector<8x128xf32>
    %179 = arith.addf %178, %177 : vector<8x128xf32>
    %180 = arith.divf %178, %179 : vector<8x128xf32>
    %181 = arith.mulf %172, %125 : vector<8x128xf32>
    %182 = arith.mulf %166, %174 : vector<8x128xf32>
    %183 = arith.addf %181, %182 : vector<8x128xf32>
    %184 = math.tanh %183 : vector<8x128xf32>
    %185 = arith.mulf %180, %184 : vector<8x128xf32>
    %186 = vector.extract_strided_slice %5 {offsets = [24, 0], sizes = [8, 512], strides = [1, 1]} : vector<64x512xf32> to vector<8x512xf32>
    %187 = arith.truncf %156 : vector<8x128xf32> to vector<8x128xbf16>
    %cst_36 = arith.constant dense<0.000000e+00> : vector<8x512xf32>
    %188 = tpu.matmul %187, %6, %cst_36 {dimension_numbers = #tpu.dot_dimension_numbers<[1], [0], [0], [1], [0, 0, 1, 1], [], []>} : vector<8x128xbf16>, vector<128x512xbf16>, vector<8x512xf32> -> vector<8x512xf32>
    %189 = arith.addf %186, %188 : vector<8x512xf32>
    %190 = vector.extract_strided_slice %189 {offsets = [0, 0], sizes = [8, 128], strides = [1, 1]} : vector<8x512xf32> to vector<8x128xf32>
    %191 = arith.negf %190 : vector<8x128xf32>
    %192 = math.exp %191 : vector<8x128xf32>
    %cst_37 = arith.constant 1.000000e+00 : f32
    %193 = vector.broadcast %cst_37 : f32 to vector<8x128xf32>
    %194 = arith.addf %193, %192 : vector<8x128xf32>
    %195 = arith.divf %193, %194 : vector<8x128xf32>
    %196 = vector.extract_strided_slice %189 {offsets = [0, 128], sizes = [8, 128], strides = [1, 1]} : vector<8x512xf32> to vector<8x128xf32>
    %197 = arith.negf %196 : vector<8x128xf32>
    %198 = math.exp %197 : vector<8x128xf32>
    %cst_38 = arith.constant 1.000000e+00 : f32
    %199 = vector.broadcast %cst_38 : f32 to vector<8x128xf32>
    %200 = arith.addf %199, %198 : vector<8x128xf32>
    %201 = arith.divf %199, %200 : vector<8x128xf32>
    %202 = vector.extract_strided_slice %189 {offsets = [0, 256], sizes = [8, 128], strides = [1, 1]} : vector<8x512xf32> to vector<8x128xf32>
    %203 = math.tanh %202 : vector<8x128xf32>
    %204 = vector.extract_strided_slice %189 {offsets = [0, 384], sizes = [8, 128], strides = [1, 1]} : vector<8x512xf32> to vector<8x128xf32>
    %205 = arith.negf %204 : vector<8x128xf32>
    %206 = math.exp %205 : vector<8x128xf32>
    %cst_39 = arith.constant 1.000000e+00 : f32
    %207 = vector.broadcast %cst_39 : f32 to vector<8x128xf32>
    %208 = arith.addf %207, %206 : vector<8x128xf32>
    %209 = arith.divf %207, %208 : vector<8x128xf32>
    %210 = arith.mulf %201, %154 : vector<8x128xf32>
    %211 = arith.mulf %195, %203 : vector<8x128xf32>
    %212 = arith.addf %210, %211 : vector<8x128xf32>
    %213 = math.tanh %212 : vector<8x128xf32>
    %214 = arith.mulf %209, %213 : vector<8x128xf32>
    %215 = tpu.concatenate %214, %185 in 1 : vector<8x128xf32>, vector<8x128xf32> -> vector<8x256xf32>
    %216 = arith.truncf %215 : vector<8x256xf32> to vector<8x256xbf16>
    %cst_40 = arith.constant dense<0.000000e+00> : vector<8x512xf32>
    %217 = tpu.matmul %216, %7, %cst_40 {dimension_numbers = #tpu.dot_dimension_numbers<[1], [0], [0], [1], [0, 0, 1, 1], [], []>} : vector<8x256xbf16>, vector<256x512xbf16>, vector<8x512xf32> -> vector<8x512xf32>
    %218 = arith.addf %10, %217 : vector<8x512xf32>
    %219 = vector.extract_strided_slice %218 {offsets = [0, 0], sizes = [8, 128], strides = [1, 1]} : vector<8x512xf32> to vector<8x128xf32>
    %220 = arith.negf %219 : vector<8x128xf32>
    %221 = math.exp %220 : vector<8x128xf32>
    %cst_41 = arith.constant 1.000000e+00 : f32
    %222 = vector.broadcast %cst_41 : f32 to vector<8x128xf32>
    %223 = arith.addf %222, %221 : vector<8x128xf32>
    %224 = arith.divf %222, %223 : vector<8x128xf32>
    %225 = vector.extract_strided_slice %218 {offsets = [0, 128], sizes = [8, 128], strides = [1, 1]} : vector<8x512xf32> to vector<8x128xf32>
    %226 = arith.negf %225 : vector<8x128xf32>
    %227 = math.exp %226 : vector<8x128xf32>
    %cst_42 = arith.constant 1.000000e+00 : f32
    %228 = vector.broadcast %cst_42 : f32 to vector<8x128xf32>
    %229 = arith.addf %228, %227 : vector<8x128xf32>
    %230 = arith.divf %228, %229 : vector<8x128xf32>
    %231 = vector.extract_strided_slice %218 {offsets = [0, 256], sizes = [8, 128], strides = [1, 1]} : vector<8x512xf32> to vector<8x128xf32>
    %232 = math.tanh %231 : vector<8x128xf32>
    %233 = vector.extract_strided_slice %218 {offsets = [0, 384], sizes = [8, 128], strides = [1, 1]} : vector<8x512xf32> to vector<8x128xf32>
    %234 = arith.negf %233 : vector<8x128xf32>
    %235 = math.exp %234 : vector<8x128xf32>
    %cst_43 = arith.constant 1.000000e+00 : f32
    %236 = vector.broadcast %cst_43 : f32 to vector<8x128xf32>
    %237 = arith.addf %236, %235 : vector<8x128xf32>
    %238 = arith.divf %236, %237 : vector<8x128xf32>
    %239 = arith.mulf %230, %183 : vector<8x128xf32>
    %240 = arith.mulf %224, %232 : vector<8x128xf32>
    %241 = arith.addf %239, %240 : vector<8x128xf32>
    %242 = math.tanh %241 : vector<8x128xf32>
    %243 = arith.mulf %238, %242 : vector<8x128xf32>
    %244 = vector.extract_strided_slice %5 {offsets = [32, 0], sizes = [8, 512], strides = [1, 1]} : vector<64x512xf32> to vector<8x512xf32>
    %245 = arith.truncf %214 : vector<8x128xf32> to vector<8x128xbf16>
    %cst_44 = arith.constant dense<0.000000e+00> : vector<8x512xf32>
    %246 = tpu.matmul %245, %6, %cst_44 {dimension_numbers = #tpu.dot_dimension_numbers<[1], [0], [0], [1], [0, 0, 1, 1], [], []>} : vector<8x128xbf16>, vector<128x512xbf16>, vector<8x512xf32> -> vector<8x512xf32>
    %247 = arith.addf %244, %246 : vector<8x512xf32>
    %248 = vector.extract_strided_slice %247 {offsets = [0, 0], sizes = [8, 128], strides = [1, 1]} : vector<8x512xf32> to vector<8x128xf32>
    %249 = arith.negf %248 : vector<8x128xf32>
    %250 = math.exp %249 : vector<8x128xf32>
    %cst_45 = arith.constant 1.000000e+00 : f32
    %251 = vector.broadcast %cst_45 : f32 to vector<8x128xf32>
    %252 = arith.addf %251, %250 : vector<8x128xf32>
    %253 = arith.divf %251, %252 : vector<8x128xf32>
    %254 = vector.extract_strided_slice %247 {offsets = [0, 128], sizes = [8, 128], strides = [1, 1]} : vector<8x512xf32> to vector<8x128xf32>
    %255 = arith.negf %254 : vector<8x128xf32>
    %256 = math.exp %255 : vector<8x128xf32>
    %cst_46 = arith.constant 1.000000e+00 : f32
    %257 = vector.broadcast %cst_46 : f32 to vector<8x128xf32>
    %258 = arith.addf %257, %256 : vector<8x128xf32>
    %259 = arith.divf %257, %258 : vector<8x128xf32>
    %260 = vector.extract_strided_slice %247 {offsets = [0, 256], sizes = [8, 128], strides = [1, 1]} : vector<8x512xf32> to vector<8x128xf32>
    %261 = math.tanh %260 : vector<8x128xf32>
    %262 = vector.extract_strided_slice %247 {offsets = [0, 384], sizes = [8, 128], strides = [1, 1]} : vector<8x512xf32> to vector<8x128xf32>
    %263 = arith.negf %262 : vector<8x128xf32>
    %264 = math.exp %263 : vector<8x128xf32>
    %cst_47 = arith.constant 1.000000e+00 : f32
    %265 = vector.broadcast %cst_47 : f32 to vector<8x128xf32>
    %266 = arith.addf %265, %264 : vector<8x128xf32>
    %267 = arith.divf %265, %266 : vector<8x128xf32>
    %268 = arith.mulf %259, %212 : vector<8x128xf32>
    %269 = arith.mulf %253, %261 : vector<8x128xf32>
    %270 = arith.addf %268, %269 : vector<8x128xf32>
    %271 = math.tanh %270 : vector<8x128xf32>
    %272 = arith.mulf %267, %271 : vector<8x128xf32>
    %273 = tpu.concatenate %272, %243 in 1 : vector<8x128xf32>, vector<8x128xf32> -> vector<8x256xf32>
    %274 = arith.truncf %273 : vector<8x256xf32> to vector<8x256xbf16>
    %cst_48 = arith.constant dense<0.000000e+00> : vector<8x512xf32>
    %275 = tpu.matmul %274, %7, %cst_48 {dimension_numbers = #tpu.dot_dimension_numbers<[1], [0], [0], [1], [0, 0, 1, 1], [], []>} : vector<8x256xbf16>, vector<256x512xbf16>, vector<8x512xf32> -> vector<8x512xf32>
    %276 = arith.addf %10, %275 : vector<8x512xf32>
    %277 = vector.extract_strided_slice %276 {offsets = [0, 0], sizes = [8, 128], strides = [1, 1]} : vector<8x512xf32> to vector<8x128xf32>
    %278 = arith.negf %277 : vector<8x128xf32>
    %279 = math.exp %278 : vector<8x128xf32>
    %cst_49 = arith.constant 1.000000e+00 : f32
    %280 = vector.broadcast %cst_49 : f32 to vector<8x128xf32>
    %281 = arith.addf %280, %279 : vector<8x128xf32>
    %282 = arith.divf %280, %281 : vector<8x128xf32>
    %283 = vector.extract_strided_slice %276 {offsets = [0, 128], sizes = [8, 128], strides = [1, 1]} : vector<8x512xf32> to vector<8x128xf32>
    %284 = arith.negf %283 : vector<8x128xf32>
    %285 = math.exp %284 : vector<8x128xf32>
    %cst_50 = arith.constant 1.000000e+00 : f32
    %286 = vector.broadcast %cst_50 : f32 to vector<8x128xf32>
    %287 = arith.addf %286, %285 : vector<8x128xf32>
    %288 = arith.divf %286, %287 : vector<8x128xf32>
    %289 = vector.extract_strided_slice %276 {offsets = [0, 256], sizes = [8, 128], strides = [1, 1]} : vector<8x512xf32> to vector<8x128xf32>
    %290 = math.tanh %289 : vector<8x128xf32>
    %291 = vector.extract_strided_slice %276 {offsets = [0, 384], sizes = [8, 128], strides = [1, 1]} : vector<8x512xf32> to vector<8x128xf32>
    %292 = arith.negf %291 : vector<8x128xf32>
    %293 = math.exp %292 : vector<8x128xf32>
    %cst_51 = arith.constant 1.000000e+00 : f32
    %294 = vector.broadcast %cst_51 : f32 to vector<8x128xf32>
    %295 = arith.addf %294, %293 : vector<8x128xf32>
    %296 = arith.divf %294, %295 : vector<8x128xf32>
    %297 = arith.mulf %288, %241 : vector<8x128xf32>
    %298 = arith.mulf %282, %290 : vector<8x128xf32>
    %299 = arith.addf %297, %298 : vector<8x128xf32>
    %300 = math.tanh %299 : vector<8x128xf32>
    %301 = arith.mulf %296, %300 : vector<8x128xf32>
    %302 = vector.extract_strided_slice %5 {offsets = [40, 0], sizes = [8, 512], strides = [1, 1]} : vector<64x512xf32> to vector<8x512xf32>
    %303 = arith.truncf %272 : vector<8x128xf32> to vector<8x128xbf16>
    %cst_52 = arith.constant dense<0.000000e+00> : vector<8x512xf32>
    %304 = tpu.matmul %303, %6, %cst_52 {dimension_numbers = #tpu.dot_dimension_numbers<[1], [0], [0], [1], [0, 0, 1, 1], [], []>} : vector<8x128xbf16>, vector<128x512xbf16>, vector<8x512xf32> -> vector<8x512xf32>
    %305 = arith.addf %302, %304 : vector<8x512xf32>
    %306 = vector.extract_strided_slice %305 {offsets = [0, 0], sizes = [8, 128], strides = [1, 1]} : vector<8x512xf32> to vector<8x128xf32>
    %307 = arith.negf %306 : vector<8x128xf32>
    %308 = math.exp %307 : vector<8x128xf32>
    %cst_53 = arith.constant 1.000000e+00 : f32
    %309 = vector.broadcast %cst_53 : f32 to vector<8x128xf32>
    %310 = arith.addf %309, %308 : vector<8x128xf32>
    %311 = arith.divf %309, %310 : vector<8x128xf32>
    %312 = vector.extract_strided_slice %305 {offsets = [0, 128], sizes = [8, 128], strides = [1, 1]} : vector<8x512xf32> to vector<8x128xf32>
    %313 = arith.negf %312 : vector<8x128xf32>
    %314 = math.exp %313 : vector<8x128xf32>
    %cst_54 = arith.constant 1.000000e+00 : f32
    %315 = vector.broadcast %cst_54 : f32 to vector<8x128xf32>
    %316 = arith.addf %315, %314 : vector<8x128xf32>
    %317 = arith.divf %315, %316 : vector<8x128xf32>
    %318 = vector.extract_strided_slice %305 {offsets = [0, 256], sizes = [8, 128], strides = [1, 1]} : vector<8x512xf32> to vector<8x128xf32>
    %319 = math.tanh %318 : vector<8x128xf32>
    %320 = vector.extract_strided_slice %305 {offsets = [0, 384], sizes = [8, 128], strides = [1, 1]} : vector<8x512xf32> to vector<8x128xf32>
    %321 = arith.negf %320 : vector<8x128xf32>
    %322 = math.exp %321 : vector<8x128xf32>
    %cst_55 = arith.constant 1.000000e+00 : f32
    %323 = vector.broadcast %cst_55 : f32 to vector<8x128xf32>
    %324 = arith.addf %323, %322 : vector<8x128xf32>
    %325 = arith.divf %323, %324 : vector<8x128xf32>
    %326 = arith.mulf %317, %270 : vector<8x128xf32>
    %327 = arith.mulf %311, %319 : vector<8x128xf32>
    %328 = arith.addf %326, %327 : vector<8x128xf32>
    %329 = math.tanh %328 : vector<8x128xf32>
    %330 = arith.mulf %325, %329 : vector<8x128xf32>
    %331 = tpu.concatenate %330, %301 in 1 : vector<8x128xf32>, vector<8x128xf32> -> vector<8x256xf32>
    %332 = arith.truncf %331 : vector<8x256xf32> to vector<8x256xbf16>
    %cst_56 = arith.constant dense<0.000000e+00> : vector<8x512xf32>
    %333 = tpu.matmul %332, %7, %cst_56 {dimension_numbers = #tpu.dot_dimension_numbers<[1], [0], [0], [1], [0, 0, 1, 1], [], []>} : vector<8x256xbf16>, vector<256x512xbf16>, vector<8x512xf32> -> vector<8x512xf32>
    %334 = arith.addf %10, %333 : vector<8x512xf32>
    %335 = vector.extract_strided_slice %334 {offsets = [0, 0], sizes = [8, 128], strides = [1, 1]} : vector<8x512xf32> to vector<8x128xf32>
    %336 = arith.negf %335 : vector<8x128xf32>
    %337 = math.exp %336 : vector<8x128xf32>
    %cst_57 = arith.constant 1.000000e+00 : f32
    %338 = vector.broadcast %cst_57 : f32 to vector<8x128xf32>
    %339 = arith.addf %338, %337 : vector<8x128xf32>
    %340 = arith.divf %338, %339 : vector<8x128xf32>
    %341 = vector.extract_strided_slice %334 {offsets = [0, 128], sizes = [8, 128], strides = [1, 1]} : vector<8x512xf32> to vector<8x128xf32>
    %342 = arith.negf %341 : vector<8x128xf32>
    %343 = math.exp %342 : vector<8x128xf32>
    %cst_58 = arith.constant 1.000000e+00 : f32
    %344 = vector.broadcast %cst_58 : f32 to vector<8x128xf32>
    %345 = arith.addf %344, %343 : vector<8x128xf32>
    %346 = arith.divf %344, %345 : vector<8x128xf32>
    %347 = vector.extract_strided_slice %334 {offsets = [0, 256], sizes = [8, 128], strides = [1, 1]} : vector<8x512xf32> to vector<8x128xf32>
    %348 = math.tanh %347 : vector<8x128xf32>
    %349 = vector.extract_strided_slice %334 {offsets = [0, 384], sizes = [8, 128], strides = [1, 1]} : vector<8x512xf32> to vector<8x128xf32>
    %350 = arith.negf %349 : vector<8x128xf32>
    %351 = math.exp %350 : vector<8x128xf32>
    %cst_59 = arith.constant 1.000000e+00 : f32
    %352 = vector.broadcast %cst_59 : f32 to vector<8x128xf32>
    %353 = arith.addf %352, %351 : vector<8x128xf32>
    %354 = arith.divf %352, %353 : vector<8x128xf32>
    %355 = arith.mulf %346, %299 : vector<8x128xf32>
    %356 = arith.mulf %340, %348 : vector<8x128xf32>
    %357 = arith.addf %355, %356 : vector<8x128xf32>
    %358 = math.tanh %357 : vector<8x128xf32>
    %359 = arith.mulf %354, %358 : vector<8x128xf32>
    %360 = vector.extract_strided_slice %5 {offsets = [48, 0], sizes = [8, 512], strides = [1, 1]} : vector<64x512xf32> to vector<8x512xf32>
    %361 = arith.truncf %330 : vector<8x128xf32> to vector<8x128xbf16>
    %cst_60 = arith.constant dense<0.000000e+00> : vector<8x512xf32>
    %362 = tpu.matmul %361, %6, %cst_60 {dimension_numbers = #tpu.dot_dimension_numbers<[1], [0], [0], [1], [0, 0, 1, 1], [], []>} : vector<8x128xbf16>, vector<128x512xbf16>, vector<8x512xf32> -> vector<8x512xf32>
    %363 = arith.addf %360, %362 : vector<8x512xf32>
    %364 = vector.extract_strided_slice %363 {offsets = [0, 0], sizes = [8, 128], strides = [1, 1]} : vector<8x512xf32> to vector<8x128xf32>
    %365 = arith.negf %364 : vector<8x128xf32>
    %366 = math.exp %365 : vector<8x128xf32>
    %cst_61 = arith.constant 1.000000e+00 : f32
    %367 = vector.broadcast %cst_61 : f32 to vector<8x128xf32>
    %368 = arith.addf %367, %366 : vector<8x128xf32>
    %369 = arith.divf %367, %368 : vector<8x128xf32>
    %370 = vector.extract_strided_slice %363 {offsets = [0, 128], sizes = [8, 128], strides = [1, 1]} : vector<8x512xf32> to vector<8x128xf32>
    %371 = arith.negf %370 : vector<8x128xf32>
    %372 = math.exp %371 : vector<8x128xf32>
    %cst_62 = arith.constant 1.000000e+00 : f32
    %373 = vector.broadcast %cst_62 : f32 to vector<8x128xf32>
    %374 = arith.addf %373, %372 : vector<8x128xf32>
    %375 = arith.divf %373, %374 : vector<8x128xf32>
    %376 = vector.extract_strided_slice %363 {offsets = [0, 256], sizes = [8, 128], strides = [1, 1]} : vector<8x512xf32> to vector<8x128xf32>
    %377 = math.tanh %376 : vector<8x128xf32>
    %378 = vector.extract_strided_slice %363 {offsets = [0, 384], sizes = [8, 128], strides = [1, 1]} : vector<8x512xf32> to vector<8x128xf32>
    %379 = arith.negf %378 : vector<8x128xf32>
    %380 = math.exp %379 : vector<8x128xf32>
    %cst_63 = arith.constant 1.000000e+00 : f32
    %381 = vector.broadcast %cst_63 : f32 to vector<8x128xf32>
    %382 = arith.addf %381, %380 : vector<8x128xf32>
    %383 = arith.divf %381, %382 : vector<8x128xf32>
    %384 = arith.mulf %375, %328 : vector<8x128xf32>
    %385 = arith.mulf %369, %377 : vector<8x128xf32>
    %386 = arith.addf %384, %385 : vector<8x128xf32>
    %387 = math.tanh %386 : vector<8x128xf32>
    %388 = arith.mulf %383, %387 : vector<8x128xf32>
    %389 = tpu.concatenate %388, %359 in 1 : vector<8x128xf32>, vector<8x128xf32> -> vector<8x256xf32>
    %390 = arith.truncf %389 : vector<8x256xf32> to vector<8x256xbf16>
    %cst_64 = arith.constant dense<0.000000e+00> : vector<8x512xf32>
    %391 = tpu.matmul %390, %7, %cst_64 {dimension_numbers = #tpu.dot_dimension_numbers<[1], [0], [0], [1], [0, 0, 1, 1], [], []>} : vector<8x256xbf16>, vector<256x512xbf16>, vector<8x512xf32> -> vector<8x512xf32>
    %392 = arith.addf %10, %391 : vector<8x512xf32>
    %393 = vector.extract_strided_slice %392 {offsets = [0, 0], sizes = [8, 128], strides = [1, 1]} : vector<8x512xf32> to vector<8x128xf32>
    %394 = arith.negf %393 : vector<8x128xf32>
    %395 = math.exp %394 : vector<8x128xf32>
    %cst_65 = arith.constant 1.000000e+00 : f32
    %396 = vector.broadcast %cst_65 : f32 to vector<8x128xf32>
    %397 = arith.addf %396, %395 : vector<8x128xf32>
    %398 = arith.divf %396, %397 : vector<8x128xf32>
    %399 = vector.extract_strided_slice %392 {offsets = [0, 128], sizes = [8, 128], strides = [1, 1]} : vector<8x512xf32> to vector<8x128xf32>
    %400 = arith.negf %399 : vector<8x128xf32>
    %401 = math.exp %400 : vector<8x128xf32>
    %cst_66 = arith.constant 1.000000e+00 : f32
    %402 = vector.broadcast %cst_66 : f32 to vector<8x128xf32>
    %403 = arith.addf %402, %401 : vector<8x128xf32>
    %404 = arith.divf %402, %403 : vector<8x128xf32>
    %405 = vector.extract_strided_slice %392 {offsets = [0, 256], sizes = [8, 128], strides = [1, 1]} : vector<8x512xf32> to vector<8x128xf32>
    %406 = math.tanh %405 : vector<8x128xf32>
    %407 = vector.extract_strided_slice %392 {offsets = [0, 384], sizes = [8, 128], strides = [1, 1]} : vector<8x512xf32> to vector<8x128xf32>
    %408 = arith.negf %407 : vector<8x128xf32>
    %409 = math.exp %408 : vector<8x128xf32>
    %cst_67 = arith.constant 1.000000e+00 : f32
    %410 = vector.broadcast %cst_67 : f32 to vector<8x128xf32>
    %411 = arith.addf %410, %409 : vector<8x128xf32>
    %412 = arith.divf %410, %411 : vector<8x128xf32>
    %413 = arith.mulf %404, %357 : vector<8x128xf32>
    %414 = arith.mulf %398, %406 : vector<8x128xf32>
    %415 = arith.addf %413, %414 : vector<8x128xf32>
    %416 = math.tanh %415 : vector<8x128xf32>
    %417 = arith.mulf %412, %416 : vector<8x128xf32>
    %418 = vector.extract_strided_slice %5 {offsets = [56, 0], sizes = [8, 512], strides = [1, 1]} : vector<64x512xf32> to vector<8x512xf32>
    %419 = arith.truncf %388 : vector<8x128xf32> to vector<8x128xbf16>
    %cst_68 = arith.constant dense<0.000000e+00> : vector<8x512xf32>
    %420 = tpu.matmul %419, %6, %cst_68 {dimension_numbers = #tpu.dot_dimension_numbers<[1], [0], [0], [1], [0, 0, 1, 1], [], []>} : vector<8x128xbf16>, vector<128x512xbf16>, vector<8x512xf32> -> vector<8x512xf32>
    %421 = arith.addf %418, %420 : vector<8x512xf32>
    %422 = vector.extract_strided_slice %421 {offsets = [0, 0], sizes = [8, 128], strides = [1, 1]} : vector<8x512xf32> to vector<8x128xf32>
    %423 = arith.negf %422 : vector<8x128xf32>
    %424 = math.exp %423 : vector<8x128xf32>
    %cst_69 = arith.constant 1.000000e+00 : f32
    %425 = vector.broadcast %cst_69 : f32 to vector<8x128xf32>
    %426 = arith.addf %425, %424 : vector<8x128xf32>
    %427 = arith.divf %425, %426 : vector<8x128xf32>
    %428 = vector.extract_strided_slice %421 {offsets = [0, 128], sizes = [8, 128], strides = [1, 1]} : vector<8x512xf32> to vector<8x128xf32>
    %429 = arith.negf %428 : vector<8x128xf32>
    %430 = math.exp %429 : vector<8x128xf32>
    %cst_70 = arith.constant 1.000000e+00 : f32
    %431 = vector.broadcast %cst_70 : f32 to vector<8x128xf32>
    %432 = arith.addf %431, %430 : vector<8x128xf32>
    %433 = arith.divf %431, %432 : vector<8x128xf32>
    %434 = vector.extract_strided_slice %421 {offsets = [0, 256], sizes = [8, 128], strides = [1, 1]} : vector<8x512xf32> to vector<8x128xf32>
    %435 = math.tanh %434 : vector<8x128xf32>
    %436 = vector.extract_strided_slice %421 {offsets = [0, 384], sizes = [8, 128], strides = [1, 1]} : vector<8x512xf32> to vector<8x128xf32>
    %437 = arith.negf %436 : vector<8x128xf32>
    %438 = math.exp %437 : vector<8x128xf32>
    %cst_71 = arith.constant 1.000000e+00 : f32
    %439 = vector.broadcast %cst_71 : f32 to vector<8x128xf32>
    %440 = arith.addf %439, %438 : vector<8x128xf32>
    %441 = arith.divf %439, %440 : vector<8x128xf32>
    %442 = arith.mulf %433, %386 : vector<8x128xf32>
    %443 = arith.mulf %427, %435 : vector<8x128xf32>
    %444 = arith.addf %442, %443 : vector<8x128xf32>
    %445 = math.tanh %444 : vector<8x128xf32>
    %446 = arith.mulf %441, %445 : vector<8x128xf32>
    %447 = tpu.concatenate %446, %417 in 1 : vector<8x128xf32>, vector<8x128xf32> -> vector<8x256xf32>
    %448 = arith.truncf %447 : vector<8x256xf32> to vector<8x256xbf16>
    %cst_72 = arith.constant dense<0.000000e+00> : vector<8x512xf32>
    %449 = tpu.matmul %448, %7, %cst_72 {dimension_numbers = #tpu.dot_dimension_numbers<[1], [0], [0], [1], [0, 0, 1, 1], [], []>} : vector<8x256xbf16>, vector<256x512xbf16>, vector<8x512xf32> -> vector<8x512xf32>
    %450 = arith.addf %10, %449 : vector<8x512xf32>
    %451 = vector.extract_strided_slice %450 {offsets = [0, 0], sizes = [8, 128], strides = [1, 1]} : vector<8x512xf32> to vector<8x128xf32>
    %452 = arith.negf %451 : vector<8x128xf32>
    %453 = math.exp %452 : vector<8x128xf32>
    %cst_73 = arith.constant 1.000000e+00 : f32
    %454 = vector.broadcast %cst_73 : f32 to vector<8x128xf32>
    %455 = arith.addf %454, %453 : vector<8x128xf32>
    %456 = arith.divf %454, %455 : vector<8x128xf32>
    %457 = vector.extract_strided_slice %450 {offsets = [0, 128], sizes = [8, 128], strides = [1, 1]} : vector<8x512xf32> to vector<8x128xf32>
    %458 = arith.negf %457 : vector<8x128xf32>
    %459 = math.exp %458 : vector<8x128xf32>
    %cst_74 = arith.constant 1.000000e+00 : f32
    %460 = vector.broadcast %cst_74 : f32 to vector<8x128xf32>
    %461 = arith.addf %460, %459 : vector<8x128xf32>
    %462 = arith.divf %460, %461 : vector<8x128xf32>
    %463 = vector.extract_strided_slice %450 {offsets = [0, 256], sizes = [8, 128], strides = [1, 1]} : vector<8x512xf32> to vector<8x128xf32>
    %464 = math.tanh %463 : vector<8x128xf32>
    %465 = vector.extract_strided_slice %450 {offsets = [0, 384], sizes = [8, 128], strides = [1, 1]} : vector<8x512xf32> to vector<8x128xf32>
    %466 = arith.negf %465 : vector<8x128xf32>
    %467 = math.exp %466 : vector<8x128xf32>
    %cst_75 = arith.constant 1.000000e+00 : f32
    %468 = vector.broadcast %cst_75 : f32 to vector<8x128xf32>
    %469 = arith.addf %468, %467 : vector<8x128xf32>
    %470 = arith.divf %468, %469 : vector<8x128xf32>
    %471 = arith.mulf %462, %415 : vector<8x128xf32>
    %472 = arith.mulf %456, %464 : vector<8x128xf32>
    %473 = arith.addf %471, %472 : vector<8x128xf32>
    %474 = math.tanh %473 : vector<8x128xf32>
    %475 = arith.mulf %470, %474 : vector<8x128xf32>
    %476 = arith.truncf %475 : vector<8x128xf32> to vector<8x128xbf16>
    %c0_76 = arith.constant 0 : index
    %c0_77 = arith.constant 0 : index
    %477 = vector.load %arg6[%c0_76, %c0_77] : memref<128x128xbf16, #tpu.memory_space<vmem>>, vector<128x128xbf16>
    %cst_78 = arith.constant dense<0.000000e+00> : vector<8x128xf32>
    %478 = tpu.matmul %476, %477, %cst_78 {dimension_numbers = #tpu.dot_dimension_numbers<[1], [0], [0], [1], [0, 0, 1, 1], [], []>} : vector<8x128xbf16>, vector<128x128xbf16>, vector<8x128xf32> -> vector<8x128xf32>
    %c0_79 = arith.constant 0 : index
    %c0_80 = arith.constant 0 : index
    %479 = vector.load %arg7[%c0_79, %c0_80] : memref<1x128xf32, #tpu.memory_space<vmem>>, vector<1x128xf32>
    %480 = vector.broadcast %479 : vector<1x128xf32> to vector<8x128xf32>
    %481 = arith.addf %478, %480 : vector<8x128xf32>
    %cst_81 = arith.constant 0.000000e+00 : f32
    %482 = vector.broadcast %cst_81 : f32 to vector<8x128xf32>
    %483 = arith.maximumf %481, %482 : vector<8x128xf32>
    %484 = arith.truncf %483 : vector<8x128xf32> to vector<8x128xbf16>
    %c0_82 = arith.constant 0 : index
    %c0_83 = arith.constant 0 : index
    %485 = vector.load %arg8[%c0_82, %c0_83] : memref<128x128xbf16, #tpu.memory_space<vmem>>, vector<128x128xbf16>
    %cst_84 = arith.constant dense<0.000000e+00> : vector<8x128xf32>
    %486 = tpu.matmul %484, %485, %cst_84 {dimension_numbers = #tpu.dot_dimension_numbers<[1], [0], [0], [1], [0, 0, 1, 1], [], []>} : vector<8x128xbf16>, vector<128x128xbf16>, vector<8x128xf32> -> vector<8x128xf32>
    %c0_85 = arith.constant 0 : index
    %c0_86 = arith.constant 0 : index
    %487 = vector.load %arg9[%c0_85, %c0_86] : memref<1x128xf32, #tpu.memory_space<vmem>>, vector<1x128xf32>
    %488 = vector.broadcast %487 : vector<1x128xf32> to vector<8x128xf32>
    %489 = arith.addf %486, %488 : vector<8x128xf32>
    %c0_87 = arith.constant 0 : index
    %c0_88 = arith.constant 0 : index
    %490 = vector.load %arg10[%c0_87, %c0_88] : memref<8x128xf32, #tpu.memory_space<vmem>>, vector<8x128xf32>
    tpu.vector_store %arg10[%c0_87, %c0_88], %489 {strides = array<i32>} : memref<8x128xf32, #tpu.memory_space<vmem>>, vector<8x128xf32>,
    return
  }
}

</mosaic_0001>

<bundles_post_ra>
// kernel: tramit_predictor_forward.1
= control target key start
LH: loop header
LB: loop body
LE: loop exit
PB: predicated region body
PF: predicated region fallthrough
CT: control target
= control target key end

     0   :  { %vm122_vm0 = vcmask 261120   ;;  %s6636_s1 = inlined_call_operand.vmem [shape: bf16[32,512], index: 1, kind: input, shape index: {}]   ;;  %s6637_s0 = inlined_call_operand.vmem [shape: bf16[64,32], index: 0, kind: input, shape index: {}]   ;;  %s6638_s2 = inlined_call_operand.vmem [shape: bf16[128,512], index: 2, kind: input, shape index: {}]   ;;  %s6639_s4 = inlined_call_operand.vmem [shape: bf16[256,512], index: 4, kind: input, shape index: {}]   ;;  %s6640_s3 = inlined_call_operand.vmem [shape: f32[1,512], index: 3, kind: input, shape index: {}]   ;;  %s6641_s5 = inlined_call_operand.vmem [shape: f32[1,512], index: 5, kind: input, shape index: {}]   ;;  %s6642_s7 = inlined_call_operand.vmem [shape: f32[1,128], index: 7, kind: input, shape index: {}]   ;;  %s6643_s6 = inlined_call_operand.vmem [shape: bf16[128,128], index: 6, kind: input, shape index: {}]   ;;  %s6644_s8 = inlined_call_operand.vmem [shape: bf16[128,128], index: 8, kind: input, shape index: {}]   ;;  %s6645_s9 = inlined_call_operand.vmem [shape: f32[1,128], index: 9, kind: input, shape index: {}]   ;;  %s6646_s10 = inlined_call_operand.vmem [shape: f32[8,128], index: 10, kind: output, shape index: {}]  }
   0x1   :  { %v3377_v0 = vld [vmem:[%s6636_s1 + $0x20] sm:$0xf]  ;;  %v3913_v1 = vld [vmem:[%s6636_s1 + $0x2c] sm:$0xf0]  ;;  %v3911_v2 = vld [vmem:[%s6636_s1 + $0x24] sm:$0xf] }
   0x2   :  { %v3378_v3 = vor.u32 %v3913_v1, %v3377_v0  ;;  %v3379_v4 = vld [vmem:[%s6636_s1 + $0x30] sm:$0xf0]  ;;  %v3361_v5 = vld [vmem:[%s6636_s1] sm:$0xf]  ;;  %v3909_v6 = vld [vmem:[%s6636_s1 + $0xc] sm:$0xf0] }
   0x3   :  { %v3382_v7 = vor.u32 %v3911_v2, %v3379_v4  ;;  %v3907_v8 = vld [vmem:[%s6636_s1 + $0x4] sm:$0xf]  ;;  %v3363_v9 = vld [vmem:[%s6636_s1 + $0x10] sm:$0xf0]  ;;  %v3362_v10 = vor.u32 %v3909_v6, %v3361_v5  ;;  %v3912_v11 = vld [vmem:[%s6636_s1 + $0x2c] sm:$0xf] }
   0x4   :  { %141 = vmatpush.bf16.msra.mxu0 %v3378_v3  ;;  %4027 = vmatpush.bf16.msra.mxu2 %v3378_v3  ;;  %v3387_v12 = vld [vmem:[%s6636_s1 + $0x38] sm:$0xf0]  ;;  %v3366_v13 = vor.u32 %v3907_v8, %v3363_v9  ;;  %v4381_v14 = vld [vmem:[%s6637_s0] sm:$0xff]  ;;  %v3908_v16 = vld [vmem:[%s6636_s1 + $0xc] sm:$0xf] }
   0x5   :  { %170 = vmatpush.bf16.msra.mxu1 %v3382_v7  ;;  %4029 = vmatpush.bf16.msra.mxu3 %v3382_v7  ;;  %v4386_v15 = vld [vmem:[%s6637_s0 + $0x18] sm:$0xff]  ;;  %v3385_v17 = vld [vmem:[%s6636_s1 + $0x28] sm:$0xf]  ;;  %v3390_v18 = vor.u32 %v3912_v11, %v3387_v12  ;;  %v3944_v24 = vld [vmem:[%s6638_s2 + $0xec] sm:$0xf] }
   0x6   :  { %v3371_v19 = vld [vmem:[%s6636_s1 + $0x18] sm:$0xf0]  ;;  %v3914_v20 = vld [vmem:[%s6636_s1 + $0x34] sm:$0xf0]  ;;  %v3369_v21 = vld [vmem:[%s6636_s1 + $0x8] sm:$0xf] }
   0x7   :  { %v3386_v22 = vor.u32 %v3914_v20, %v3385_v17  ;;  %v3910_v23 = vld [vmem:[%s6636_s1 + $0x14] sm:$0xf0]  ;;  %v3531_v25 = vld [vmem:[%s6638_s2 + $0xf8] sm:$0xf0]  ;;  %v3521_v26 = vld [vmem:[%s6638_s2 + $0xe0] sm:$0xf]  ;;  %v3374_v32 = vor.u32 %v3908_v16, %v3371_v19 }
   0x8   :  { %142 = vmatpush.bf16.msra.mxu0 %v3362_v10  ;;  %4028 = vmatpush.bf16.msra.mxu2 %v3362_v10  ;;  %v3945_v27 = vld [vmem:[%s6638_s2 + $0xec] sm:$0xf0]  ;;  %v3943_v28 = vld [vmem:[%s6638_s2 + $0xe4] sm:$0xf]  ;;  %v3523_v30 = vld [vmem:[%s6638_s2 + $0xf0] sm:$0xf0]  ;;  %v3370_v33 = vor.u32 %v3910_v23, %v3369_v21  ;;  %v4444_v38 = vor.u32 %v3944_v24, %v3531_v25 }
   0x9   :  { %171 = vmatpush.bf16.msra.mxu1 %v3366_v13  ;;  %4030 = vmatpush.bf16.msra.mxu3 %v3366_v13  ;;  %v4421_v29 = vor.u32 %v3945_v27, %v3521_v26  ;;  %v3505_v31 = vld [vmem:[%s6638_s2 + $0xc0] sm:$0xf]  ;;  %v4429_v34 = vor.u32 %v3943_v28, %v3523_v30  ;;  %v3941_v35 = vld [vmem:[%s6638_s2 + $0xcc] sm:$0xf0]  ;;  %v3939_v36 = vld [vmem:[%s6638_s2 + $0xc4] sm:$0xf] }
   0xa   :  { %v3507_v37 = vld [vmem:[%s6638_s2 + $0xd0] sm:$0xf0]  ;;  %6845 = vst [vmem:[#allocation3_spill] sm:$0xff] %v4444_v38  ;;  %v3940_v39 = vld [vmem:[%s6638_s2 + $0xcc] sm:$0xf]  ;;  %v4461_v42 = vor.u32 %v3941_v35, %v3505_v31 }
   0xb   :  { %6844 = vst [vmem:[#allocation2_spill] sm:$0xff] %v4429_v34  ;;  %3391 = vmatmul.msk.bf16.vlgmr.msra.gmra.mxu0 %vm122_vm0, %v4381_v14  ;;  %3394 = vmatmul.msk.bf16.vlgmr.msra.gmra.mxu2 %vm122_vm0, %v4386_v15  ;;  %v3515_v40 = vld [vmem:[%s6638_s2 + $0xd8] sm:$0xf0]  ;;  %v3529_v41 = vld [vmem:[%s6638_s2 + $0xe8] sm:$0xf]  ;;  %v4463_v43 = vor.u32 %v3939_v36, %v3507_v37 }
   0xc   :  { %199 = vmatpush.bf16.msrb.mxu2 %v3386_v22  ;;  %3395 = vmatmul.msk.bf16.vlgmr.msra.gmra.mxu1 %vm122_vm0, %v4381_v14  ;;  %v3489_v44 = vld [vmem:[%s6638_s2 + $0xa0] sm:$0xf]  ;;  %v3946_v45 = vld [vmem:[%s6638_s2 + $0xf4] sm:$0xf0]  ;;  %v3937_v46 = vld [vmem:[%s6638_s2 + $0xac] sm:$0xf0]  ;;  %v4483_v50 = vor.u32 %v3940_v39, %v3515_v40 }
   0xd   :  { %228 = vmatpush.bf16.msrb.mxu3 %v3390_v18  ;;  %517 = vmatpush.bf16.msrb.mxu0 %v4421_v29  ;;  %6846 = vst [vmem:[#allocation4_spill] sm:$0xff] %v4463_v43  ;;  %v3935_v47 = vld [vmem:[%s6638_s2 + $0xa4] sm:$0xf]  ;;  %v3491_v48 = vld [vmem:[%s6638_s2 + $0xb0] sm:$0xf0]  ;;  %v4480_v49 = vor.u32 %v3946_v45, %v3529_v41  ;;  %v4494_v53 = vor.u32 %v3937_v46, %v3489_v44  ;;  %v3904_v8 = vld [vmem:[%s6637_s0 + $0x8] sm:$0xff] }
   0xe   :  { %3398 = vmatmul.msk.bf16.vlgmr.msra.gmra.mxu3 %vm122_vm0, %v4386_v15  ;;  %530 = vmatpush.bf16.msrb.mxu1 %v4429_v34  ;;  %6847 = vst [vmem:[#allocation5_spill] sm:$0xff] %v4483_v50  ;;  %v3936_v51 = vld [vmem:[%s6638_s2 + $0xac] sm:$0xf]  ;;  %v3499_v52 = vld [vmem:[%s6638_s2 + $0xb8] sm:$0xf0]  ;;  %v4496_v54 = vor.u32 %v3935_v47, %v3491_v48 }
   0xf   :  { %v3473_v55 = vld [vmem:[%s6638_s2 + $0x80] sm:$0xf]  ;;  %v3513_v56 = vld [vmem:[%s6638_s2 + $0xc8] sm:$0xf]  ;;  %v3942_v57 = vld [vmem:[%s6638_s2 + $0xd4] sm:$0xf0]  ;;  %v4519_v62 = vor.u32 %v3936_v51, %v3499_v52 }
  0x10   :  { %200 = vmatpush.bf16.msrb.mxu2 %v3370_v33  ;;  %6848 = vst [vmem:[#allocation6_spill] sm:$0xff] %v4496_v54  ;;  %v3933_v58 = vld [vmem:[%s6638_s2 + $0x8c] sm:$0xf0]  ;;  %v3931_v59 = vld [vmem:[%s6638_s2 + $0x84] sm:$0xf]  ;;  %v4516_v61 = vor.u32 %v3942_v57, %v3513_v56 }
  0x11   :  { %229 = vmatpush.bf16.msrb.mxu3 %v3374_v32  ;;  %518 = vmatpush.bf16.msrb.mxu0 %v4461_v42  ;;  %v3475_v60 = vld [vmem:[%s6638_s2 + $0x90] sm:$0xf0]  ;;  %6849 = vst [vmem:[#allocation7_spill] sm:$0xff] %v4519_v62  ;;  %v4524_v63 = vor.u32 %v3933_v58, %v3473_v55  ;;  %v3457_v1 = vld [vmem:[%s6638_s2 + $0x60] sm:$0xf] }
  0x12   :  { %531 = vmatpush.bf16.msrb.mxu1 %v4463_v43  ;;  %v4526_v0 = vor.u32 %v3931_v59, %v3475_v60  ;;  %v3497_v2 = vld [vmem:[%s6638_s2 + $0xa8] sm:$0xf]  ;;  %v3938_v3 = vld [vmem:[%s6638_s2 + $0xb4] sm:$0xf0]  ;;  %v3929_v4 = vld [vmem:[%s6638_s2 + $0x6c] sm:$0xf0] }
  0x13   :  { %6850 = vst [vmem:[#allocation8_spill] sm:$0xff] %v4524_v63  ;;  %v3927_v5 = vld [vmem:[%s6638_s2 + $0x64] sm:$0xf]  ;;  %v3459_v6 = vld [vmem:[%s6638_s2 + $0x70] sm:$0xf0]  ;;  %v4546_v7 = vor.u32 %v3938_v3, %v3497_v2  ;;  %v4561_v11 = vor.u32 %v3929_v4, %v3457_v1 }
  0x14   :  { %543 = vmatpush.bf16.msra.mxu2 %v4480_v49  ;;  %6851 = vst [vmem:[#allocation9_spill] sm:$0xff] %v4526_v0  ;;  %v3932_v9 = vld [vmem:[%s6638_s2 + $0x8c] sm:$0xf]  ;;  %v3483_v10 = vld [vmem:[%s6638_s2 + $0x98] sm:$0xf0]  ;;  %v4563_v12 = vor.u32 %v3927_v5, %v3459_v6  ;;  %v3905_v52 = vld [vmem:[%s6637_s0 + $0x10] sm:$0xff] }
  0x15   :  { %556 = vmatpush.bf16.msra.mxu3 %v4444_v38  ;;  %519 = vmatpush.bf16.msrb.mxu0 %v4494_v53  ;;  %6852 = vst [vmem:[#allocation10_spill] sm:$0xff] %v4561_v11  ;;  %v3441_v13 = vld [vmem:[%s6638_s2 + $0x40] sm:$0xf]  ;;  %v3925_v16 = vld [vmem:[%s6638_s2 + $0x4c] sm:$0xf0]  ;;  %v4577_v19 = vor.u32 %v3932_v9, %v3483_v10 }
  0x16   :  { %532 = vmatpush.bf16.msrb.mxu1 %v4496_v54  ;;  %6853 = vst [vmem:[#allocation11_spill] sm:$0xff] %v4563_v12  ;;  %v3923_v17 = vld [vmem:[%s6638_s2 + $0x44] sm:$0xf]  ;;  %v3443_v18 = vld [vmem:[%s6638_s2 + $0x50] sm:$0xf0] }
  0x17   :  { %6854 = vst [vmem:[#allocation12_spill] sm:$0xff] %v4577_v19  ;;  %v3425_v20 = vld [vmem:[%s6638_s2 + $0x20] sm:$0xf]  ;;  %v3928_v21 = vld [vmem:[%s6638_s2 + $0x6c] sm:$0xf]  ;;  %v4601_v24 = vor.u32 %v3923_v17, %v3443_v18 }
  0x18   :  { %544 = vmatpush.bf16.msra.mxu2 %v4516_v61  ;;  %v3467_v22 = vld [vmem:[%s6638_s2 + $0x78] sm:$0xf0]  ;;  %v3481_v23 = vld [vmem:[%s6638_s2 + $0x88] sm:$0xf]  ;;  %v3921_v25 = vld [vmem:[%s6638_s2 + $0x2c] sm:$0xf0] }
  0x19   :  { %557 = vmatpush.bf16.msra.mxu3 %v4483_v50  ;;  %520 = vmatpush.bf16.msrb.mxu0 %v4524_v63  ;;  %6856 = vst [vmem:[#allocation14_spill] sm:$0xff] %v4601_v24  ;;  %v3919_v26 = vld [vmem:[%s6638_s2 + $0x24] sm:$0xf]  ;;  %v3934_v27 = vld [vmem:[%s6638_s2 + $0x94] sm:$0xf0]  ;;  %v4616_v30 = vor.u32 %v3928_v21, %v3467_v22  ;;  %v4637_v39 = vor.u32 %v3921_v25, %v3425_v20 }
  0x1a   :  { %533 = vmatpush.bf16.msrb.mxu1 %v4526_v0  ;;  %v3427_v28 = vld [vmem:[%s6638_s2 + $0x30] sm:$0xf0]  ;;  %v4618_v31 = vor.u32 %v3934_v27, %v3481_v23  ;;  %v3465_v32 = vld [vmem:[%s6638_s2 + $0x68] sm:$0xf]  ;;  %v3930_v33 = vld [vmem:[%s6638_s2 + $0x74] sm:$0xf0] }
  0x1b   :  { %3392 = vmatmul.msk.bf16.gmra.mxu0 %vm122_vm0, %v3904_v8  ;;  %3399 = vmatmul.msk.bf16.vlgmr.msrb.gmra.mxu2 %vm122_vm0, %v4381_v14  ;;  %6857 = vst [vmem:[#allocation15_spill] sm:$0xff] %v4616_v30  ;;  %v3924_v35 = vld [vmem:[%s6638_s2 + $0x4c] sm:$0xf]  ;;  %v3451_v36 = vld [vmem:[%s6638_s2 + $0x58] sm:$0xf0]  ;;  %v4633_v37 = vor.u32 %v3930_v33, %v3465_v32  ;;  %v4639_v40 = vor.u32 %v3919_v26, %v3427_v28 }
  0x1c   :  { %545 = vmatpush.bf16.msra.mxu2 %v4546_v7  ;;  %3396 = vmatmul.msk.bf16.gmra.mxu1 %vm122_vm0, %v3904_v8  ;;  %6858 = vst [vmem:[#allocation16_spill] sm:$0xff] %v4618_v31  ;;  %v3409_v41 = vld [vmem:[%s6638_s2] sm:$0xf]  ;;  %v3917_v44 = vld [vmem:[%s6638_s2 + $0xc] sm:$0xf0]  ;;  %v4654_v47 = vor.u32 %v3924_v35, %v3451_v36 }
  0x1d   :  { %558 = vmatpush.bf16.msra.mxu3 %v4519_v62  ;;  %521 = vmatpush.bf16.msrb.mxu0 %v4561_v11  ;;  %6859 = vst [vmem:[#allocation17_spill] sm:$0xff] %v4633_v37  ;;  %v3915_v45 = vld [vmem:[%s6638_s2 + $0x4] sm:$0xf]  ;;  %v3411_v46 = vld [vmem:[%s6638_s2 + $0x10] sm:$0xf0]  ;;  %v4659_v48 = vor.u32 %v3917_v44, %v3409_v41 }
  0x1e   :  { %3403 = vmatmul.msk.bf16.vlgmr.msrb.gmra.mxu3 %vm122_vm0, %v4381_v14  ;;  %534 = vmatpush.bf16.msrb.mxu1 %v4563_v12  ;;  %v4599_v14 = vor.u32 %v3925_v16, %v3441_v13  ;;  %6860 = vst [vmem:[#allocation18_spill] sm:$0xff] %v4637_v39  ;;  %v4661_v51 = vor.u32 %v3915_v45, %v3411_v46  ;;  %v3920_v55 = vld [vmem:[%s6638_s2 + $0x2c] sm:$0xf]  ;;  %v3435_v56 = vld [vmem:[%s6638_s2 + $0x38] sm:$0xf0]  ;;  %v4291_v13 = vmov 0  }
  0x1f   :  { %6861 = vst [vmem:[#allocation19_spill] sm:$0xff] %v4639_v40  ;;  %v3449_v57 = vld [vmem:[%s6638_s2 + $0x48] sm:$0xf]  ;;  %v4682_v58 = vor.u32 %v3920_v55, %v3435_v56  ;;  %v3926_v59 = vld [vmem:[%s6638_s2 + $0x54] sm:$0xf0] }
  0x20   :  { %6855 = vst [vmem:[#allocation13_spill] sm:$0xff] %v4599_v14  ;;  %546 = vmatpush.bf16.msra.mxu2 %v4618_v31  ;;  %v3916_v60 = vld [vmem:[%s6638_s2 + $0xc] sm:$0xf]  ;;  %v3419_v1 = vld [vmem:[%s6638_s2 + $0x18] sm:$0xf0]  ;;  %v4693_v2 = vor.u32 %v3926_v59, %v3449_v57 }
  0x21   :  { %559 = vmatpush.bf16.msra.mxu3 %v4577_v19  ;;  %522 = vmatpush.bf16.msrb.mxu0 %v4599_v14  ;;  %6862 = vst [vmem:[#allocation20_spill] sm:$0xff] %v4654_v47  ;;  %v3433_v3 = vld [vmem:[%s6638_s2 + $0x28] sm:$0xf]  ;;  %v3922_v4 = vld [vmem:[%s6638_s2 + $0x34] sm:$0xf0]  ;;  %v4702_v5 = vor.u32 %v3916_v60, %v3419_v1 }
  0x22   :  { %535 = vmatpush.bf16.msrb.mxu1 %v4601_v24  ;;  %6863 = vst [vmem:[#allocation21_spill] sm:$0xff] %v4659_v48  ;;  %v4705_v6 = vor.u32 %v3922_v4, %v3433_v3  ;;  %v3918_v9 = vld [vmem:[%s6638_s2 + $0x14] sm:$0xf0]  ;;  %v3780_v16 = vld [vmem:[%s6639_s4 + $0x1e0] sm:$0xf] }
  0x23   :  { %6864 = vst [vmem:[#allocation22_spill] sm:$0xff] %v4693_v2  ;;  %v4009_v17 = vld [vmem:[%s6639_s4 + $0x1ec] sm:$0xf0]  ;;  %v4007_v18 = vld [vmem:[%s6639_s4 + $0x1e4] sm:$0xf] }
  0x24   :  { %547 = vmatpush.bf16.msra.mxu2 %v4633_v37  ;;  %6865 = vst [vmem:[#allocation23_spill] sm:$0xff] %v4702_v5  ;;  %v4733_v20 = vor.u32 %v4009_v17, %v3780_v16  ;;  %v4745_v23 = vld [vmem:[%s6640_s3] sm:$0xf]  ;;  %v4005_v27 = vld [vmem:[%s6639_s4 + $0x1cc] sm:$0xf0] }
  0x25   :  { %560 = vmatpush.bf16.msra.mxu3 %v4616_v30  ;;  %523 = vmatpush.bf16.msrb.mxu0 %v4637_v39  ;;  %6866 = vst [vmem:[#allocation24_spill] sm:$0xff] %v4705_v6  ;;  %v3764_v26 = vld [vmem:[%s6639_s4 + $0x1c0] sm:$0xf]  ;;  %v4003_v28 = vld [vmem:[%s6639_s4 + $0x1c4] sm:$0xf]  ;;  %v4761_v32 = vperm.slane %v4745_v23, 0 }
  0x26   :  { %536 = vmatpush.bf16.msrb.mxu1 %v4639_v40  ;;  %6868 = vst [vmem:[#allocation26_spill] sm:$0xff] %v4733_v20  ;;  %v4763_v33 = vor.u32 %v4005_v27, %v3764_v26  ;;  %v3766_v35 = vld [vmem:[%s6639_s4 + $0x1d0] sm:$0xf0]  ;;  %v4769_v36 = vperm.slane %v4745_v23, 1  ;;  %v3748_v45 = vld [vmem:[%s6639_s4 + $0x1a0] sm:$0xf] }
  0x27   :  { %6869 = vst [vmem:[#allocation27_spill] sm:$0xff] %v4761_v32  ;;  %v4771_v41 = vor.u32 %v4003_v28, %v3766_v35  ;;  %v4001_v46 = vld [vmem:[%s6639_s4 + $0x1ac] sm:$0xf0]  ;;  %v3750_v59 = vld [vmem:[%s6639_s4 + $0x1b0] sm:$0xf0] }
  0x28   :  { %548 = vmatpush.bf16.msra.mxu2 %v4693_v2  ;;  %6870 = vst [vmem:[#allocation28_spill] sm:$0xff] %v4769_v36  ;;  %v4787_v57 = vor.u32 %v4001_v46, %v3748_v45  ;;  %v3734_v17 = vld [vmem:[%s6639_s4 + $0x190] sm:$0xf0]  ;;  %v3716_v26 = vld [vmem:[%s6639_s4 + $0x160] sm:$0xf] }
  0x29   :  { %561 = vmatpush.bf16.msra.mxu3 %v4654_v47  ;;  %524 = vmatpush.bf16.msrb.mxu0 %v4659_v48  ;;  %v3993_v27 = vld [vmem:[%s6639_s4 + $0x16c] sm:$0xf0]  ;;  %v3991_v28 = vld [vmem:[%s6639_s4 + $0x164] sm:$0xf]  ;;  %v3718_v45 = vld [vmem:[%s6639_s4 + $0x170] sm:$0xf0] }
  0x2a   :  { %537 = vmatpush.bf16.msrb.mxu1 %v4661_v51  ;;  %v3740_v37 = vld [vmem:[%s6639_s4 + $0x188] sm:$0xf]  ;;  %v3998_v11 = vld [vmem:[%s6639_s4 + $0x194] sm:$0xf0]  ;;  %v3742_v63 = vld [vmem:[%s6639_s4 + $0x198] sm:$0xf0] }
  0x2b   :  { %3393 = vmatmul.msk.bf16.gmra.mxu0 %vm122_vm0, %v3905_v52  ;;  %3400 = vmatmul.msk.bf16.gmra.mxu2 %vm122_vm0, %v3904_v8 }
  0x2c   :  { %3397 = vmatmul.msk.bf16.gmra.mxu1 %vm122_vm0, %v3905_v52  ;;  %549 = vmatpush.bf16.msra.mxu2 %v4705_v6 }
  0x2d   :  { %562 = vmatpush.bf16.msra.mxu3 %v4682_v58 }
  0x2e   :  { %3404 = vmatmul.msk.bf16.gmra.mxu3 %vm122_vm0, %v3904_v8  ;;  %v3417_v8 = vld [vmem:[%s6638_s2 + $0x8] sm:$0xf]  ;;  %971 = vmatpush.bf16.msra.mxu1 %v4733_v20 }
  0x2f   :  { %v4715_v10 = vor.u32 %v3918_v9, %v3417_v8  ;;  %v3732_v8 = vld [vmem:[%s6639_s4 + $0x180] sm:$0xf]  ;;  %v3997_v9 = vld [vmem:[%s6639_s4 + $0x18c] sm:$0xf0] }
  0x30   :  { %v4812_v16 = vor.u32 %v3997_v9, %v3732_v8  ;;  %v3700_v9 = vld [vmem:[%s6639_s4 + $0x140] sm:$0xf] }
  0x31   :  { %563 = vmatpush.bf16.msra.mxu3 %v4702_v5  ;;  %6867 = vst [vmem:[#allocation25_spill] sm:$0xff] %v4715_v10  ;;  %550 = vmatpush.bf16.msra.mxu2 %v4715_v10  ;;  %v4006_v10 = vld [vmem:[%s6639_s4 + $0x1d4] sm:$0xf0] }
  0x32   :  { %972 = vmatpush.bf16.msra.mxu1 %v4763_v33  ;;  %6875 = vst [vmem:[#allocation33_spill] sm:$0xff] %v4812_v16 }
  0x36   :  { %973 = vmatpush.bf16.msra.mxu1 %v4787_v57 }
  0x3a   :  { %974 = vmatpush.bf16.msra.mxu1 %v4812_v16 }
  0x3b   :  { %3401 = vmatmul.msk.bf16.gmra.mxu2 %vm122_vm0, %v3905_v52  ;;  %525 = vmatmul.bf16.vlgmr.msrb.gmra.mxu0 %v4291_v13 }
  0x3c   :  { %538 = vmatmul.bf16.vlgmr.msrb.gmra.mxu1 %v4291_v13 }
  0x3e   :  { %3405 = vmatmul.msk.bf16.gmra.mxu3 %vm122_vm0, %v3905_v52  ;;  %v3999_v52 = vld [vmem:[%s6639_s4 + $0x1a4] sm:$0xf] }
  0x3f   :  { %v4797_v3 = vor.u32 %v3999_v52, %v3750_v59  ;;  %v4839_v52 = vor.u32 %v3991_v28, %v3718_v45 }
  0x41   :  { %6880 = vst [vmem:[#allocation38_spill] sm:$0xff] %v4839_v52 }
  0x4b   :  { %3402 = vmatmul.msk.bf16.gmra.mxu2 %vm122_vm0, %v4386_v15 }
  0x4e   :  { %3406 = vmatmul.msk.bf16.gmra.mxu3 %vm122_vm0, %v4386_v15  ;;  %v3782_v15 = vld [vmem:[%s6639_s4 + $0x1f0] sm:$0xf0] }
  0x4f   :  { %v4740_v22 = vor.u32 %v4007_v18, %v3782_v15 }
  0x51   :  { %997 = vmatpush.bf16.msrb.mxu3 %v4740_v22 }
  0x55   :  { %998 = vmatpush.bf16.msrb.mxu3 %v4771_v41 }
  0x59   :  { %999 = vmatpush.bf16.msrb.mxu3 %v4797_v3 }
  0x5b   :  { %551 = vmatmul.bf16.vlgmr.msra.gmra.mxu2 %v4291_v13 }
  0x5e   :  { %564 = vmatmul.bf16.vlgmr.msra.gmra.mxu3 %v4291_v13  ;;  %v3995_v13 = vld [vmem:[%s6639_s4 + $0x184] sm:$0xf] }
  0x5f   :  { %v4817_v18 = vor.u32 %v3995_v13, %v3734_v17  ;;  %v3989_v13 = vld [vmem:[%s6639_s4 + $0x14c] sm:$0xf0]  ;;  %v3987_v17 = vld [vmem:[%s6639_s4 + $0x144] sm:$0xf] }
  0x61   :  { %6876 = vst [vmem:[#allocation34_spill] sm:$0xff] %v4817_v18  ;;  %1000 = vmatpush.bf16.msrb.mxu3 %v4817_v18 }
  0x65   :  { %1001 = vmatpush.bf16.msrb.mxu3 %v4839_v52 }
  0x88   :  { %v4738_v21 = vpop.f32.mrf.mxu0 }
  0x89   :  { %v4747_v25 = vpop.f32.mrf.mxu1 }
  0x8e   :  { %v159_v44 = vpop.f32.mrf.mxu2 }
  0x8f   :  { %v4785_v55 = vadd.f32 %v159_v44, %v4761_v32  ;;  %v4834_v44 = vor.u32 %v3993_v27, %v3716_v26  ;;  %v4858_v26 = vor.u32 %v3989_v13, %v3700_v9  ;;  %v3702_v27 = vld [vmem:[%s6639_s4 + $0x150] sm:$0xf0]  ;;  %v3983_v9 = vld [vmem:[%s6639_s4 + $0x124] sm:$0xf] }
  0x90   :  { %v4795_v1 = vpop.f32.mrf.mxu0  ;;  %v4863_v28 = vor.u32 %v3987_v17, %v3702_v27  ;;  %v3686_v27 = vld [vmem:[%s6639_s4 + $0x130] sm:$0xf0] }
  0x91   :  { %6871 = vst [vmem:[#allocation29_spill] sm:$0xff] %v4785_v55  ;;  %v188_v56 = vpop.f32.mrf.mxu3  ;;  %v4799_v4 = vpop.f32.mrf.mxu1  ;;  %975 = vmatpush.bf16.msra.mxu1 %v4834_v44 }
  0x92   :  { %v4793_v60 = vadd.f32 %v188_v56, %v4769_v36  ;;  %6873 = vst [vmem:[#allocation31_spill] sm:$0xff] %v4795_v1  ;;  %1002 = vmatpush.bf16.msrb.mxu3 %v4863_v28 }
  0x93   :  { %6874 = vst [vmem:[#allocation32_spill] sm:$0xff] %v4799_v4 }
  0x94   :  { %6872 = vst [vmem:[#allocation30_spill] sm:$0xff] %v4793_v60  ;;  %v3668_v60 = vld [vmem:[%s6639_s4 + $0x100] sm:$0xf] }
  0x95   :  { %6879 = vst [vmem:[#allocation37_spill] sm:$0xff] %v4834_v44  ;;  %976 = vmatpush.bf16.msra.mxu1 %v4858_v26 }
  0x96   :  { %v4820_v15 = vpop.f32.mrf.mxu2  ;;  %6883 = vst [vmem:[#allocation41_spill] sm:$0xff] %v4858_v26 }
  0x97   :  { %6877 = vst [vmem:[#allocation35_spill] sm:$0xff] %v4820_v15 }
  0x98   :  { %v149_v46 = vpop.f32.mrf.mxu0  ;;  %6884 = vst [vmem:[#allocation42_spill] sm:$0xff] %v4863_v28 }
  0x99   :  { %v4832_v35 = vpop.f32.mrf.mxu3  ;;  %v4842_v56 = vadd.f32 %v149_v46, %v4761_v32  ;;  %v178_v59 = vpop.f32.mrf.mxu1  ;;  %v3684_v46 = vld [vmem:[%s6639_s4 + $0x120] sm:$0xf] }
  0x9a   :  { %6878 = vst [vmem:[#allocation36_spill] sm:$0xff] %v4832_v35  ;;  %v4846_v8 = vadd.f32 %v178_v59, %v4769_v36  ;;  %v3985_v59 = vld [vmem:[%s6639_s4 + $0x12c] sm:$0xf0]  ;;  %v4887_v35 = vor.u32 %v3983_v9, %v3686_v27  ;;  %v3670_v27 = vld [vmem:[%s6639_s4 + $0x110] sm:$0xf0] }
  0x9b   :  { %6881 = vst [vmem:[#allocation39_spill] sm:$0xff] %v4842_v56  ;;  %v4880_v17 = vor.u32 %v3985_v59, %v3684_v46  ;;  %v3981_v46 = vld [vmem:[%s6639_s4 + $0x10c] sm:$0xf0]  ;;  %v3979_v59 = vld [vmem:[%s6639_s4 + $0x104] sm:$0xf] }
  0x9c   :  { %6882 = vst [vmem:[#allocation40_spill] sm:$0xff] %v4846_v8  ;;  %1003 = vmatpush.bf16.msrb.mxu3 %v4887_v35  ;;  %v4902_v9 = vor.u32 %v3981_v46, %v3668_v60  ;;  %v4913_v56 = vor.u32 %v3979_v59, %v3670_v27  ;;  %v4008_v60 = vld [vmem:[%s6639_s4 + $0x1ec] sm:$0xf]  ;;  %v3790_v46 = vld [vmem:[%s6639_s4 + $0x1f8] sm:$0xf0] }
  0x9d   :  { %6885 = vst [vmem:[#allocation43_spill] sm:$0xff] %v4880_v17  ;;  %977 = vmatpush.bf16.msra.mxu1 %v4880_v17  ;;  %v4924_v1 = vor.u32 %v4008_v60, %v3790_v46  ;;  %v3975_v59 = vld [vmem:[%s6639_s4 + $0xe4] sm:$0xf]  ;;  %v3654_v46 = vld [vmem:[%s6639_s4 + $0xf0] sm:$0xf0] }
  0x9e   :  { %v4866_v45 = vpop.f32.mrf.mxu2  ;;  %6887 = vst [vmem:[#allocation45_spill] sm:$0xff] %v4887_v35  ;;  %v4953_v6 = vor.u32 %v3975_v59, %v3654_v46  ;;  %v3638_v46 = vld [vmem:[%s6639_s4 + $0xd0] sm:$0xf0] }
  0x9f   :  { %6889 = vst [vmem:[#allocation47_spill] sm:$0xff] %v4902_v9 }
  0xa0   :  { %v4885_v15 = vpop.f32.mrf.mxu0  ;;  %6890 = vst [vmem:[#allocation48_spill] sm:$0xff] %v4913_v56  ;;  %1004 = vmatpush.bf16.msrb.mxu3 %v4913_v56  ;;  %984 = vmatpush.bf16.msrb.mxu2 %v4953_v6 }
  0xa1   :  { %v4878_v13 = vpop.f32.mrf.mxu3  ;;  %6886 = vst [vmem:[#allocation44_spill] sm:$0xff] %v4885_v15  ;;  %v4889_v55 = vpop.f32.mrf.mxu1  ;;  %v3788_v15 = vld [vmem:[%s6639_s4 + $0x1e8] sm:$0xf]  ;;  %978 = vmatpush.bf16.msra.mxu1 %v4902_v9 }
  0xa2   :  { %6888 = vst [vmem:[#allocation46_spill] sm:$0xff] %v4889_v55  ;;  %v4010_v55 = vld [vmem:[%s6639_s4 + $0x1f4] sm:$0xf0] }
  0xa3   :  { %v4915_v8 = vor.u32 %v4010_v55, %v3788_v15  ;;  %6892 = vst [vmem:[#allocation50_spill] sm:$0xff] %v4924_v1  ;;  %v3652_v55 = vld [vmem:[%s6639_s4 + $0xe0] sm:$0xf]  ;;  %v3977_v15 = vld [vmem:[%s6639_s4 + $0xec] sm:$0xf0] }
  0xa4   :  { %1049 = vmatpush.bf16.msra.mxu3 %v4924_v1  ;;  %v4942_v60 = vor.u32 %v3977_v15, %v3652_v55  ;;  %6896 = vst [vmem:[#allocation54_spill] sm:$0xff] %v4953_v6  ;;  %v4004_v55 = vld [vmem:[%s6639_s4 + $0x1cc] sm:$0xf]  ;;  %v3774_v15 = vld [vmem:[%s6639_s4 + $0x1d8] sm:$0xf0]  ;;  %v5006_v6 = vperm.slane %v4745_v23, 2 }
  0xa5   :  { %6891 = vst [vmem:[#allocation49_spill] sm:$0xff] %v4915_v8  ;;  %1023 = vmatpush.bf16.msrb.mxu1 %v4915_v8  ;;  %v4967_v14 = vor.u32 %v4004_v55, %v3774_v15  ;;  %v3756_v55 = vld [vmem:[%s6639_s4 + $0x1a8] sm:$0xf]  ;;  %v4002_v15 = vld [vmem:[%s6639_s4 + $0x1b4] sm:$0xf0] }
  0xa6   :  { %v4926_v4 = vpop.f32.mrf.mxu2  ;;  %6895 = vst [vmem:[#allocation53_spill] sm:$0xff] %v4942_v60  ;;  %958 = vmatpush.bf16.msra.mxu0 %v4942_v60  ;;  %v5009_v60 = vperm.slane %v4745_v23, 3  ;;  %v3967_v23 = vld [vmem:[%s6639_s4 + $0xa4] sm:$0xf] }
  0xa7   :  { %6893 = vst [vmem:[#allocation51_spill] sm:$0xff] %v4926_v4  ;;  %v3772_v4 = vld [vmem:[%s6639_s4 + $0x1c8] sm:$0xf] }
  0xa8   :  { %v154_v48 = vpop.f32.mrf.mxu0  ;;  %6899 = vst [vmem:[#allocation57_spill] sm:$0xff] %v4967_v14  ;;  %1050 = vmatpush.bf16.msra.mxu3 %v4967_v14 }
  0xa9   :  { %v4939_v27 = vpop.f32.mrf.mxu3  ;;  %v4964_v39 = vadd.f32 %v154_v48, %v4761_v32  ;;  %v183_v2 = vpop.f32.mrf.mxu1  ;;  %v3973_v48 = vld [vmem:[%s6639_s4 + $0xcc] sm:$0xf0]  ;;  %6904 = vst [vmem:[#allocation62_spill] sm:$0xff] %v5006_v6 }
  0xaa   :  { %6894 = vst [vmem:[#allocation52_spill] sm:$0xff] %v4939_v27  ;;  %v4955_v27 = vor.u32 %v4006_v10, %v3772_v4  ;;  %v4970_v59 = vadd.f32 %v183_v2, %v4769_v36  ;;  %v3636_v10 = vld [vmem:[%s6639_s4 + $0xc0] sm:$0xf]  ;;  %v3971_v4 = vld [vmem:[%s6639_s4 + $0xc4] sm:$0xf] }
  0xab   :  { %6898 = vst [vmem:[#allocation56_spill] sm:$0xff] %v4964_v39  ;;  %v4984_v2 = vor.u32 %v3973_v48, %v3636_v10  ;;  %v4995_v39 = vor.u32 %v3971_v4, %v3638_v46  ;;  %v4000_v10 = vld [vmem:[%s6639_s4 + $0x1ac] sm:$0xf]  ;;  %v3758_v48 = vld [vmem:[%s6639_s4 + $0x1b8] sm:$0xf0] }
  0xac   :  { %6897 = vst [vmem:[#allocation55_spill] sm:$0xff] %v4955_v27  ;;  %1024 = vmatpush.bf16.msrb.mxu1 %v4955_v27  ;;  %v5012_v4 = vor.u32 %v4000_v10, %v3758_v48 }
  0xad   :  { %6900 = vst [vmem:[#allocation58_spill] sm:$0xff] %v4970_v59  ;;  %v4997_v59 = vor.u32 %v4002_v15, %v3756_v55  ;;  %959 = vmatpush.bf16.msra.mxu0 %v4984_v2  ;;  %985 = vmatpush.bf16.msrb.mxu2 %v4995_v39  ;;  %v3620_v55 = vld [vmem:[%s6639_s4 + $0xa0] sm:$0xf]  ;;  %v3969_v15 = vld [vmem:[%s6639_s4 + $0xac] sm:$0xf0] }
  0xae   :  { %6901 = vst [vmem:[#allocation59_spill] sm:$0xff] %v4984_v2  ;;  %v207_v46 = vpop.f32.mrf.mxu2  ;;  %1051 = vmatpush.bf16.msra.mxu3 %v5012_v4  ;;  %v3622_v2 = vld [vmem:[%s6639_s4 + $0xb0] sm:$0xf0] }
  0xaf   :  { %6902 = vst [vmem:[#allocation60_spill] sm:$0xff] %v4995_v39  ;;  %v5026_v10 = vadd.f32 %v207_v46, %v5006_v6  ;;  %v5029_v39 = vor.u32 %v3969_v15, %v3620_v55  ;;  %v5045_v31 = vor.u32 %v3967_v23, %v3622_v2  ;;  %v5047_v55 = vor.u32 %v3998_v11, %v3740_v37  ;;  %v3996_v15 = vld [vmem:[%s6639_s4 + $0x18c] sm:$0xf]  ;;  %v3604_v11 = vld [vmem:[%s6639_s4 + $0x80] sm:$0xf] }
  0xb0   :  { %6903 = vst [vmem:[#allocation61_spill] sm:$0xff] %v4997_v59  ;;  %1025 = vmatpush.bf16.msrb.mxu1 %v4997_v59  ;;  %v3965_v37 = vld [vmem:[%s6639_s4 + $0x8c] sm:$0xf0]  ;;  %v3963_v2 = vld [vmem:[%s6639_s4 + $0x84] sm:$0xf] }
  0xb1   :  { %6905 = vst [vmem:[#allocation63_spill] sm:$0xff] %v5009_v60  ;;  %v236_v48 = vpop.f32.mrf.mxu3  ;;  %960 = vmatpush.bf16.msra.mxu0 %v5029_v39  ;;  %986 = vmatpush.bf16.msrb.mxu2 %v5045_v31  ;;  %v3606_v23 = vld [vmem:[%s6639_s4 + $0x90] sm:$0xf0] }
  0xb2   :  { %6906 = vst [vmem:[#allocation64_spill] sm:$0xff] %v5012_v4  ;;  %v5041_v46 = vadd.f32 %v236_v48, %v5009_v60  ;;  %v5055_v4 = vpop.f32.mrf.mxu1  ;;  %v5058_v48 = vor.u32 %v3996_v15, %v3742_v63  ;;  %v5072_v63 = vor.u32 %v3965_v37, %v3604_v11  ;;  %v3724_v15 = vld [vmem:[%s6639_s4 + $0x168] sm:$0xf]  ;;  %v3992_v11 = vld [vmem:[%s6639_s4 + $0x16c] sm:$0xf] }
  0xb3   :  { %6907 = vst [vmem:[#allocation65_spill] sm:$0xff] %v5026_v10  ;;  %v5043_v10 = vpop.f32.mrf.mxu0  ;;  %v3726_v37 = vld [vmem:[%s6639_s4 + $0x178] sm:$0xf0] }
  0xb4   :  { %6908 = vst [vmem:[#allocation66_spill] sm:$0xff] %v5029_v39  ;;  %1026 = vmatpush.bf16.msrb.mxu1 %v5047_v55  ;;  %1052 = vmatpush.bf16.msra.mxu3 %v5058_v48 }
  0xb5   :  { %6909 = vst [vmem:[#allocation67_spill] sm:$0xff] %v5041_v46  ;;  %961 = vmatpush.bf16.msra.mxu0 %v5072_v63 }
  0xb6   :  { %6910 = vst [vmem:[#allocation68_spill] sm:$0xff] %v5043_v10  ;;  %v3994_v10 = vld [vmem:[%s6639_s4 + $0x174] sm:$0xf0]  ;;  %v5096_v39 = vpop.f32.mrf.mxu2 }
  0xb7   :  { %6911 = vst [vmem:[#allocation69_spill] sm:$0xff] %v5045_v31  ;;  %v5085_v46 = vor.u32 %v3994_v10, %v3724_v15  ;;  %v5094_v31 = vor.u32 %v3992_v11, %v3726_v37  ;;  %v3588_v10 = vld [vmem:[%s6639_s4 + $0x60] sm:$0xf]  ;;  %v145_v15 = vadd.f32 %v4738_v21, %v4761_v32  ;;  %v174_v21 = vadd.f32 %v4747_v25, %v4769_v36  ;;  %v3957_v25 = vld [vmem:[%s6639_s4 + $0x4c] sm:$0xf0] }
  0xb8   :  { %6912 = vst [vmem:[#allocation70_spill] sm:$0xff] %v5047_v55 }
  0xb9   :  { %6913 = vst [vmem:[#allocation71_spill] sm:$0xff] %v5055_v4  ;;  %v5083_v4 = vor.u32 %v3963_v2, %v3606_v23  ;;  %1027 = vmatpush.bf16.msrb.mxu1 %v5085_v46  ;;  %v3961_v2 = vld [vmem:[%s6639_s4 + $0x6c] sm:$0xf0]  ;;  %v3959_v23 = vld [vmem:[%s6639_s4 + $0x64] sm:$0xf]  ;;  %v5111_v11 = vpop.f32.mrf.mxu3  ;;  %1053 = vmatpush.bf16.msra.mxu3 %v5094_v31 }
  0xba   :  { %6914 = vst [vmem:[#allocation72_spill] sm:$0xff] %v5058_v48  ;;  %v5114_v37 = vor.u32 %v3961_v2, %v3588_v10  ;;  %v3988_v2 = vld [vmem:[%s6639_s4 + $0x14c] sm:$0xf]  ;;  %v539_v55 = vpop.f32.mrf.mxu1 }
  0xbb   :  { %6915 = vst [vmem:[#allocation73_spill] sm:$0xff] %v5072_v63  ;;  %987 = vmatpush.bf16.msrb.mxu2 %v5083_v4  ;;  %v3990_v63 = vld [vmem:[%s6639_s4 + $0x154] sm:$0xf0] }
  0xbc   :  { %6916 = vst [vmem:[#allocation74_spill] sm:$0xff] %v5083_v4  ;;  %v3708_v4 = vld [vmem:[%s6639_s4 + $0x148] sm:$0xf]  ;;  %962 = vmatpush.bf16.msra.mxu0 %v5114_v37 }
  0xbd   :  { %6917 = vst [vmem:[#allocation75_spill] sm:$0xff] %v5085_v46  ;;  %v5129_v10 = vor.u32 %v3990_v63, %v3708_v4  ;;  %v3572_v46 = vld [vmem:[%s6639_s4 + $0x40] sm:$0xf]  ;;  %v3955_v4 = vld [vmem:[%s6639_s4 + $0x44] sm:$0xf] }
  0xbe   :  { %6918 = vst [vmem:[#allocation76_spill] sm:$0xff] %v5094_v31  ;;  %v3710_v31 = vld [vmem:[%s6639_s4 + $0x158] sm:$0xf0]  ;;  %v3574_v63 = vld [vmem:[%s6639_s4 + $0x50] sm:$0xf0] }
  0xbf   :  { %6919 = vst [vmem:[#allocation77_spill] sm:$0xff] %v5096_v39  ;;  %v3590_v39 = vld [vmem:[%s6639_s4 + $0x70] sm:$0xf0]  ;;  %1028 = vmatpush.bf16.msrb.mxu1 %v5129_v10 }
  0xc0   :  { %6920 = vst [vmem:[#allocation78_spill] sm:$0xff] %v5111_v11  ;;  %v526_v11 = vpop.f32.mrf.mxu0  ;;  %v5127_v32 = vor.u32 %v3959_v23, %v3590_v39  ;;  %v5141_v39 = vor.u32 %v3988_v2, %v3710_v31  ;;  %v570_v23 = vadd.f32 %v539_v55, %v174_v21  ;;  %v5156_v31 = vor.u32 %v3955_v4, %v3574_v63  ;;  %v3986_v2 = vld [vmem:[%s6639_s4 + $0x134] sm:$0xf0]  ;;  %v3984_v55 = vld [vmem:[%s6639_s4 + $0x12c] sm:$0xf]  ;;  %v212_v63 = vpop.f32.mrf.mxu2 }
  0xc1   :  { %6921 = vst [vmem:[#allocation79_spill] sm:$0xff] %v5114_v37  ;;  %v569_v48 = vadd.f32 %v526_v11, %v145_v15  ;;  %v5154_v15 = vor.u32 %v3957_v25, %v3572_v46  ;;  %v3692_v11 = vld [vmem:[%s6639_s4 + $0x128] sm:$0xf]  ;;  %v3694_v46 = vld [vmem:[%s6639_s4 + $0x138] sm:$0xf0] }
  0xc2   :  { %6922 = vst [vmem:[#allocation80_spill] sm:$0xff] %v5127_v32  ;;  %988 = vmatpush.bf16.msrb.mxu2 %v5127_v32  ;;  %1054 = vmatpush.bf16.msra.mxu3 %v5141_v39  ;;  %v5168_v36 = vor.u32 %v3986_v2, %v3692_v11  ;;  %v3536_v25 = vmul.f32 -1.442695, %v570_v23  ;;  %v5173_v4 = vor.u32 %v3984_v55, %v3694_v46  ;;  %v241_v11 = vpop.f32.mrf.mxu3  ;;  %v3556_v23 = vld [vmem:[%s6639_s4 + $0x20] sm:$0xf] }
  0xc3   :  { %6923 = vst [vmem:[#allocation81_spill] sm:$0xff] %v5129_v10  ;;  %v3535_v21 = vmul.f32 -1.442695, %v569_v48  ;;  %963 = vmatpush.bf16.msra.mxu0 %v5154_v15  ;;  %v5179_v48 = vadd.f32 %v212_v63, %v5006_v6  ;;  %v3953_v2 = vld [vmem:[%s6639_s4 + $0x2c] sm:$0xf0] }
  0xc4   :  { %6924 = vst [vmem:[#allocation82_spill] sm:$0xff] %v5141_v39  ;;  %1029 = vmatpush.bf16.msrb.mxu1 %v5168_v36  ;;  %v3951_v55 = vld [vmem:[%s6639_s4 + $0x24] sm:$0xf]  ;;  %v3558_v63 = vld [vmem:[%s6639_s4 + $0x30] sm:$0xf0] }
  0xc5   :  { %6925 = vst [vmem:[#allocation83_spill] sm:$0xff] %v5154_v15  ;;  %4035 = vpow2.f32 %v3535_v21  ;;  %v5192_v21 = vadd.f32 %v241_v11, %v5009_v60  ;;  %v541_v15 = vpop.f32.mrf.mxu1  ;;  %v5205_v32 = vor.u32 %v3951_v55, %v3558_v63  ;;  %v3947_v55 = vld [vmem:[%s6639_s4 + $0x4] sm:$0xf] }
  0xc6   :  { %6926 = vst [vmem:[#allocation84_spill] sm:$0xff] %v5156_v31  ;;  %4037 = vpow2.f32 %v3536_v25  ;;  %989 = vmatpush.bf16.msrb.mxu2 %v5156_v31  ;;  %1055 = vmatpush.bf16.msra.mxu3 %v5173_v4  ;;  %v5194_v25 = vor.u32 %v3953_v2, %v3556_v23  ;;  %v3982_v31 = vld [vmem:[%s6639_s4 + $0x114] sm:$0xf0]  ;;  %v3980_v23 = vld [vmem:[%s6639_s4 + $0x10c] sm:$0xf]  ;;  %v6707_v15 = vmov 0.0|0.0  }
  0xc7   :  { %6927 = vst [vmem:[#allocation85_spill] sm:$0xff] %v5168_v36  ;;  %v3678_v2 = vld [vmem:[%s6639_s4 + $0x118] sm:$0xf0]  ;;  %979 = vmatmul.bf16.vlgmr.msra.gmra.mxu1 %v6707_v15  ;;  %1005 = vmatmul.bf16.vlgmr.msrb.gmra.mxu3 %v6707_v15  ;;  %v3660_v15 = vld [vmem:[%s6639_s4 + $0xe8] sm:$0xf] }
  0xc8   :  { %6928 = vst [vmem:[#allocation86_spill] sm:$0xff] %v5173_v4  ;;  %v528_v46 = vpop.f32.mrf.mxu0  ;;  %964 = vmatpush.bf16.msra.mxu0 %v5194_v25  ;;  %v5245_v37 = vpop.f32.mrf.mxu2 }
  0xc9   :  { %6929 = vst [vmem:[#allocation87_spill] sm:$0xff] %v5179_v48  ;;  %v3676_v48 = vld [vmem:[%s6639_s4 + $0x108] sm:$0xf]  ;;  %v5216_v46 = vor.u32 %v3980_v23, %v3678_v2  ;;  %v3542_v2 = vld [vmem:[%s6639_s4 + $0x10] sm:$0xf0] }
  0xca   :  { %6930 = vst [vmem:[#allocation88_spill] sm:$0xff] %v5192_v21  ;;  %v5207_v11 = vor.u32 %v3982_v31, %v3676_v48  ;;  %990 = vmatpush.bf16.msrb.mxu2 %v5205_v32  ;;  %v3540_v31 = vld [vmem:[%s6639_s4] sm:$0xf]  ;;  %v3949_v48 = vld [vmem:[%s6639_s4 + $0xc] sm:$0xf0] }
  0xcb   :  { %6931 = vst [vmem:[#allocation89_spill] sm:$0xff] %v5194_v25  ;;  %v4036_v21 = vpop.eup %4035  ;;  %v5231_v23 = vor.u32 %v3949_v48, %v3540_v31  ;;  %1056 = vmatpush.bf16.msra.mxu3 %v5216_v46  ;;  %v5240_v25 = vor.u32 %v3947_v55, %v3542_v2  ;;  %v3978_v31 = vld [vmem:[%s6639_s4 + $0xf4] sm:$0xf0]  ;;  %v3976_v48 = vld [vmem:[%s6639_s4 + $0xec] sm:$0xf]  ;;  %v5260_v2 = vpop.f32.mrf.mxu3 }
  0xcc   :  { %6932 = vst [vmem:[#allocation90_spill] sm:$0xff] %v5205_v32  ;;  %v4038_v63 = vpop.eup %4037  ;;  %1030 = vmatpush.bf16.msrb.mxu1 %v5207_v11  ;;  %v3662_v55 = vld [vmem:[%s6639_s4 + $0xf8] sm:$0xf0] }
  0xcd   :  { %6933 = vst [vmem:[#allocation91_spill] sm:$0xff] %v5207_v11  ;;  %v5236_v32 = vadd.f32 1.0, %v4038_v63  ;;  %965 = vmatpush.bf16.msra.mxu0 %v5231_v23  ;;  %v5258_v63 = vadd.f32 1.0, %v4036_v21  ;;  %v3974_v21 = vld [vmem:[%s6639_s4 + $0xd4] sm:$0xf0] }
  0xce   :  { %6934 = vst [vmem:[#allocation92_spill] sm:$0xff] %v5216_v46  ;;  %991 = vmatpush.bf16.msrb.mxu2 %v5240_v25 }
  0xcf   :  { %6935 = vst [vmem:[#allocation93_spill] sm:$0xff] %v5231_v23  ;;  %1168 = vmatpush.bf16.msrb.mxu3 %v4444_v38  ;;  %4039 = vrcp.f32 %v5236_v32  ;;  %v5267_v38 = vor.u32 %v3978_v31, %v3660_v15  ;;  %vm601_vm2 = vweird.f32 %v5236_v32  ;;  %vm582_vm5 = vweird.f32 %v5258_v63 }
  0xd0   :  { %1142 = vmatpush.bf16.msra.mxu1 %v4429_v34  ;;  %6936 = vst [vmem:[#allocation94_spill] sm:$0xff] %v5240_v25  ;;  %v5269_v34 = vor.u32 %v3976_v48, %v3662_v55  ;;  %v3646_v25 = vld [vmem:[%s6639_s4 + $0xd8] sm:$0xf0]  ;;  %4041 = vrcp.f32 %v5258_v63  ;;  %v3628_v48 = vld [vmem:[%s6639_s4 + $0xa8] sm:$0xf] }
  0xd1   :  { %6937 = vst [vmem:[#allocation95_spill] sm:$0xff] %v5245_v37  ;;  %v3644_v37 = vld [vmem:[%s6639_s4 + $0xc8] sm:$0xf]  ;;  %1010 = vmatpush.bf16.msrb.mxu0 %v5267_v38  ;;  %v3970_v55 = vld [vmem:[%s6639_s4 + $0xb4] sm:$0xf0] }
  0xd2   :  { %6938 = vst [vmem:[#allocation96_spill] sm:$0xff] %v5260_v2  ;;  %v3972_v2 = vld [vmem:[%s6639_s4 + $0xcc] sm:$0xf]  ;;  %1036 = vmatpush.bf16.msra.mxu2 %v5269_v34  ;;  %v5285_v15 = vor.u32 %v3974_v21, %v3644_v37  ;;  %v3630_v37 = vld [vmem:[%s6639_s4 + $0xb8] sm:$0xf0] }
  0xd3   :  { %6939 = vst [vmem:[#allocation97_spill] sm:$0xff] %v5267_v38  ;;  %1169 = vmatpush.bf16.msrb.mxu3 %v4483_v50  ;;  %v5287_v31 = vor.u32 %v3972_v2, %v3646_v25  ;;  %v3968_v50 = vld [vmem:[%s6639_s4 + $0xac] sm:$0xf]  ;;  %v217_v25 = vpop.f32.mrf.mxu2 }
  0xd4   :  { %6940 = vst [vmem:[#allocation98_spill] sm:$0xff] %v5269_v34  ;;  %1143 = vmatpush.bf16.msra.mxu1 %v4463_v43  ;;  %v5306_v21 = vadd.f32 %v217_v25, %v5006_v6  ;;  %v246_v43 = vpop.f32.mrf.mxu3  ;;  %v5310_v34 = vor.u32 %v3970_v55, %v3628_v48  ;;  %v3966_v25 = vld [vmem:[%s6639_s4 + $0x94] sm:$0xf0] }
  0xd5   :  { %6941 = vst [vmem:[#allocation99_spill] sm:$0xff] %v5285_v15  ;;  %v5303_v2 = vpop.eup %4039  ;;  %1011 = vmatpush.bf16.msrb.mxu0 %v5285_v15  ;;  %v5315_v38 = vadd.f32 %v246_v43, %v5009_v60  ;;  %v3614_v43 = vld [vmem:[%s6639_s4 + $0x98] sm:$0xf0]  ;;  %v3580_v15 = vld [vmem:[%s6639_s4 + $0x48] sm:$0xf] }
  0xd6   :  { %6942 = vst [vmem:[#allocation100_spill] sm:$0xff] %v5287_v31  ;;  %1037 = vmatpush.bf16.msra.mxu2 %v5287_v31  ;;  %v597_v48 = vmul.f32 %v5303_v2, %v5236_v32  ;;  %v3596_v31 = vld [vmem:[%s6639_s4 + $0x68] sm:$0xf]  ;;  %vm602_vm1 = vweird.f32 %v5303_v2 }
  0xd7   :  { %1170 = vmatpush.bf16.msrb.mxu3 %v4519_v62  ;;  %6943 = vst [vmem:[#allocation101_spill] sm:$0xff] %v5306_v21  ;;  %v3612_v62 = vld [vmem:[%s6639_s4 + $0x88] sm:$0xf]  ;;  %v5323_v21 = vpop.eup %4041  ;;  %vm5434_vm4 = vmor %vm601_vm2, %vm602_vm1 }
  0xd8   :  { %1144 = vmatpush.bf16.msra.mxu1 %v4496_v54  ;;  %6944 = vst [vmem:[#allocation102_spill] sm:$0xff] %v5310_v34  ;;  %v5312_v54 = vor.u32 %v3968_v50, %v3630_v37  ;;  %v3964_v50 = vld [vmem:[%s6639_s4 + $0x8c] sm:$0xf]  ;;  %v5337_v55 = vor.u32 %v3966_v25, %v3612_v62  ;;  %v3598_v25 = vld [vmem:[%s6639_s4 + $0x78] sm:$0xf0]  ;;  %vm583_vm3 = vweird.f32 %v5323_v21 }
  0xd9   :  { %6946 = vst [vmem:[#allocation104_spill] sm:$0xff] %v5315_v38  ;;  %1012 = vmatpush.bf16.msrb.mxu0 %v5310_v34  ;;  %v5339_v37 = vor.u32 %v3964_v50, %v3614_v43  ;;  %v578_v38 = vmul.f32 %v5323_v21, %v5258_v63  ;;  %v3960_v62 = vld [vmem:[%s6639_s4 + $0x6c] sm:$0xf]  ;;  %v598_v50 = vsub.f32 1.0, %v597_v48  ;;  %v3958_v48 = vld [vmem:[%s6639_s4 + $0x54] sm:$0xf0]  ;;  %vm5451_vm6 = vmor %vm582_vm5, %vm583_vm3 }
  0xda   :  { %6945 = vst [vmem:[#allocation103_spill] sm:$0xff] %v5312_v54  ;;  %1038 = vmatpush.bf16.msra.mxu2 %v5312_v54  ;;  %v5367_v34 = vor.u32 %v3960_v62, %v3598_v25 }
  0xdb   :  { %1171 = vmatpush.bf16.msrb.mxu3 %v4577_v19  ;;  %6947 = vst [vmem:[#allocation105_spill] sm:$0xff] %v5337_v55  ;;  %v3962_v19 = vld [vmem:[%s6639_s4 + $0x74] sm:$0xf0] }
  0xdc   :  { %1145 = vmatpush.bf16.msra.mxu1 %v4526_v0  ;;  %6948 = vst [vmem:[#allocation106_spill] sm:$0xff] %v5339_v37  ;;  %v6949_v0 = vmov 0.0|0.0   ;;  %v5361_v43 = vpop.f32.mrf.mxu3  ;;  %v5365_v54 = vor.u32 %v3962_v19, %v3596_v31  ;;  %v3582_v19 = vld [vmem:[%s6639_s4 + $0x58] sm:$0xf0]  ;;  %v5386_v31 = vor.u32 %v3958_v48, %v3580_v15  ;;  %v203_v15 = vadd.f32 %v4866_v45, %v5006_v6 }
  0xdd   :  { %1031 = vmatmul.bf16.vlgmr.msrb.gmra.mxu1 %v6949_v0  ;;  %1057 = vmatmul.bf16.vlgmr.msra.gmra.mxu3 %v6949_v0  ;;  %v5358_v0 = vpop.f32.mrf.mxu2  ;;  %6951 = vst [vmem:[#allocation108_spill] sm:$0xff] %v5361_v43  ;;  %v3564_v43 = vld [vmem:[%s6639_s4 + $0x28] sm:$0xf]  ;;  %v607_v48 = vand.u32 2147483648, %v5236_v32  ;;  %v605_v45 = vand.u32 2147483647, %v5236_v32 }
  0xde   :  { %6950 = vst [vmem:[#allocation107_spill] sm:$0xff] %v5358_v0  ;;  %1013 = vmatpush.bf16.msrb.mxu0 %v5337_v55  ;;  %1039 = vmatpush.bf16.msra.mxu2 %v5339_v37  ;;  %v3956_v0 = vld [vmem:[%s6639_s4 + $0x4c] sm:$0xf] }
  0xdf   :  { %1172 = vmatpush.bf16.msrb.mxu3 %v4616_v30  ;;  %6952 = vst [vmem:[#allocation109_spill] sm:$0xff] %v5365_v54  ;;  %v5388_v62 = vor.u32 %v3956_v0, %v3582_v19  ;;  %v232_v0 = vadd.f32 %v4878_v13, %v5009_v60  ;;  %vm606_vm7 = vcmp.eq.f32.partialorder %v605_v45, 8.507059e+37 }
  0xe0   :  { %1146 = vmatpush.bf16.msra.mxu1 %v4563_v12  ;;  %6953 = vst [vmem:[#allocation110_spill] sm:$0xff] %v5367_v34  ;;  %v579_v12 = vsub.f32 1.0, %v578_v38  ;;  %v599_v38 = vmul.f32 %v5303_v2, %v598_v50  ;;  %v3954_v50 = vld [vmem:[%s6639_s4 + $0x34] sm:$0xf0] }
  0xe1   :  { %6954 = vst [vmem:[#allocation111_spill] sm:$0xff] %v5386_v31  ;;  %v5415_v6 = vor.u32 %v3954_v50, %v3564_v43  ;;  %v588_v43 = vand.u32 2147483648, %v5258_v63 }
  0xe2   :  { %1014 = vmatpush.bf16.msrb.mxu0 %v5365_v54  ;;  %1040 = vmatpush.bf16.msra.mxu2 %v5367_v34  ;;  %6955 = vst [vmem:[#allocation112_spill] sm:$0xff] %v5388_v62  ;;  %v580_v25 = vmul.f32 %v5323_v21, %v579_v12  ;;  %v3566_v12 = vld [vmem:[%s6639_s4 + $0x38] sm:$0xf0] }
  0xe3   :  { %1173 = vmatpush.bf16.msrb.mxu3 %v4654_v47  ;;  %v3952_v47 = vld [vmem:[%s6639_s4 + $0x2c] sm:$0xf]  ;;  %6956 = vst [vmem:[#allocation113_spill] sm:$0xff] %v5415_v6 }
  0xe4   :  { %1147 = vmatpush.bf16.msra.mxu1 %v4601_v24  ;;  %v600_v24 = vadd.f32 %v5303_v2, %v599_v38  ;;  %v5417_v13 = vor.u32 %v3952_v47, %v3566_v12  ;;  %v581_v38 = vadd.f32 %v5323_v21, %v580_v25  ;;  %v3948_v47 = vld [vmem:[%s6639_s4 + $0xc] sm:$0xf]  ;;  %v586_v25 = vand.u32 2147483647, %v5258_v63 }
  0xe5   :  { %v552_v19 = vpop.f32.mrf.mxu2 }
  0xe6   :  { %v571_v30 = vadd.f32 %v552_v19, %v203_v15  ;;  %1015 = vmatpush.bf16.msrb.mxu0 %v5386_v31  ;;  %1041 = vmatpush.bf16.msra.mxu2 %v5388_v62  ;;  %6957 = vst [vmem:[#allocation114_spill] sm:$0xff] %v5417_v13  ;;  %v3548_v15 = vld [vmem:[%s6639_s4 + $0x8] sm:$0xf]  ;;  %v3950_v19 = vld [vmem:[%s6639_s4 + $0x14] sm:$0xf0]  ;;  %v604_v50 = vsel %vm5434_vm4, %v5303_v2, %v600_v24  ;;  %vm587_vm8 = vcmp.eq.f32.partialorder %v586_v25, 8.507059e+37 }
  0xe7   :  { %1174 = vmatpush.bf16.msrb.mxu3 %v4682_v58  ;;  %v5457_v63 = vor.u32 %v3950_v19, %v3548_v15  ;;  %v585_v24 = vsel %vm5451_vm6, %v5323_v21, %v581_v38 }
  0xe8   :  { %1148 = vmatpush.bf16.msra.mxu1 %v4639_v40  ;;  %v565_v40 = vpop.f32.mrf.mxu3  ;;  %4043 = vtanh.f32 %v571_v30  ;;  %v608_v30 = vor.u32 1.1754944e-38, %v607_v48 }
  0xe9   :  { %v572_v60 = vadd.f32 %v565_v40, %v232_v0  ;;  %v3550_v40 = vld [vmem:[%s6639_s4 + $0x18] sm:$0xf0]  ;;  %6962 = vst [vmem:[#allocation115_spill] sm:$0xff] %v5457_v63 }
  0xea   :  { %1016 = vmatpush.bf16.msrb.mxu0 %v5415_v6  ;;  %1042 = vmatpush.bf16.msra.mxu2 %v5417_v13  ;;  %v5459_v32 = vor.u32 %v3948_v47, %v3550_v40  ;;  %v609_v2 = vsel %vm606_vm7, %v608_v30, %v604_v50 }
  0xeb   :  { %v3537_v12 = vmul.f32 -1.442695, %v572_v60  ;;  %1175 = vmatpush.bf16.msrb.mxu3 %v4702_v5  ;;  %v589_v60 = vor.u32 1.1754944e-38, %v588_v43  ;;  %v631_v19 = vmul.f32 0.0, %v609_v2 }
  0xec   :  { %1149 = vmatpush.bf16.msra.mxu1 %v4661_v51  ;;  %6963 = vst [vmem:[#allocation116_spill] sm:$0xff] %v5459_v32 }
  0xed   :  { %4045 = vpow2.f32 %v3537_v12  ;;  %v554_v48 = vpop.f32.mrf.mxu2  ;;  %v590_v5 = vsel %vm587_vm8, %v589_v60, %v585_v24 }
  0xee   :  { %1017 = vmatpush.bf16.msrb.mxu0 %v5457_v63  ;;  %1043 = vmatpush.bf16.msra.mxu2 %v5459_v32 }
  0xef   :  { %1289 = vmatpush.bf16.msra.mxu3 %v4740_v22 }
  0xf0   :  { %1263 = vmatpush.bf16.msrb.mxu1 %v4733_v20  ;;  %v4044_v20 = vpop.eup %4043  ;;  %v567_v15 = vpop.f32.mrf.mxu3 }
  0xf1   :  { %v632_v47 = vmul.f32 %v4044_v20, %v590_v5  ;;  %v6964_v15 = vld [vmem:[#allocation64_spill] sm:$0xff] }
  0xf3   :  { %1290 = vmatpush.bf16.msra.mxu3 %v4771_v41  ;;  %v4046_v21 = vpop.eup %4045  ;;  %v5469_v45 = vadd.f32 %v632_v47, %v631_v19  ;;  %v6965_v19 = vld [vmem:[#allocation8_spill] sm:$0xff] }
  0xf4   :  { %1264 = vmatpush.bf16.msrb.mxu1 %v4763_v33  ;;  %v615_v38 = vadd.f32 1.0, %v4046_v21  ;;  %v6966_v47 = vld [vmem:[#allocation16_spill] sm:$0xff]  ;;  %v6967_v21 = vld [vmem:[#allocation70_spill] sm:$0xff] }
  0xf6   :  { %4047 = vrcp.f32 %v615_v38  ;;  %v627_v20 = vand.u32 2147483648, %v615_v38  ;;  %v625_v50 = vand.u32 2147483647, %v615_v38  ;;  %vm621_vm10 = vweird.f32 %v615_v38 }
  0xf7   :  { %1291 = vmatpush.bf16.msra.mxu3 %v4797_v3  ;;  %4049 = vtanh.f32 %v5469_v45 }
  0xf8   :  { %1265 = vmatpush.bf16.msrb.mxu1 %v4787_v57  ;;  %v628_v30 = vor.u32 1.1754944e-38, %v627_v20  ;;  %vm626_vm12 = vcmp.eq.f32.partialorder %v625_v50, 8.507059e+37  ;;  %v6972_v20 = vld [vmem:[#allocation76_spill] sm:$0xff]  ;;  %v6974_v50 = vld [vmem:[#allocation22_spill] sm:$0xff] }
  0xfb   :  { %1292 = vmatpush.bf16.msra.mxu3 %v4817_v18 }
  0xfc   :  { %1266 = vmatpush.bf16.msrb.mxu1 %v4812_v16  ;;  %v4048_v43 = vpop.eup %4047 }
  0xfd   :  { %v617_v40 = vmul.f32 %v4048_v43, %v615_v38  ;;  %vm622_vm9 = vweird.f32 %v4048_v43  ;;  %v4050_v24 = vpop.eup %4049  ;;  %v6968_v38 = vld [vmem:[#allocation72_spill] sm:$0xff] }
  0xfe   :  { %vm623_vm11 = vmor %vm621_vm10, %vm622_vm9 }
  0xff   :  { %1293 = vmatpush.bf16.msra.mxu3 %v4839_v52  ;;  %v618_v5 = vsub.f32 1.0, %v617_v40  ;;  %v6970_v40 = vld [vmem:[#allocation17_spill] sm:$0xff] }
 0x100   :  { %1267 = vmatpush.bf16.msrb.mxu1 %v4834_v44 }
 0x101   :  { %v619_v25 = vmul.f32 %v4048_v43, %v618_v5  ;;  %v6971_v5 = vld [vmem:[#allocation75_spill] sm:$0xff] }
 0x103   :  { %1294 = vmatpush.bf16.msra.mxu3 %v4863_v28  ;;  %v620_v12 = vadd.f32 %v4048_v43, %v619_v25  ;;  %v6973_v25 = vld [vmem:[#allocation13_spill] sm:$0xff] }
 0x104   :  { %1268 = vmatpush.bf16.msrb.mxu1 %v4858_v26 }
 0x105   :  { %v624_v0 = vsel %vm623_vm11, %v4048_v43, %v620_v12  ;;  %v6969_v43 = vld [vmem:[#allocation10_spill] sm:$0xff] }
 0x106   :  { %v629_v60 = vsel %vm626_vm12, %v628_v30, %v624_v0  ;;  %v6975_v12 = vld [vmem:[#allocation18_spill] sm:$0xff]  ;;  %v6976_v30 = vld [vmem:[#allocation24_spill] sm:$0xff]  ;;  %v6977_v0 = vld [vmem:[#allocation21_spill] sm:$0xff] }
 0x107   :  { %1295 = vmatpush.bf16.msra.mxu3 %v4887_v35  ;;  %v635_v2 = vmul.f32 %v4050_v24, %v629_v60  ;;  %v6978_v24 = vld [vmem:[#allocation25_spill] sm:$0xff] }
 0x108   :  { %1269 = vmatpush.bf16.msrb.mxu1 %v4880_v17  ;;  %v6979_v60 = vld [vmem:[#allocation53_spill] sm:$0xff] }
 0x109   :  { %v636_v48 = vpack.c.bf16 %v635_v2, %v635_v2  ;;  %v6980_v2 = vld [vmem:[#allocation54_spill] sm:$0xff] }
 0x10b   :  { %1296 = vmatpush.bf16.msra.mxu3 %v4913_v56  ;;  %966 = vmatmul.bf16.vlgmr.msra.gmra.mxu0 %v636_v48 }
 0x10c   :  { %1270 = vmatpush.bf16.msrb.mxu1 %v4902_v9  ;;  %992 = vmatmul.bf16.vlgmr.msrb.gmra.mxu2 %v636_v48 }
 0x10d   :  { %1150 = vmatmul.bf16.vlgmr.msra.gmra.mxu1 %v636_v48  ;;  %1176 = vmatmul.bf16.vlgmr.msrb.gmra.mxu3 %v636_v48 }
 0x10e   :  { %1129 = vmatpush.bf16.msra.mxu0 %v4421_v29  ;;  %1155 = vmatpush.bf16.msrb.mxu2 %v4480_v49 }
 0x10f   :  { %1341 = vmatpush.bf16.msrb.mxu3 %v4924_v1 }
 0x110   :  { %1315 = vmatpush.bf16.msra.mxu1 %v4915_v8 }
 0x112   :  { %1130 = vmatpush.bf16.msra.mxu0 %v4461_v42  ;;  %1156 = vmatpush.bf16.msrb.mxu2 %v4516_v61 }
 0x113   :  { %1342 = vmatpush.bf16.msrb.mxu3 %v4967_v14  ;;  %v6994_v14 = vld [vmem:[#allocation97_spill] sm:$0xff] }
 0x114   :  { %1316 = vmatpush.bf16.msra.mxu1 %v4955_v27  ;;  %v6995_v27 = vld [vmem:[#allocation98_spill] sm:$0xff] }
 0x116   :  { %1131 = vmatpush.bf16.msra.mxu0 %v4494_v53  ;;  %1157 = vmatpush.bf16.msrb.mxu2 %v4546_v7 }
 0x117   :  { %1343 = vmatpush.bf16.msrb.mxu3 %v6964_v15  ;;  %v6992_v15 = vld [vmem:[#allocation90_spill] sm:$0xff] }
 0x118   :  { %1317 = vmatpush.bf16.msra.mxu1 %v4997_v59  ;;  %v6993_v59 = vld [vmem:[#allocation94_spill] sm:$0xff] }
 0x11a   :  { %1132 = vmatpush.bf16.msra.mxu0 %v6965_v19  ;;  %1158 = vmatpush.bf16.msrb.mxu2 %v6966_v47 }
 0x11b   :  { %1344 = vmatpush.bf16.msrb.mxu3 %v6968_v38  ;;  %1018 = vmatmul.bf16.vlgmr.msrb.gmra.mxu0 %v636_v48  ;;  %v6987_v38 = vld [vmem:[#allocation79_spill] sm:$0xff] }
 0x11c   :  { %1318 = vmatpush.bf16.msra.mxu1 %v6967_v21  ;;  %1044 = vmatmul.bf16.vlgmr.msra.gmra.mxu2 %v636_v48  ;;  %v6988_v21 = vld [vmem:[#allocation80_spill] sm:$0xff] }
 0x11e   :  { %1133 = vmatpush.bf16.msra.mxu0 %v6969_v43  ;;  %1159 = vmatpush.bf16.msrb.mxu2 %v6970_v40 }
 0x11f   :  { %1345 = vmatpush.bf16.msrb.mxu3 %v6972_v20  ;;  %v6985_v20 = vld [vmem:[#allocation73_spill] sm:$0xff] }
 0x120   :  { %1319 = vmatpush.bf16.msra.mxu1 %v6971_v5  ;;  %v6986_v5 = vld [vmem:[#allocation74_spill] sm:$0xff] }
 0x122   :  { %1134 = vmatpush.bf16.msra.mxu0 %v6973_v25  ;;  %1160 = vmatpush.bf16.msrb.mxu2 %v6974_v50 }
 0x123   :  { %1346 = vmatpush.bf16.msrb.mxu3 %v5141_v39  ;;  %v6981_v39 = vld [vmem:[#allocation59_spill] sm:$0xff] }
 0x124   :  { %1320 = vmatpush.bf16.msra.mxu1 %v5129_v10  ;;  %v6982_v10 = vld [vmem:[#allocation60_spill] sm:$0xff] }
 0x126   :  { %1135 = vmatpush.bf16.msra.mxu0 %v6975_v12  ;;  %1161 = vmatpush.bf16.msrb.mxu2 %v6976_v30 }
 0x127   :  { %1347 = vmatpush.bf16.msrb.mxu3 %v5173_v4  ;;  %v6984_v4 = vld [vmem:[#allocation69_spill] sm:$0xff] }
 0x128   :  { %1321 = vmatpush.bf16.msra.mxu1 %v5168_v36  ;;  %v6983_v36 = vld [vmem:[#allocation66_spill] sm:$0xff] }
 0x12a   :  { %1136 = vmatpush.bf16.msra.mxu0 %v6977_v0  ;;  %1162 = vmatpush.bf16.msrb.mxu2 %v6978_v24 }
 0x12b   :  { %1348 = vmatpush.bf16.msrb.mxu3 %v5216_v46  ;;  %v6990_v46 = vld [vmem:[#allocation84_spill] sm:$0xff] }
 0x12c   :  { %1322 = vmatpush.bf16.msra.mxu1 %v5207_v11  ;;  %v6989_v11 = vld [vmem:[#allocation83_spill] sm:$0xff] }
 0x12d   :  { %1137 = vmatmul.bf16.vlgmr.msra.gmra.mxu0 %v636_v48  ;;  %1163 = vmatmul.bf16.vlgmr.msrb.gmra.mxu2 %v636_v48  ;;  %v6991_v48 = vld [vmem:[#allocation89_spill] sm:$0xff] }
 0x12e   :  { %1250 = vmatpush.bf16.msrb.mxu0 %v6979_v60  ;;  %1276 = vmatpush.bf16.msra.mxu2 %v6980_v2 }
 0x132   :  { %1251 = vmatpush.bf16.msrb.mxu0 %v6981_v39  ;;  %1277 = vmatpush.bf16.msra.mxu2 %v6982_v10 }
 0x136   :  { %1252 = vmatpush.bf16.msrb.mxu0 %v6983_v36  ;;  %1278 = vmatpush.bf16.msra.mxu2 %v6984_v4 }
 0x13a   :  { %1253 = vmatpush.bf16.msrb.mxu0 %v6985_v20  ;;  %1279 = vmatpush.bf16.msra.mxu2 %v6986_v5 }
 0x13e   :  { %1254 = vmatpush.bf16.msrb.mxu0 %v6987_v38  ;;  %1280 = vmatpush.bf16.msra.mxu2 %v6988_v21  ;;  %v6996_v38 = vld [vmem:[#allocation99_spill] sm:$0xff]  ;;  %v6997_v21 = vld [vmem:[#allocation100_spill] sm:$0xff] }
 0x142   :  { %1255 = vmatpush.bf16.msrb.mxu0 %v6989_v11  ;;  %1281 = vmatpush.bf16.msra.mxu2 %v6990_v46  ;;  %v6998_v11 = vld [vmem:[#allocation102_spill] sm:$0xff]  ;;  %v6999_v46 = vld [vmem:[#allocation103_spill] sm:$0xff] }
 0x144   :  { %v980_v5 = vpop.f32.mrf.mxu1 }
 0x146   :  { %1256 = vmatpush.bf16.msrb.mxu0 %v6991_v48  ;;  %1282 = vmatpush.bf16.msra.mxu2 %v6992_v15 }
 0x14a   :  { %1257 = vmatpush.bf16.msrb.mxu0 %v5231_v23  ;;  %1283 = vmatpush.bf16.msra.mxu2 %v6993_v59  ;;  %v1006_v48 = vpop.f32.mrf.mxu3 }
 0x14c   :  { %v982_v20 = vpop.f32.mrf.mxu1 }
 0x14e   :  { %1302 = vmatpush.bf16.msra.mxu0 %v6994_v14  ;;  %1328 = vmatpush.bf16.msrb.mxu2 %v6995_v27 }
 0x152   :  { %1303 = vmatpush.bf16.msra.mxu0 %v6996_v38  ;;  %1329 = vmatpush.bf16.msrb.mxu2 %v6997_v21  ;;  %v1008_v27 = vpop.f32.mrf.mxu3  ;;  %v7003_v21 = vld [vmem:[#allocation32_spill] sm:$0xff] }
 0x153   :  { %v347_v27 = vld [vmem:[%s6641_s5] sm:$0xf] }
 0x156   :  { %1304 = vmatpush.bf16.msra.mxu0 %v6998_v11  ;;  %1330 = vmatpush.bf16.msrb.mxu2 %v6999_v46 }
 0x15a   :  { %1305 = vmatpush.bf16.msra.mxu0 %v5337_v55  ;;  %1331 = vmatpush.bf16.msrb.mxu2 %v5339_v37  ;;  %v1032_v14 = vpop.f32.mrf.mxu1 }
 0x15e   :  { %1306 = vmatpush.bf16.msra.mxu0 %v5365_v54  ;;  %1332 = vmatpush.bf16.msrb.mxu2 %v5367_v34  ;;  %v5551_v34 = vperm.slane %v347_v27, 0 }
 0x160   :  { %v1058_v46 = vpop.f32.mrf.mxu3  ;;  %7000 = vst [vmem:[#allocation8_spill] sm:$0xff] %v5551_v34 }
 0x162   :  { %1307 = vmatpush.bf16.msra.mxu0 %v5386_v31  ;;  %1333 = vmatpush.bf16.msrb.mxu2 %v5388_v62  ;;  %v1034_v20 = vpop.f32.mrf.mxu1 }
 0x166   :  { %1308 = vmatpush.bf16.msra.mxu0 %v5415_v6  ;;  %1334 = vmatpush.bf16.msrb.mxu2 %v5417_v13  ;;  %v5554_v13 = vperm.slane %v347_v27, 1 }
 0x168   :  { %v1060_v37 = vpop.f32.mrf.mxu3  ;;  %7001 = vst [vmem:[#allocation16_spill] sm:$0xff] %v5554_v13 }
 0x169   :  { %v7002_v37 = vld [vmem:[#allocation28_spill] sm:$0xff] }
 0x16a   :  { %1309 = vmatpush.bf16.msra.mxu0 %v5457_v63  ;;  %1335 = vmatpush.bf16.msrb.mxu2 %v5459_v32  ;;  %v176_v38 = vadd.f32 %v7003_v21, %v7002_v37  ;;  %v7006_v21 = vld [vmem:[#allocation52_spill] sm:$0xff] }
 0x188   :  { %v967_v31 = vpop.f32.mrf.mxu0 }
 0x189   :  { %v981_v54 = vadd.f32 %v980_v5, %v967_v31 }
 0x18a   :  { %v1151_v62 = vpop.f32.mrf.mxu1 }
 0x18b   :  { %v1062_v6 = vadd.f32 %v981_v54, %v5551_v34  ;;  %v1182_v15 = vadd.f32 %v1151_v62, %v176_v38 }
 0x18d   :  { %v3794_v55 = vmul.f32 -1.442695, %v1062_v6  ;;  %v3798_v6 = vmul.f32 -1.442695, %v1182_v15  ;;  %v5564_v15 = vperm.slane %v347_v27, 3 }
 0x18f   :  { %v993_v20 = vpop.f32.mrf.mxu2  ;;  %4051 = vpow2.f32 %v3794_v55  ;;  %v5559_v55 = vperm.slane %v347_v27, 2  ;;  %7007 = vst [vmem:[#allocation17_spill] sm:$0xff] %v5564_v15 }
 0x190   :  { %v1007_v63 = vadd.f32 %v1006_v48, %v993_v20  ;;  %v1177_v11 = vpop.f32.mrf.mxu3  ;;  %v969_v32 = vpop.f32.mrf.mxu0  ;;  %v7005_v20 = vld [vmem:[#allocation63_spill] sm:$0xff] }
 0x191   :  { %7004 = vst [vmem:[#allocation10_spill] sm:$0xff] %v5559_v55  ;;  %v234_v37 = vadd.f32 %v7006_v21, %v7005_v20 }
 0x192   :  { %v1063_v59 = vadd.f32 %v1007_v63, %v5554_v13  ;;  %v1153_v23 = vpop.f32.mrf.mxu1 }
 0x194   :  { %v3795_v1 = vmul.f32 -1.442695, %v1063_v59  ;;  %v1184_v59 = vadd.f32 %v1177_v11, %v234_v37 }
 0x195   :  { %v4052_v31 = vpop.eup %4051 }
 0x196   :  { %4053 = vpow2.f32 %v3795_v1  ;;  %v1069_v5 = vadd.f32 1.0, %v4052_v31 }
 0x197   :  { %v995_v54 = vpop.f32.mrf.mxu2 }
 0x198   :  { %v1179_v34 = vpop.f32.mrf.mxu3  ;;  %4055 = vrcp.f32 %v1069_v5  ;;  %v1019_v8 = vpop.f32.mrf.mxu0  ;;  %v1079_v21 = vand.u32 2147483647, %v1069_v5  ;;  %vm1075_vm14 = vweird.f32 %v1069_v5 }
 0x199   :  { %v1033_v48 = vadd.f32 %v1032_v14, %v1019_v8  ;;  %4057 = vpow2.f32 %v3798_v6  ;;  %v3799_v14 = vmul.f32 -1.442695, %v1184_v59  ;;  %v1081_v8 = vand.u32 2147483648, %v1069_v5 }
 0x19a   :  { %vm1080_vm0 = vcmp.eq.f32.partialorder %v1079_v21, 8.507059e+37 }
 0x19b   :  { %v1064_v1 = vadd.f32 %v1033_v48, %v5559_v55 }
 0x19c   :  { %v4054_v32 = vpop.eup %4053 }
 0x19d   :  { %v1088_v63 = vadd.f32 1.0, %v4054_v32 }
 0x19e   :  { %v4056_v23 = vpop.eup %4055 }
 0x19f   :  { %4059 = vrcp.f32 %v1088_v63  ;;  %v1045_v62 = vpop.f32.mrf.mxu2  ;;  %v1071_v38 = vmul.f32 %v4056_v23, %v1069_v5  ;;  %v4058_v31 = vpop.eup %4057  ;;  %vm1076_vm13 = vweird.f32 %v4056_v23  ;;  %v1098_v5 = vand.u32 2147483647, %v1088_v63 }
 0x1a0   :  { %v1021_v34 = vpop.f32.mrf.mxu0  ;;  %v1059_v13 = vadd.f32 %v1058_v46, %v1045_v62  ;;  %4061 = vtanh.f32 %v1064_v1  ;;  %v5567_v11 = vadd.f32 1.0, %v4058_v31  ;;  %vm1077_vm15 = vmor %vm1075_vm14, %vm1076_vm13  ;;  %v7008_v62 = vld [vmem:[#allocation27_spill] sm:$0xff]  ;;  %vm1094_vm2 = vweird.f32 %v1088_v63 }
 0x1a1   :  { %v1072_v54 = vsub.f32 1.0, %v1071_v38  ;;  %4063 = vpow2.f32 %v3799_v14  ;;  %v1082_v34 = vor.u32 1.1754944e-38, %v1081_v8  ;;  %vm1099_vm4 = vcmp.eq.f32.partialorder %v1098_v5, 8.507059e+37 }
 0x1a2   :  { %v1065_v32 = vadd.f32 %v1059_v13, %v5564_v15  ;;  %v1100_v13 = vand.u32 2147483648, %v1088_v63  ;;  %vm1213_vm10 = vweird.f32 %v5567_v11 }
 0x1a3   :  { %v1073_v6 = vmul.f32 %v4056_v23, %v1072_v54  ;;  %v7009_v54 = vld [vmem:[#allocation31_spill] sm:$0xff] }
 0x1a4   :  { %v3796_v27 = vmul.f32 -1.442695, %v1065_v32  ;;  %v147_v55 = vadd.f32 %v7009_v54, %v7008_v62 }
 0x1a5   :  { %v4060_v20 = vpop.eup %4059  ;;  %v1074_v48 = vadd.f32 %v4056_v23, %v1073_v6 }
 0x1a6   :  { %v1090_v37 = vmul.f32 %v4060_v20, %v1088_v63  ;;  %4065 = vpow2.f32 %v3796_v27  ;;  %v4062_v1 = vpop.eup %4061  ;;  %vm1095_vm1 = vweird.f32 %v4060_v20 }
 0x1a7   :  { %v1047_v38 = vpop.f32.mrf.mxu2  ;;  %v1078_v59 = vsel %vm1077_vm15, %v4056_v23, %v1074_v48  ;;  %4067 = vrcp.f32 %v5567_v11  ;;  %v1101_v23 = vor.u32 1.1754944e-38, %v1100_v13  ;;  %vm1096_vm3 = vmor %vm1094_vm2, %vm1095_vm1 }
 0x1a8   :  { %v1091_v46 = vsub.f32 1.0, %v1090_v37  ;;  %v1083_v31 = vsel %vm1080_vm0, %v1082_v34, %v1078_v59  ;;  %v4064_v37 = vpop.eup %4063 }
 0x1a9   :  { %v1125_v6 = vmul.f32 %v4062_v1, %v1083_v31 }
 0x1aa   :  { %v1092_v15 = vmul.f32 %v4060_v20, %v1091_v46  ;;  %v1138_v14 = vpop.f32.mrf.mxu0 }
 0x1ab   :  { %v1181_v32 = vadd.f32 %v1138_v14, %v147_v55 }
 0x1ac   :  { %v1093_v8 = vadd.f32 %v4060_v20, %v1092_v15  ;;  %v4066_v48 = vpop.eup %4065  ;;  %v5578_v15 = vadd.f32 1.0, %v4064_v37 }
 0x1ad   :  { %v3797_v21 = vmul.f32 -1.442695, %v1181_v32  ;;  %v5572_v38 = vpop.eup %4067  ;;  %v1108_v62 = vadd.f32 1.0, %v4066_v48 }
 0x1ae   :  { %v1097_v27 = vsel %vm1096_vm3, %v4060_v20, %v1093_v8  ;;  %v1209_v63 = vmul.f32 %v5572_v38, %v5567_v11  ;;  %vm1214_vm7 = vweird.f32 %v5572_v38  ;;  %vm1233_vm2 = vweird.f32 %v5578_v15 }
 0x1af   :  { %v1102_v54 = vsel %vm1099_vm4, %v1101_v23, %v1097_v27  ;;  %4069 = vpow2.f32 %v3797_v21  ;;  %v7011_v23 = vld [vmem:[#allocation62_spill] sm:$0xff]  ;;  %v7012_v21 = vld [vmem:[#allocation51_spill] sm:$0xff]  ;;  %v1118_v27 = vand.u32 2147483647, %v1108_v62  ;;  %vm1114_vm6 = vweird.f32 %v1108_v62  ;;  %vm5594_vm11 = vmor %vm1213_vm10, %vm1214_vm7 }
 0x1b0   :  { %v1124_v34 = vmul.f32 0.0, %v1102_v54  ;;  %v1164_v46 = vpop.f32.mrf.mxu2  ;;  %4071 = vrcp.f32 %v1108_v62  ;;  %v1210_v31 = vsub.f32 1.0, %v1209_v63  ;;  %v205_v48 = vadd.f32 %v7012_v21, %v7011_v23 }
 0x1b1   :  { %4073 = vrcp.f32 %v5578_v15  ;;  %vm1119_vm9 = vcmp.eq.f32.partialorder %v1118_v27, 8.507059e+37 }
 0x1b2   :  { %v5574_v59 = vadd.f32 %v1125_v6, %v1124_v34  ;;  %v1140_v55 = vpop.f32.mrf.mxu0  ;;  %v1211_v8 = vmul.f32 %v5572_v38, %v1210_v31  ;;  %v1120_v6 = vand.u32 2147483648, %v1108_v62 }
 0x1b3   :  { %v1183_v55 = vadd.f32 %v1164_v46, %v205_v48 }
 0x1b4   :  { %7010 = vst [vmem:[#allocation13_spill] sm:$0xff] %v5574_v59  ;;  %v1212_v31 = vadd.f32 %v5572_v38, %v1211_v8 }
 0x1b5   :  { %v4070_v1 = vpop.eup %4069 }
 0x1b6   :  { %v1188_v13 = vadd.f32 1.0, %v4070_v1  ;;  %v4072_v20 = vpop.eup %4071 }
 0x1b7   :  { %v1110_v5 = vmul.f32 %v4072_v20, %v1108_v62  ;;  %vm1115_vm5 = vweird.f32 %v4072_v20  ;;  %v5585_v54 = vpop.eup %4073  ;;  %v1217_v62 = vand.u32 2147483647, %v5567_v11 }
 0x1b8   :  { %4075 = vrcp.f32 %v1188_v13  ;;  %v1166_v14 = vpop.f32.mrf.mxu2  ;;  %vm1116_vm8 = vmor %vm1114_vm6, %vm1115_vm5  ;;  %v1200_v8 = vand.u32 2147483648, %v1188_v13  ;;  %v1198_v56 = vand.u32 2147483647, %v1188_v13  ;;  %vm1194_vm13 = vweird.f32 %v1188_v13 }
 0x1b9   :  { %v1111_v32 = vsub.f32 1.0, %v1110_v5  ;;  %4077 = vtanh.f32 %v5574_v59  ;;  %v1121_v5 = vor.u32 1.1754944e-38, %v1120_v6  ;;  %v1219_v14 = vand.u32 2147483648, %v5567_v11 }
 0x1ba   :  { %4079 = vtanh.f32 %v1183_v55  ;;  %vm1218_vm14 = vcmp.eq.f32.partialorder %v1217_v62, 8.507059e+37  ;;  %v1201_v11 = vor.u32 1.1754944e-38, %v1200_v8  ;;  %vm1199_vm0 = vcmp.eq.f32.partialorder %v1198_v56, 8.507059e+37  ;;  %v7018_v62 = vld [vmem:[#allocation5_spill] sm:$0xff] }
 0x1bb   :  { %v1112_v37 = vmul.f32 %v4072_v20, %v1111_v32  ;;  %v1229_v32 = vmul.f32 %v5585_v54, %v5578_v15  ;;  %v1220_v27 = vor.u32 1.1754944e-38, %v1219_v14  ;;  %vm1234_vm1 = vweird.f32 %v5585_v54 }
 0x1bc   :  { %v1239_v56 = vand.u32 2147483648, %v5578_v15  ;;  %vm1235_vm3 = vmor %vm1233_vm2, %vm1234_vm1 }
 0x1bd   :  { %v1113_v63 = vadd.f32 %v4072_v20, %v1112_v37 }
 0x1be   :  { %v4076_v34 = vpop.eup %4075  ;;  %v1240_v8 = vor.u32 1.1754944e-38, %v1239_v56  ;;  %v7033_v56 = vld [vmem:[#allocation50_spill] sm:$0xff] }
 0x1bf   :  { %v1190_v1 = vmul.f32 %v4076_v34, %v1188_v13  ;;  %v1117_v21 = vsel %vm1116_vm8, %v4072_v20, %v1113_v63  ;;  %v4078_v23 = vpop.eup %4077  ;;  %vm1195_vm12 = vweird.f32 %v4076_v34  ;;  %v1216_v20 = vsel %vm5594_vm11, %v5572_v38, %v1212_v31 }
 0x1c0   :  { %v1122_v48 = vsel %vm1119_vm9, %v1121_v5, %v1117_v21  ;;  %v1230_v63 = vsub.f32 1.0, %v1229_v32  ;;  %vm1196_vm15 = vmor %vm1194_vm13, %vm1195_vm12  ;;  %v1221_v5 = vsel %vm1218_vm14, %v1220_v27, %v1216_v20  ;;  %v7016_v21 = vld [vmem:[#allocation3_spill] sm:$0xff]  ;;  %v7017_v32 = vld [vmem:[#allocation4_spill] sm:$0xff] }
 0x1c1   :  { %v1191_v46 = vsub.f32 1.0, %v1190_v1  ;;  %v1128_v6 = vmul.f32 %v4078_v23, %v1122_v48  ;;  %v7015_v23 = vld [vmem:[#allocation2_spill] sm:$0xff]  ;;  %v1243_v14 = vmul.f32 %v1221_v5, %v5469_v45  ;;  %v7020_v48 = vld [vmem:[#allocation7_spill] sm:$0xff]  ;;  %v7021_v27 = vld [vmem:[#allocation9_spill] sm:$0xff] }
 0x1c2   :  { %v1231_v38 = vmul.f32 %v5585_v54, %v1230_v63  ;;  %v7019_v45 = vld [vmem:[#allocation6_spill] sm:$0xff]  ;;  %v7022_v63 = vld [vmem:[#allocation12_spill] sm:$0xff] }
 0x1c3   :  { %v1192_v59 = vmul.f32 %v4076_v34, %v1191_v46  ;;  %v1249_v1 = vpack.c.bf16 %v1128_v6, %v1128_v6  ;;  %v4080_v46 = vpop.eup %4079 }
 0x1c5   :  { %v1193_v9 = vadd.f32 %v4076_v34, %v1192_v59  ;;  %1271 = vmatmul.bf16.vlgmr.msrb.gmra.mxu1 %v1249_v1  ;;  %1297 = vmatmul.bf16.vlgmr.msra.gmra.mxu3 %v1249_v1 }
 0x1c6   :  { %1434 = vmatpush.bf16.msrb.mxu1 %v7015_v23  ;;  %1460 = vmatpush.bf16.msra.mxu3 %v7016_v21 }
 0x1c7   :  { %v1197_v55 = vsel %vm1196_vm15, %v4076_v34, %v1193_v9  ;;  %v1232_v9 = vadd.f32 %v5585_v54, %v1231_v38  ;;  %v1237_v34 = vand.u32 2147483647, %v5578_v15  ;;  %v7023_v15 = vld [vmem:[#allocation11_spill] sm:$0xff] }
 0x1c8   :  { %v1202_v31 = vsel %vm1199_vm0, %v1201_v11, %v1197_v55  ;;  %v7024_v55 = vld [vmem:[#allocation15_spill] sm:$0xff] }
 0x1c9   :  { %v1244_v59 = vmul.f32 %v4080_v46, %v1202_v31  ;;  %v1236_v37 = vsel %vm1235_vm3, %v5585_v54, %v1232_v9  ;;  %vm1238_vm4 = vcmp.eq.f32.partialorder %v1237_v34, 8.507059e+37  ;;  %v7025_v54 = vld [vmem:[#allocation14_spill] sm:$0xff]  ;;  %v7026_v46 = vld [vmem:[#allocation20_spill] sm:$0xff]  ;;  %v7027_v38 = vld [vmem:[#allocation19_spill] sm:$0xff] }
 0x1ca   :  { %1435 = vmatpush.bf16.msrb.mxu1 %v7017_v32  ;;  %1461 = vmatpush.bf16.msra.mxu3 %v7018_v62  ;;  %v1241_v20 = vsel %vm1238_vm4, %v1240_v8, %v1236_v37  ;;  %v7029_v31 = vld [vmem:[#allocation26_spill] sm:$0xff]  ;;  %v7032_v9 = vld [vmem:[#allocation49_spill] sm:$0xff]  ;;  %v7036_v8 = vld [vmem:[#allocation55_spill] sm:$0xff] }
 0x1cb   :  { %v5605_v13 = vadd.f32 %v1244_v59, %v1243_v14  ;;  %v7030_v14 = vld [vmem:[#allocation47_spill] sm:$0xff]  ;;  %v7031_v59 = vld [vmem:[#allocation48_spill] sm:$0xff]  ;;  %v7034_v34 = vld [vmem:[#allocation73_spill] sm:$0xff] }
 0x1cc   :  { %v7035_v37 = vld [vmem:[#allocation74_spill] sm:$0xff] }
 0x1cd   :  { %4081 = vtanh.f32 %v5605_v13 }
 0x1ce   :  { %1436 = vmatpush.bf16.msrb.mxu1 %v7019_v45  ;;  %1462 = vmatpush.bf16.msra.mxu3 %v7020_v48 }
 0x1d2   :  { %1437 = vmatpush.bf16.msrb.mxu1 %v7021_v27  ;;  %1463 = vmatpush.bf16.msra.mxu3 %v7022_v63 }
 0x1d3   :  { %v4082_v6 = vpop.eup %4081 }
 0x1d4   :  { %v1247_v11 = vmul.f32 %v4082_v6, %v1241_v20  ;;  %v7037_v6 = vld [vmem:[#allocation57_spill] sm:$0xff]  ;;  %v7038_v20 = vld [vmem:[#allocation79_spill] sm:$0xff] }
 0x1d5   :  { %1323 = vmatmul.bf16.vlgmr.msra.gmra.mxu1 %v1249_v1  ;;  %1349 = vmatmul.bf16.vlgmr.msrb.gmra.mxu3 %v1249_v1  ;;  %v7028_v1 = vld [vmem:[#allocation23_spill] sm:$0xff] }
 0x1d6   :  { %v1248_v5 = vpack.c.bf16 %v1247_v11, %v1247_v11  ;;  %1438 = vmatpush.bf16.msrb.mxu1 %v7023_v15  ;;  %1464 = vmatpush.bf16.msra.mxu3 %v7024_v55  ;;  %v7039_v11 = vld [vmem:[#allocation80_spill] sm:$0xff] }
 0x1d8   :  { %1258 = vmatmul.bf16.vlgmr.msrb.gmra.mxu0 %v1248_v5  ;;  %1284 = vmatmul.bf16.vlgmr.msra.gmra.mxu2 %v1248_v5 }
 0x1d9   :  { %1421 = vmatpush.bf16.msrb.mxu0 %v4421_v29  ;;  %1447 = vmatpush.bf16.msra.mxu2 %v4480_v49 }
 0x1da   :  { %1439 = vmatpush.bf16.msrb.mxu1 %v7025_v54  ;;  %1465 = vmatpush.bf16.msra.mxu3 %v7026_v46 }
 0x1dd   :  { %1422 = vmatpush.bf16.msrb.mxu0 %v4461_v42  ;;  %1448 = vmatpush.bf16.msra.mxu2 %v4516_v61 }
 0x1de   :  { %1440 = vmatpush.bf16.msrb.mxu1 %v7027_v38  ;;  %1466 = vmatpush.bf16.msra.mxu3 %v4682_v58 }
 0x1e1   :  { %1423 = vmatpush.bf16.msrb.mxu0 %v4494_v53  ;;  %1449 = vmatpush.bf16.msra.mxu2 %v4546_v7 }
 0x1e2   :  { %1441 = vmatpush.bf16.msrb.mxu1 %v4661_v51  ;;  %1467 = vmatpush.bf16.msra.mxu3 %v7028_v1 }
 0x1e5   :  { %1424 = vmatpush.bf16.msrb.mxu0 %v6965_v19  ;;  %1450 = vmatpush.bf16.msra.mxu2 %v6966_v47 }
 0x1e6   :  { %1555 = vmatpush.bf16.msra.mxu1 %v7029_v31  ;;  %1581 = vmatpush.bf16.msrb.mxu3 %v4740_v22 }
 0x1e7   :  { %1442 = vmatmul.bf16.vlgmr.msrb.gmra.mxu1 %v1248_v5  ;;  %1468 = vmatmul.bf16.vlgmr.msra.gmra.mxu3 %v1248_v5 }
 0x1e8   :  { %1310 = vmatmul.bf16.vlgmr.msra.gmra.mxu0 %v1248_v5  ;;  %1336 = vmatmul.bf16.vlgmr.msrb.gmra.mxu2 %v1248_v5 }
 0x1e9   :  { %1425 = vmatpush.bf16.msrb.mxu0 %v6969_v43  ;;  %1451 = vmatpush.bf16.msra.mxu2 %v6970_v40 }
 0x1ea   :  { %1556 = vmatpush.bf16.msra.mxu1 %v4763_v33  ;;  %1582 = vmatpush.bf16.msrb.mxu3 %v4771_v41 }
 0x1ed   :  { %1426 = vmatpush.bf16.msrb.mxu0 %v6973_v25  ;;  %1452 = vmatpush.bf16.msra.mxu2 %v6974_v50 }
 0x1ee   :  { %1557 = vmatpush.bf16.msra.mxu1 %v4787_v57  ;;  %1583 = vmatpush.bf16.msrb.mxu3 %v4797_v3 }
 0x1f1   :  { %1427 = vmatpush.bf16.msrb.mxu0 %v6975_v12  ;;  %1453 = vmatpush.bf16.msra.mxu2 %v6976_v30 }
 0x1f2   :  { %1558 = vmatpush.bf16.msra.mxu1 %v4812_v16  ;;  %1584 = vmatpush.bf16.msrb.mxu3 %v4817_v18 }
 0x1f5   :  { %1428 = vmatpush.bf16.msrb.mxu0 %v6977_v0  ;;  %1454 = vmatpush.bf16.msra.mxu2 %v6978_v24 }
 0x1f6   :  { %1559 = vmatpush.bf16.msra.mxu1 %v4834_v44  ;;  %1585 = vmatpush.bf16.msrb.mxu3 %v4839_v52 }
 0x1f8   :  { %1429 = vmatmul.bf16.vlgmr.msrb.gmra.mxu0 %v1248_v5  ;;  %1455 = vmatmul.bf16.vlgmr.msra.gmra.mxu2 %v1248_v5  ;;  %v7040_v5 = vld [vmem:[#allocation61_spill] sm:$0xff] }
 0x1f9   :  { %1542 = vmatpush.bf16.msra.mxu0 %v6979_v60  ;;  %1568 = vmatpush.bf16.msrb.mxu2 %v6980_v2 }
 0x1fa   :  { %1560 = vmatpush.bf16.msra.mxu1 %v4858_v26  ;;  %1586 = vmatpush.bf16.msrb.mxu3 %v4863_v28  ;;  %v7075_v28 = vld [vmem:[#allocation16_spill] sm:$0xff] }
 0x1fd   :  { %1543 = vmatpush.bf16.msra.mxu0 %v6981_v39  ;;  %1569 = vmatpush.bf16.msrb.mxu2 %v6982_v10 }
 0x1fe   :  { %1561 = vmatpush.bf16.msra.mxu1 %v4880_v17  ;;  %1587 = vmatpush.bf16.msrb.mxu3 %v4887_v35 }
 0x201   :  { %1544 = vmatpush.bf16.msra.mxu0 %v6983_v36  ;;  %1570 = vmatpush.bf16.msrb.mxu2 %v6984_v4 }
 0x202   :  { %1562 = vmatpush.bf16.msra.mxu1 %v7030_v14  ;;  %1588 = vmatpush.bf16.msrb.mxu3 %v7031_v59  ;;  %v7041_v14 = vld [vmem:[#allocation64_spill] sm:$0xff]  ;;  %v7042_v59 = vld [vmem:[#allocation83_spill] sm:$0xff] }
 0x205   :  { %1545 = vmatpush.bf16.msra.mxu0 %v7034_v34  ;;  %1571 = vmatpush.bf16.msrb.mxu2 %v7035_v37  ;;  %v7045_v34 = vld [vmem:[#allocation72_spill] sm:$0xff]  ;;  %v7046_v37 = vld [vmem:[#allocation89_spill] sm:$0xff] }
 0x206   :  { %1607 = vmatpush.bf16.msrb.mxu1 %v7032_v9  ;;  %1633 = vmatpush.bf16.msra.mxu3 %v7033_v56  ;;  %v7043_v9 = vld [vmem:[#allocation84_spill] sm:$0xff]  ;;  %v7044_v56 = vld [vmem:[#allocation70_spill] sm:$0xff] }
 0x209   :  { %1546 = vmatpush.bf16.msra.mxu0 %v7038_v20  ;;  %1572 = vmatpush.bf16.msrb.mxu2 %v7039_v11  ;;  %v7049_v20 = vld [vmem:[#allocation76_spill] sm:$0xff]  ;;  %v7050_v11 = vld [vmem:[#allocation93_spill] sm:$0xff] }
 0x20a   :  { %1608 = vmatpush.bf16.msrb.mxu1 %v7036_v8  ;;  %1634 = vmatpush.bf16.msra.mxu3 %v7037_v6  ;;  %v7047_v8 = vld [vmem:[#allocation90_spill] sm:$0xff]  ;;  %v7048_v6 = vld [vmem:[#allocation75_spill] sm:$0xff] }
 0x20d   :  { %1547 = vmatpush.bf16.msra.mxu0 %v7042_v59  ;;  %1573 = vmatpush.bf16.msrb.mxu2 %v7043_v9  ;;  %v7053_v59 = vld [vmem:[#allocation98_spill] sm:$0xff]  ;;  %v7054_v9 = vld [vmem:[#allocation81_spill] sm:$0xff] }
 0x20e   :  { %1609 = vmatpush.bf16.msrb.mxu1 %v7040_v5  ;;  %1635 = vmatpush.bf16.msra.mxu3 %v7041_v14  ;;  %v7051_v5 = vld [vmem:[#allocation94_spill] sm:$0xff]  ;;  %v7052_v14 = vld [vmem:[#allocation97_spill] sm:$0xff] }
 0x211   :  { %1548 = vmatpush.bf16.msra.mxu0 %v7046_v37  ;;  %1574 = vmatpush.bf16.msrb.mxu2 %v7047_v8  ;;  %v7057_v37 = vld [vmem:[#allocation100_spill] sm:$0xff]  ;;  %v7058_v8 = vld [vmem:[#allocation85_spill] sm:$0xff] }
 0x212   :  { %1610 = vmatpush.bf16.msrb.mxu1 %v7044_v56  ;;  %1636 = vmatpush.bf16.msra.mxu3 %v7045_v34  ;;  %v7055_v56 = vld [vmem:[#allocation82_spill] sm:$0xff]  ;;  %v7056_v34 = vld [vmem:[#allocation99_spill] sm:$0xff] }
 0x215   :  { %1549 = vmatpush.bf16.msra.mxu0 %v7050_v11  ;;  %1575 = vmatpush.bf16.msrb.mxu2 %v7051_v5  ;;  %v7061_v11 = vld [vmem:[#allocation103_spill] sm:$0xff] }
 0x216   :  { %1611 = vmatpush.bf16.msrb.mxu1 %v7048_v6  ;;  %1637 = vmatpush.bf16.msra.mxu3 %v7049_v20  ;;  %v7059_v6 = vld [vmem:[#allocation86_spill] sm:$0xff]  ;;  %v7062_v5 = vld [vmem:[#allocation91_spill] sm:$0xff] }
 0x217   :  { %v7060_v20 = vld [vmem:[#allocation102_spill] sm:$0xff] }
 0x219   :  { %1594 = vmatpush.bf16.msrb.mxu0 %v7052_v14  ;;  %1620 = vmatpush.bf16.msra.mxu2 %v7053_v59  ;;  %v7063_v14 = vld [vmem:[#allocation92_spill] sm:$0xff]  ;;  %v7064_v59 = vld [vmem:[#allocation105_spill] sm:$0xff] }
 0x21a   :  { %1612 = vmatpush.bf16.msrb.mxu1 %v7054_v9  ;;  %1638 = vmatpush.bf16.msra.mxu3 %v7055_v56  ;;  %v7065_v9 = vld [vmem:[#allocation106_spill] sm:$0xff]  ;;  %v7066_v56 = vld [vmem:[#allocation109_spill] sm:$0xff] }
 0x21d   :  { %1595 = vmatpush.bf16.msrb.mxu0 %v7056_v34  ;;  %1621 = vmatpush.bf16.msra.mxu2 %v7057_v37  ;;  %v7067_v34 = vld [vmem:[#allocation110_spill] sm:$0xff]  ;;  %v7068_v37 = vld [vmem:[#allocation111_spill] sm:$0xff] }
 0x21e   :  { %1613 = vmatpush.bf16.msrb.mxu1 %v7058_v8  ;;  %1639 = vmatpush.bf16.msra.mxu3 %v7059_v6  ;;  %v7069_v8 = vld [vmem:[#allocation112_spill] sm:$0xff]  ;;  %v7070_v6 = vld [vmem:[#allocation113_spill] sm:$0xff] }
 0x221   :  { %1596 = vmatpush.bf16.msrb.mxu0 %v7060_v20  ;;  %1622 = vmatpush.bf16.msra.mxu2 %v7061_v11  ;;  %v7071_v20 = vld [vmem:[#allocation114_spill] sm:$0xff]  ;;  %v7072_v11 = vld [vmem:[#allocation115_spill] sm:$0xff] }
 0x222   :  { %1614 = vmatpush.bf16.msrb.mxu1 %v7062_v5  ;;  %1640 = vmatpush.bf16.msra.mxu3 %v7063_v14  ;;  %v7073_v5 = vld [vmem:[#allocation116_spill] sm:$0xff] }
 0x225   :  { %1597 = vmatpush.bf16.msrb.mxu0 %v7064_v59  ;;  %1623 = vmatpush.bf16.msra.mxu2 %v7065_v9 }
 0x229   :  { %1598 = vmatpush.bf16.msrb.mxu0 %v7066_v56  ;;  %1624 = vmatpush.bf16.msra.mxu2 %v7067_v34  ;;  %v7074_v34 = vld [vmem:[#allocation8_spill] sm:$0xff] }
 0x22d   :  { %1599 = vmatpush.bf16.msrb.mxu0 %v7068_v37  ;;  %1625 = vmatpush.bf16.msra.mxu2 %v7069_v8 }
 0x231   :  { %1600 = vmatpush.bf16.msrb.mxu0 %v7070_v6  ;;  %1626 = vmatpush.bf16.msra.mxu2 %v7071_v20 }
 0x235   :  { %1601 = vmatpush.bf16.msrb.mxu0 %v7072_v11  ;;  %1627 = vmatpush.bf16.msra.mxu2 %v7073_v5 }
 0x242   :  { %v1272_v14 = vpop.f32.mrf.mxu1 }
 0x248   :  { %v1298_v59 = vpop.f32.mrf.mxu3 }
 0x24a   :  { %v1274_v4 = vpop.f32.mrf.mxu1 }
 0x250   :  { %v1300_v9 = vpop.f32.mrf.mxu3 }
 0x252   :  { %v1324_v36 = vpop.f32.mrf.mxu1 }
 0x255   :  { %v1259_v56 = vpop.f32.mrf.mxu0 }
 0x256   :  { %v1273_v35 = vadd.f32 %v1272_v14, %v1259_v56  ;;  %v7076_v14 = vld [vmem:[#allocation40_spill] sm:$0xff] }
 0x258   :  { %v1354_v17 = vadd.f32 %v1273_v35, %v7074_v34  ;;  %v1350_v37 = vpop.f32.mrf.mxu3 }
 0x25a   :  { %v3800_v10 = vmul.f32 -1.442695, %v1354_v17  ;;  %v1326_v8 = vpop.f32.mrf.mxu1 }
 0x25b   :  { %v1285_v39 = vpop.f32.mrf.mxu2 }
 0x25c   :  { %4083 = vpow2.f32 %v3800_v10  ;;  %v1299_v6 = vadd.f32 %v1298_v59, %v1285_v39 }
 0x25d   :  { %v1261_v20 = vpop.f32.mrf.mxu0 }
 0x25e   :  { %v1355_v11 = vadd.f32 %v1299_v6, %v7075_v28 }
 0x260   :  { %v3801_v26 = vmul.f32 -1.442695, %v1355_v11  ;;  %v1352_v5 = vpop.f32.mrf.mxu3  ;;  %v7077_v11 = vld [vmem:[#allocation67_spill] sm:$0xff] }
 0x262   :  { %v4084_v2 = vpop.eup %4083  ;;  %4085 = vpow2.f32 %v3801_v26 }
 0x263   :  { %v5710_v4 = vadd.f32 1.0, %v4084_v2  ;;  %v1287_v60 = vpop.f32.mrf.mxu2 }
 0x264   :  { %v1443_v9 = vpop.f32.mrf.mxu1 }
 0x265   :  { %v1474_v56 = vadd.f32 %v1443_v9, %v7076_v14  ;;  %4087 = vrcp.f32 %v5710_v4  ;;  %v1311_v35 = vpop.f32.mrf.mxu0  ;;  %v7078_v14 = vld [vmem:[#allocation17_spill] sm:$0xff]  ;;  %vm1367_vm7 = vweird.f32 %v5710_v4 }
 0x267   :  { %v3804_v17 = vmul.f32 -1.442695, %v1474_v56  ;;  %v1325_v56 = vadd.f32 %v1324_v36, %v1311_v35  ;;  %v7080_v35 = vld [vmem:[#allocation39_spill] sm:$0xff] }
 0x268   :  { %v4086_v8 = vpop.eup %4085 }
 0x269   :  { %4089 = vpow2.f32 %v3804_v17  ;;  %v1380_v10 = vadd.f32 1.0, %v4086_v8 }
 0x26a   :  { %v1469_v39 = vpop.f32.mrf.mxu3 }
 0x26b   :  { %v4088_v59 = vpop.eup %4087  ;;  %4091 = vrcp.f32 %v1380_v10  ;;  %v1337_v20 = vpop.f32.mrf.mxu2  ;;  %v1476_v5 = vadd.f32 %v1469_v39, %v7077_v11  ;;  %vm1386_vm8 = vweird.f32 %v1380_v10 }
 0x26c   :  { %v1445_v6 = vpop.f32.mrf.mxu1  ;;  %v1363_v26 = vmul.f32 %v4088_v59, %v5710_v4  ;;  %v1351_v2 = vadd.f32 %v1350_v37, %v1337_v20  ;;  %v7079_v37 = vld [vmem:[#allocation10_spill] sm:$0xff]  ;;  %v1373_v20 = vand.u32 2147483648, %v5710_v4  ;;  %vm1368_vm5 = vweird.f32 %v4088_v59 }
 0x26d   :  { %v1313_v60 = vpop.f32.mrf.mxu0  ;;  %v3805_v52 = vmul.f32 -1.442695, %v1476_v5  ;;  %v1356_v39 = vadd.f32 %v1325_v56, %v7079_v37  ;;  %vm5725_vm9 = vmor %vm1367_vm7, %vm1368_vm5 }
 0x26e   :  { %v1364_v9 = vsub.f32 1.0, %v1363_v26  ;;  %v1357_v34 = vadd.f32 %v1351_v2, %v7078_v14  ;;  %v1392_v26 = vand.u32 2147483648, %v1380_v10 }
 0x26f   :  { %v4090_v28 = vpop.eup %4089 }
 0x270   :  { %v5717_v24 = vadd.f32 1.0, %v4090_v28  ;;  %v3802_v17 = vmul.f32 -1.442695, %v1357_v34  ;;  %v1365_v0 = vmul.f32 %v4088_v59, %v1364_v9  ;;  %v1390_v34 = vand.u32 2147483647, %v1380_v10 }
 0x271   :  { %v4092_v8 = vpop.eup %4091 }
 0x272   :  { %v1471_v44 = vpop.f32.mrf.mxu3  ;;  %v1382_v6 = vmul.f32 %v4092_v8, %v1380_v10  ;;  %4093 = vpow2.f32 %v3802_v17  ;;  %v1366_v2 = vadd.f32 %v4088_v59, %v1365_v0  ;;  %vm1387_vm6 = vweird.f32 %v4092_v8 }
 0x273   :  { %v1339_v30 = vpop.f32.mrf.mxu2  ;;  %4095 = vrcp.f32 %v5717_v24  ;;  %vm1388_vm10 = vmor %vm1386_vm8, %vm1387_vm6  ;;  %v1374_v17 = vor.u32 1.1754944e-38, %v1373_v20  ;;  %vm1391_vm11 = vcmp.eq.f32.partialorder %v1390_v34, 8.507059e+37  ;;  %vm1505_vm2 = vweird.f32 %v5717_v24 }
 0x274   :  { %v1383_v12 = vsub.f32 1.0, %v1382_v6  ;;  %4097 = vpow2.f32 %v3805_v52  ;;  %v1371_v30 = vand.u32 2147483647, %v5710_v4  ;;  %v1393_v52 = vor.u32 1.1754944e-38, %v1392_v26  ;;  %v7083_v26 = vld [vmem:[#allocation13_spill] sm:$0xff] }
 0x275   :  { %v1430_v36 = vpop.f32.mrf.mxu0  ;;  %4099 = vtanh.f32 %v1356_v39 }
 0x276   :  { %v1384_v28 = vmul.f32 %v4092_v8, %v1383_v12  ;;  %v1473_v44 = vadd.f32 %v1430_v36, %v7080_v35  ;;  %v1370_v12 = vsel %vm5725_vm9, %v4088_v59, %v1366_v2  ;;  %vm1372_vm12 = vcmp.eq.f32.partialorder %v1371_v30, 8.507059e+37 }
 0x278   :  { %v4094_v11 = vpop.eup %4093  ;;  %v1385_v60 = vadd.f32 %v4092_v8, %v1384_v28  ;;  %v3803_v0 = vmul.f32 -1.442695, %v1473_v44  ;;  %v1375_v28 = vsel %vm1372_vm12, %v1374_v17, %v1370_v12 }
 0x279   :  { %v1400_v9 = vadd.f32 1.0, %v4094_v11  ;;  %v5731_v56 = vpop.eup %4095 }
 0x27a   :  { %v1389_v6 = vsel %vm1388_vm10, %v4092_v8, %v1385_v60  ;;  %4101 = vpow2.f32 %v3803_v0  ;;  %v4098_v4 = vpop.eup %4097  ;;  %v1501_v39 = vmul.f32 %v5731_v56, %v5717_v24  ;;  %vm1506_vm15 = vweird.f32 %v5731_v56 }
 0x27b   :  { %v1394_v10 = vsel %vm1391_vm11, %v1393_v52, %v1389_v6  ;;  %4103 = vrcp.f32 %v1400_v9  ;;  %v1456_v36 = vpop.f32.mrf.mxu2  ;;  %v4100_v59 = vpop.eup %4099  ;;  %v5736_v2 = vadd.f32 1.0, %v4098_v4  ;;  %v1412_v17 = vand.u32 2147483648, %v1400_v9  ;;  %vm5752_vm3 = vmor %vm1505_vm2, %vm1506_vm15 }
 0x27c   :  { %v1416_v35 = vmul.f32 %v1394_v10, %v7083_v26  ;;  %v1417_v11 = vmul.f32 %v4100_v59, %v1375_v28  ;;  %v1502_v34 = vsub.f32 1.0, %v1501_v39  ;;  %v1410_v4 = vand.u32 2147483647, %v1400_v9  ;;  %v7085_v26 = vld [vmem:[#allocation65_spill] sm:$0xff] }
 0x27d   :  { %v1432_v44 = vpop.f32.mrf.mxu0  ;;  %4105 = vrcp.f32 %v5736_v2  ;;  %vm1406_vm14 = vweird.f32 %v1400_v9  ;;  %v1413_v59 = vor.u32 1.1754944e-38, %v1412_v17  ;;  %vm1525_vm10 = vweird.f32 %v5736_v2 }
 0x27e   :  { %v5738_v5 = vadd.f32 %v1417_v11, %v1416_v35  ;;  %v1503_v12 = vmul.f32 %v5731_v56, %v1502_v34  ;;  %v1475_v35 = vadd.f32 %v1456_v36, %v7085_v26  ;;  %vm1411_vm1 = vcmp.eq.f32.partialorder %v1410_v4, 8.507059e+37 }
 0x280   :  { %v4102_v20 = vpop.eup %4101  ;;  %7084 = vst [vmem:[#allocation32_spill] sm:$0xff] %v5738_v5  ;;  %v1504_v44 = vadd.f32 %v5731_v56, %v1503_v12  ;;  %v1509_v12 = vand.u32 2147483647, %v5717_v24 }
 0x281   :  { %v4104_v8 = vpop.eup %4103  ;;  %v1480_v30 = vadd.f32 1.0, %v4102_v20 }
 0x282   :  { %v1402_v60 = vmul.f32 %v4104_v8, %v1400_v9  ;;  %vm1407_vm13 = vweird.f32 %v4104_v8  ;;  %vm1510_vm6 = vcmp.eq.f32.partialorder %v1509_v12, 8.507059e+37 }
 0x283   :  { %4107 = vrcp.f32 %v1480_v30  ;;  %v1458_v0 = vpop.f32.mrf.mxu2  ;;  %v5743_v10 = vpop.eup %4105  ;;  %vm1408_vm0 = vmor %vm1406_vm14, %vm1407_vm13  ;;  %vm1486_vm5 = vweird.f32 %v1480_v30 }
 0x284   :  { %v1403_v52 = vsub.f32 1.0, %v1402_v60  ;;  %4109 = vtanh.f32 %v5738_v5  ;;  %v1511_v60 = vand.u32 2147483648, %v5717_v24  ;;  %v1521_v9 = vmul.f32 %v5743_v10, %v5736_v2 }
 0x285   :  { %4111 = vtanh.f32 %v1475_v35  ;;  %vm1526_vm9 = vweird.f32 %v5743_v10 }
 0x286   :  { %v1404_v6 = vmul.f32 %v4104_v8, %v1403_v52  ;;  %v1512_v5 = vor.u32 1.1754944e-38, %v1511_v60  ;;  %vm1527_vm11 = vmor %vm1525_vm10, %vm1526_vm9 }
 0x288   :  { %v1405_v28 = vadd.f32 %v4104_v8, %v1404_v6  ;;  %v1492_v6 = vand.u32 2147483648, %v1480_v30 }
 0x289   :  { %v4108_v39 = vpop.eup %4107 }
 0x28a   :  { %v1482_v11 = vmul.f32 %v4108_v39, %v1480_v30  ;;  %v1409_v20 = vsel %vm1408_vm0, %v4104_v8, %v1405_v28  ;;  %v4110_v34 = vpop.eup %4109  ;;  %v1508_v8 = vsel %vm5752_vm3, %v5731_v56, %v1504_v44  ;;  %vm1487_vm4 = vweird.f32 %v4108_v39 }
 0x28b   :  { %v1414_v0 = vsel %vm1411_vm1, %v1413_v59, %v1409_v20  ;;  %v1490_v28 = vand.u32 2147483647, %v1480_v30  ;;  %v1522_v59 = vsub.f32 1.0, %v1521_v9  ;;  %vm1488_vm7 = vmor %vm1486_vm5, %vm1487_vm4  ;;  %v1493_v24 = vor.u32 1.1754944e-38, %v1492_v6  ;;  %v4112_v35 = vpop.eup %4111 }
 0x28c   :  { %v1483_v36 = vsub.f32 1.0, %v1482_v11  ;;  %v1420_v17 = vmul.f32 %v4110_v34, %v1414_v0  ;;  %v1513_v11 = vsel %vm1510_vm6, %v1512_v5, %v1508_v8  ;;  %v1529_v0 = vand.u32 2147483647, %v5736_v2  ;;  %v7090_v8 = vld [vmem:[#allocation37_spill] sm:$0xff] }
 0x28d   :  { %vm1491_vm8 = vcmp.eq.f32.partialorder %v1490_v28, 8.507059e+37  ;;  %v1523_v44 = vmul.f32 %v5743_v10, %v1522_v59  ;;  %v1535_v60 = vmul.f32 %v1513_v11, %v5605_v13  ;;  %v7092_v28 = vld [vmem:[#allocation21_spill] sm:$0xff]  ;;  %v7097_v11 = vld [vmem:[#allocation42_spill] sm:$0xff] }
 0x28e   :  { %v1484_v4 = vmul.f32 %v4108_v39, %v1483_v36  ;;  %v1541_v26 = vpack.c.bf16 %v1420_v17, %v1420_v17  ;;  %vm1530_vm12 = vcmp.eq.f32.partialorder %v1529_v0, 8.507059e+37  ;;  %v7094_v59 = vld [vmem:[#allocation53_spill] sm:$0xff] }
 0x28f   :  { %v1524_v5 = vadd.f32 %v5743_v10, %v1523_v44  ;;  %v7100_v44 = vld [vmem:[#allocation43_spill] sm:$0xff]  ;;  %v7106_v0 = vld [vmem:[#allocation49_spill] sm:$0xff] }
 0x290   :  { %v1485_v20 = vadd.f32 %v4108_v39, %v1484_v4  ;;  %1563 = vmatmul.bf16.vlgmr.msra.gmra.mxu1 %v1541_v26  ;;  %1589 = vmatmul.bf16.vlgmr.msrb.gmra.mxu3 %v1541_v26  ;;  %v7091_v4 = vld [vmem:[#allocation38_spill] sm:$0xff] }
 0x291   :  { %1726 = vmatpush.bf16.msra.mxu1 %v7015_v23  ;;  %1752 = vmatpush.bf16.msrb.mxu3 %v7016_v21  ;;  %v1528_v13 = vsel %vm1527_vm11, %v5743_v10, %v1524_v5  ;;  %v7089_v10 = vld [vmem:[#allocation24_spill] sm:$0xff]  ;;  %v7104_v5 = vld [vmem:[#allocation47_spill] sm:$0xff] }
 0x292   :  { %v1489_v56 = vsel %vm1488_vm7, %v4108_v39, %v1485_v20  ;;  %v1531_v39 = vand.u32 2147483648, %v5736_v2  ;;  %v7088_v2 = vld [vmem:[#allocation18_spill] sm:$0xff] }
 0x293   :  { %v1494_v34 = vsel %vm1491_vm8, %v1493_v24, %v1489_v56  ;;  %v7095_v20 = vld [vmem:[#allocation54_spill] sm:$0xff]  ;;  %v7096_v24 = vld [vmem:[#allocation41_spill] sm:$0xff]  ;;  %v7098_v56 = vld [vmem:[#allocation59_spill] sm:$0xff] }
 0x294   :  { %v1536_v9 = vmul.f32 %v4112_v35, %v1494_v34  ;;  %v1532_v52 = vor.u32 1.1754944e-38, %v1531_v39  ;;  %v7099_v35 = vld [vmem:[#allocation60_spill] sm:$0xff]  ;;  %v7101_v34 = vld [vmem:[#allocation45_spill] sm:$0xff] }
 0x295   :  { %1727 = vmatpush.bf16.msra.mxu1 %v7017_v32  ;;  %1753 = vmatpush.bf16.msrb.mxu3 %v7018_v62  ;;  %v7105_v39 = vld [vmem:[#allocation48_spill] sm:$0xff] }
 0x296   :  { %v5766_v30 = vadd.f32 %v1536_v9, %v1535_v60  ;;  %v1533_v12 = vsel %vm1530_vm12, %v1532_v52, %v1528_v13  ;;  %v7102_v60 = vld [vmem:[#allocation66_spill] sm:$0xff]  ;;  %v7103_v9 = vld [vmem:[#allocation69_spill] sm:$0xff] }
 0x297   :  { %v7107_v13 = vld [vmem:[#allocation50_spill] sm:$0xff]  ;;  %v7108_v52 = vld [vmem:[#allocation73_spill] sm:$0xff] }
 0x298   :  { %4113 = vtanh.f32 %v5766_v30 }
 0x299   :  { %1728 = vmatpush.bf16.msra.mxu1 %v7019_v45  ;;  %1754 = vmatpush.bf16.msrb.mxu3 %v7020_v48 }
 0x29d   :  { %1729 = vmatpush.bf16.msra.mxu1 %v7021_v27  ;;  %1755 = vmatpush.bf16.msrb.mxu3 %v7022_v63 }
 0x29e   :  { %v4114_v36 = vpop.eup %4113 }
 0x29f   :  { %v1539_v17 = vmul.f32 %v4114_v36, %v1533_v12  ;;  %v7109_v36 = vld [vmem:[#allocation74_spill] sm:$0xff]  ;;  %v7110_v12 = vld [vmem:[#allocation55_spill] sm:$0xff] }
 0x2a0   :  { %1615 = vmatmul.bf16.vlgmr.msrb.gmra.mxu1 %v1541_v26  ;;  %1641 = vmatmul.bf16.vlgmr.msra.gmra.mxu3 %v1541_v26  ;;  %v7093_v26 = vld [vmem:[#allocation25_spill] sm:$0xff] }
 0x2a1   :  { %v1540_v6 = vpack.c.bf16 %v1539_v17, %v1539_v17  ;;  %1730 = vmatpush.bf16.msra.mxu1 %v7023_v15  ;;  %1756 = vmatpush.bf16.msrb.mxu3 %v7024_v55  ;;  %v7111_v17 = vld [vmem:[#allocation57_spill] sm:$0xff] }
 0x2a3   :  { %1550 = vmatmul.bf16.vlgmr.msra.gmra.mxu0 %v1540_v6  ;;  %1576 = vmatmul.bf16.vlgmr.msrb.gmra.mxu2 %v1540_v6 }
 0x2a4   :  { %1713 = vmatpush.bf16.msra.mxu0 %v4421_v29  ;;  %1739 = vmatpush.bf16.msrb.mxu2 %v4480_v49 }
 0x2a5   :  { %1731 = vmatpush.bf16.msra.mxu1 %v7025_v54  ;;  %1757 = vmatpush.bf16.msrb.mxu3 %v7026_v46 }
 0x2a8   :  { %1714 = vmatpush.bf16.msra.mxu0 %v4461_v42  ;;  %1740 = vmatpush.bf16.msrb.mxu2 %v4516_v61 }
 0x2a9   :  { %1732 = vmatpush.bf16.msra.mxu1 %v7027_v38  ;;  %1758 = vmatpush.bf16.msrb.mxu3 %v4682_v58 }
 0x2ac   :  { %1715 = vmatpush.bf16.msra.mxu0 %v4494_v53  ;;  %1741 = vmatpush.bf16.msrb.mxu2 %v4546_v7 }
 0x2ad   :  { %1733 = vmatpush.bf16.msra.mxu1 %v4661_v51  ;;  %1759 = vmatpush.bf16.msrb.mxu3 %v7028_v1 }
 0x2b0   :  { %1716 = vmatpush.bf16.msra.mxu0 %v6965_v19  ;;  %1734 = vmatmul.bf16.vlgmr.msra.gmra.mxu1 %v1540_v6 }
 0x2b1   :  { %1847 = vmatpush.bf16.msrb.mxu1 %v7029_v31  ;;  %1873 = vmatpush.bf16.msra.mxu3 %v4740_v22 }
 0x2b2   :  { %1742 = vmatpush.bf16.msrb.mxu2 %v6966_v47  ;;  %1760 = vmatmul.bf16.vlgmr.msrb.gmra.mxu3 %v1540_v6 }
 0x2b3   :  { %1602 = vmatmul.bf16.vlgmr.msrb.gmra.mxu0 %v1540_v6  ;;  %1628 = vmatmul.bf16.vlgmr.msra.gmra.mxu2 %v1540_v6 }
 0x2b4   :  { %1717 = vmatpush.bf16.msra.mxu0 %v6969_v43 }
 0x2b5   :  { %1848 = vmatpush.bf16.msrb.mxu1 %v4763_v33  ;;  %1874 = vmatpush.bf16.msra.mxu3 %v4771_v41 }
 0x2b6   :  { %1743 = vmatpush.bf16.msrb.mxu2 %v6970_v40 }
 0x2b8   :  { %1718 = vmatpush.bf16.msra.mxu0 %v6973_v25 }
 0x2b9   :  { %1849 = vmatpush.bf16.msrb.mxu1 %v4787_v57  ;;  %1875 = vmatpush.bf16.msra.mxu3 %v4797_v3 }
 0x2ba   :  { %1744 = vmatpush.bf16.msrb.mxu2 %v6974_v50 }
 0x2bc   :  { %1719 = vmatpush.bf16.msra.mxu0 %v7088_v2 }
 0x2bd   :  { %1850 = vmatpush.bf16.msrb.mxu1 %v4812_v16  ;;  %1876 = vmatpush.bf16.msra.mxu3 %v4817_v18  ;;  %v7154_v18 = vld [vmem:[#allocation27_spill] sm:$0xff]  ;;  %v7155_v16 = vld [vmem:[#allocation44_spill] sm:$0xff] }
 0x2be   :  { %1745 = vmatpush.bf16.msrb.mxu2 %v7089_v10 }
 0x2c0   :  { %1720 = vmatpush.bf16.msra.mxu0 %v7092_v28  ;;  %v7151_v28 = vld [vmem:[#allocation46_spill] sm:$0xff] }
 0x2c1   :  { %1851 = vmatpush.bf16.msrb.mxu1 %v7090_v8  ;;  %1877 = vmatpush.bf16.msra.mxu3 %v7091_v4 }
 0x2c2   :  { %1746 = vmatpush.bf16.msrb.mxu2 %v7093_v26  ;;  %v7150_v26 = vld [vmem:[#allocation28_spill] sm:$0xff] }
 0x2c3   :  { %1721 = vmatmul.bf16.vlgmr.msra.gmra.mxu0 %v1540_v6 }
 0x2c4   :  { %1834 = vmatpush.bf16.msrb.mxu0 %v7094_v59 }
 0x2c5   :  { %1852 = vmatpush.bf16.msrb.mxu1 %v7096_v24  ;;  %1878 = vmatpush.bf16.msra.mxu3 %v7097_v11 }
 0x2c6   :  { %1860 = vmatpush.bf16.msra.mxu2 %v7095_v20  ;;  %v7149_v20 = vld [vmem:[#allocation16_spill] sm:$0xff] }
 0x2c7   :  { %1747 = vmatmul.bf16.vlgmr.msrb.gmra.mxu2 %v1540_v6  ;;  %v7112_v6 = vld [vmem:[#allocation79_spill] sm:$0xff] }
 0x2c8   :  { %1835 = vmatpush.bf16.msrb.mxu0 %v7098_v56 }
 0x2c9   :  { %1853 = vmatpush.bf16.msrb.mxu1 %v7100_v44  ;;  %1879 = vmatpush.bf16.msra.mxu3 %v7101_v34 }
 0x2ca   :  { %1861 = vmatpush.bf16.msra.mxu2 %v7099_v35 }
 0x2cc   :  { %1836 = vmatpush.bf16.msrb.mxu0 %v7102_v60  ;;  %v7113_v60 = vld [vmem:[#allocation80_spill] sm:$0xff] }
 0x2cd   :  { %1854 = vmatpush.bf16.msrb.mxu1 %v7104_v5  ;;  %1880 = vmatpush.bf16.msra.mxu3 %v7105_v39  ;;  %v7115_v5 = vld [vmem:[#allocation64_spill] sm:$0xff]  ;;  %v7116_v39 = vld [vmem:[#allocation83_spill] sm:$0xff] }
 0x2ce   :  { %1862 = vmatpush.bf16.msra.mxu2 %v7103_v9  ;;  %v7114_v9 = vld [vmem:[#allocation61_spill] sm:$0xff] }
 0x2d0   :  { %1837 = vmatpush.bf16.msrb.mxu0 %v7108_v52  ;;  %v7119_v52 = vld [vmem:[#allocation72_spill] sm:$0xff] }
 0x2d1   :  { %1899 = vmatpush.bf16.msra.mxu1 %v7106_v0  ;;  %1925 = vmatpush.bf16.msrb.mxu3 %v7107_v13  ;;  %v7117_v0 = vld [vmem:[#allocation84_spill] sm:$0xff]  ;;  %v7118_v13 = vld [vmem:[#allocation70_spill] sm:$0xff] }
 0x2d2   :  { %1863 = vmatpush.bf16.msra.mxu2 %v7109_v36  ;;  %v7120_v36 = vld [vmem:[#allocation89_spill] sm:$0xff] }
 0x2d4   :  { %1838 = vmatpush.bf16.msrb.mxu0 %v7112_v6  ;;  %v7123_v6 = vld [vmem:[#allocation76_spill] sm:$0xff] }
 0x2d5   :  { %1900 = vmatpush.bf16.msra.mxu1 %v7110_v12  ;;  %1926 = vmatpush.bf16.msrb.mxu3 %v7111_v17  ;;  %v7121_v12 = vld [vmem:[#allocation90_spill] sm:$0xff]  ;;  %v7122_v17 = vld [vmem:[#allocation75_spill] sm:$0xff] }
 0x2d6   :  { %1864 = vmatpush.bf16.msra.mxu2 %v7113_v60  ;;  %v7124_v60 = vld [vmem:[#allocation93_spill] sm:$0xff] }
 0x2d8   :  { %1839 = vmatpush.bf16.msrb.mxu0 %v7116_v39  ;;  %v7127_v39 = vld [vmem:[#allocation98_spill] sm:$0xff] }
 0x2d9   :  { %1901 = vmatpush.bf16.msra.mxu1 %v7114_v9  ;;  %1927 = vmatpush.bf16.msrb.mxu3 %v7115_v5  ;;  %v7125_v9 = vld [vmem:[#allocation94_spill] sm:$0xff]  ;;  %v7126_v5 = vld [vmem:[#allocation97_spill] sm:$0xff] }
 0x2da   :  { %1865 = vmatpush.bf16.msra.mxu2 %v7117_v0  ;;  %v7128_v0 = vld [vmem:[#allocation81_spill] sm:$0xff] }
 0x2dc   :  { %1840 = vmatpush.bf16.msrb.mxu0 %v7120_v36  ;;  %v7131_v36 = vld [vmem:[#allocation100_spill] sm:$0xff] }
 0x2dd   :  { %1902 = vmatpush.bf16.msra.mxu1 %v7118_v13  ;;  %1928 = vmatpush.bf16.msrb.mxu3 %v7119_v52  ;;  %v7129_v13 = vld [vmem:[#allocation82_spill] sm:$0xff]  ;;  %v7130_v52 = vld [vmem:[#allocation99_spill] sm:$0xff] }
 0x2de   :  { %1866 = vmatpush.bf16.msra.mxu2 %v7121_v12  ;;  %v7132_v12 = vld [vmem:[#allocation85_spill] sm:$0xff] }
 0x2e0   :  { %1841 = vmatpush.bf16.msrb.mxu0 %v7124_v60  ;;  %v7135_v60 = vld [vmem:[#allocation103_spill] sm:$0xff] }
 0x2e1   :  { %1903 = vmatpush.bf16.msra.mxu1 %v7122_v17  ;;  %1929 = vmatpush.bf16.msrb.mxu3 %v7123_v6  ;;  %v7133_v17 = vld [vmem:[#allocation86_spill] sm:$0xff] }
 0x2e2   :  { %1867 = vmatpush.bf16.msra.mxu2 %v7125_v9  ;;  %v7134_v6 = vld [vmem:[#allocation102_spill] sm:$0xff]  ;;  %v7136_v9 = vld [vmem:[#allocation91_spill] sm:$0xff] }
 0x2e4   :  { %1886 = vmatpush.bf16.msra.mxu0 %v7126_v5  ;;  %v7137_v5 = vld [vmem:[#allocation92_spill] sm:$0xff] }
 0x2e5   :  { %1904 = vmatpush.bf16.msra.mxu1 %v7128_v0  ;;  %1930 = vmatpush.bf16.msrb.mxu3 %v7129_v13  ;;  %v7139_v0 = vld [vmem:[#allocation106_spill] sm:$0xff]  ;;  %v7140_v13 = vld [vmem:[#allocation109_spill] sm:$0xff] }
 0x2e6   :  { %1912 = vmatpush.bf16.msrb.mxu2 %v7127_v39  ;;  %v7138_v39 = vld [vmem:[#allocation105_spill] sm:$0xff] }
 0x2e8   :  { %1887 = vmatpush.bf16.msra.mxu0 %v7130_v52  ;;  %v7141_v52 = vld [vmem:[#allocation110_spill] sm:$0xff] }
 0x2e9   :  { %1905 = vmatpush.bf16.msra.mxu1 %v7132_v12  ;;  %1931 = vmatpush.bf16.msrb.mxu3 %v7133_v17  ;;  %v7143_v12 = vld [vmem:[#allocation112_spill] sm:$0xff]  ;;  %v7144_v17 = vld [vmem:[#allocation113_spill] sm:$0xff] }
 0x2ea   :  { %1913 = vmatpush.bf16.msrb.mxu2 %v7131_v36  ;;  %v7142_v36 = vld [vmem:[#allocation111_spill] sm:$0xff] }
 0x2ec   :  { %1888 = vmatpush.bf16.msra.mxu0 %v7134_v6  ;;  %v7145_v6 = vld [vmem:[#allocation114_spill] sm:$0xff] }
 0x2ed   :  { %1906 = vmatpush.bf16.msra.mxu1 %v7136_v9  ;;  %1932 = vmatpush.bf16.msrb.mxu3 %v7137_v5  ;;  %v7147_v9 = vld [vmem:[#allocation116_spill] sm:$0xff] }
 0x2ee   :  { %1914 = vmatpush.bf16.msrb.mxu2 %v7135_v60  ;;  %v7146_v60 = vld [vmem:[#allocation115_spill] sm:$0xff] }
 0x2f0   :  { %1889 = vmatpush.bf16.msra.mxu0 %v7138_v39 }
 0x2f2   :  { %1915 = vmatpush.bf16.msrb.mxu2 %v7139_v0 }
 0x2f4   :  { %1890 = vmatpush.bf16.msra.mxu0 %v7140_v13 }
 0x2f6   :  { %1916 = vmatpush.bf16.msrb.mxu2 %v7141_v52  ;;  %v7148_v52 = vld [vmem:[#allocation8_spill] sm:$0xff] }
 0x2f8   :  { %1891 = vmatpush.bf16.msra.mxu0 %v7142_v36 }
 0x2fa   :  { %1917 = vmatpush.bf16.msrb.mxu2 %v7143_v12 }
 0x2fc   :  { %1892 = vmatpush.bf16.msra.mxu0 %v7144_v17 }
 0x2fe   :  { %1918 = vmatpush.bf16.msrb.mxu2 %v7145_v6 }
 0x300   :  { %1893 = vmatpush.bf16.msra.mxu0 %v7146_v60 }
 0x302   :  { %1919 = vmatpush.bf16.msrb.mxu2 %v7147_v9 }
 0x30d   :  { %v1564_v5 = vpop.f32.mrf.mxu1 }
 0x313   :  { %v1590_v39 = vpop.f32.mrf.mxu3 }
 0x315   :  { %v1566_v34 = vpop.f32.mrf.mxu1 }
 0x316   :  { %v181_v34 = vadd.f32 %v7151_v28, %v7150_v26 }
 0x31b   :  { %v1592_v0 = vpop.f32.mrf.mxu3 }
 0x31d   :  { %v1616_v44 = vpop.f32.mrf.mxu1 }
 0x320   :  { %v1551_v13 = vpop.f32.mrf.mxu0 }
 0x321   :  { %v1565_v35 = vadd.f32 %v1564_v5, %v1551_v13 }
 0x323   :  { %v1646_v56 = vadd.f32 %v1565_v35, %v7148_v52  ;;  %v1642_v36 = vpop.f32.mrf.mxu3 }
 0x325   :  { %v3806_v11 = vmul.f32 -1.442695, %v1646_v56  ;;  %v1618_v12 = vpop.f32.mrf.mxu1 }
 0x326   :  { %v1577_v24 = vpop.f32.mrf.mxu2 }
 0x327   :  { %4115 = vpow2.f32 %v3806_v11  ;;  %v1591_v17 = vadd.f32 %v1590_v39, %v1577_v24 }
 0x328   :  { %v1553_v6 = vpop.f32.mrf.mxu0 }
 0x329   :  { %v1647_v60 = vadd.f32 %v1591_v17, %v7149_v20 }
 0x32b   :  { %v3807_v59 = vmul.f32 -1.442695, %v1647_v60  ;;  %v1644_v9 = vpop.f32.mrf.mxu3  ;;  %v7152_v60 = vld [vmem:[#allocation63_spill] sm:$0xff] }
 0x32c   :  { %v7153_v9 = vld [vmem:[#allocation78_spill] sm:$0xff] }
 0x32d   :  { %v4116_v0 = vpop.eup %4115  ;;  %4117 = vpow2.f32 %v3807_v59  ;;  %v1735_v4 = vpop.f32.mrf.mxu1  ;;  %v239_v17 = vadd.f32 %v7153_v9, %v7152_v60 }
 0x32e   :  { %v5871_v5 = vadd.f32 1.0, %v4116_v0  ;;  %v1766_v35 = vadd.f32 %v1735_v4, %v181_v34  ;;  %v1579_v13 = vpop.f32.mrf.mxu2 }
 0x330   :  { %4119 = vrcp.f32 %v5871_v5  ;;  %v3810_v56 = vmul.f32 -1.442695, %v1766_v35  ;;  %v1603_v11 = vpop.f32.mrf.mxu0  ;;  %vm1659_vm15 = vweird.f32 %v5871_v5 }
 0x331   :  { %v1617_v52 = vadd.f32 %v1616_v44, %v1603_v11 }
 0x332   :  { %4121 = vpow2.f32 %v3810_v56 }
 0x333   :  { %v4118_v24 = vpop.eup %4117 }
 0x334   :  { %v1672_v39 = vadd.f32 1.0, %v4118_v24 }
 0x335   :  { %v1761_v12 = vpop.f32.mrf.mxu3  ;;  %v1737_v6 = vpop.f32.mrf.mxu1 }
 0x336   :  { %v4120_v28 = vpop.eup %4119  ;;  %4123 = vrcp.f32 %v1672_v39  ;;  %v1629_v59 = vpop.f32.mrf.mxu2  ;;  %v1768_v26 = vadd.f32 %v1761_v12, %v239_v17  ;;  %v152_v12 = vadd.f32 %v7155_v16, %v7154_v18  ;;  %v1648_v17 = vadd.f32 %v1617_v52, %v7079_v37  ;;  %v7188_v18 = vld [vmem:[#allocation57_spill] sm:$0xff] }
 0x337   :  { %v1655_v0 = vmul.f32 %v4120_v28, %v5871_v5  ;;  %v1643_v4 = vadd.f32 %v1642_v36, %v1629_v59  ;;  %v1684_v59 = vand.u32 2147483648, %v1672_v39  ;;  %vm1660_vm13 = vweird.f32 %v4120_v28 }
 0x338   :  { %v1605_v34 = vpop.f32.mrf.mxu0  ;;  %v4122_v13 = vpop.eup %4121  ;;  %v3811_v56 = vmul.f32 -1.442695, %v1768_v26  ;;  %v1682_v26 = vand.u32 2147483647, %v1672_v39  ;;  %vm1678_vm0 = vweird.f32 %v1672_v39  ;;  %vm5886_vm1 = vmor %vm1659_vm15, %vm1660_vm13 }
 0x339   :  { %v1656_v20 = vsub.f32 1.0, %v1655_v0  ;;  %v1649_v35 = vadd.f32 %v1643_v4, %v7078_v14  ;;  %v5878_v8 = vadd.f32 1.0, %v4122_v13  ;;  %v1685_v13 = vor.u32 1.1754944e-38, %v1684_v59  ;;  %v7158_v59 = vld [vmem:[#allocation32_spill] sm:$0xff] }
 0x33a   :  { %vm1683_vm3 = vcmp.eq.f32.partialorder %v1682_v26, 8.507059e+37 }
 0x33b   :  { %v3808_v10 = vmul.f32 -1.442695, %v1649_v35  ;;  %v1657_v60 = vmul.f32 %v4120_v28, %v1656_v20  ;;  %vm1797_vm10 = vweird.f32 %v5878_v8 }
 0x33c   :  { %v4124_v24 = vpop.eup %4123 }
 0x33d   :  { %v1763_v9 = vpop.f32.mrf.mxu3  ;;  %v1674_v6 = vmul.f32 %v4124_v24, %v1672_v39  ;;  %4125 = vpow2.f32 %v3808_v10  ;;  %vm1679_vm14 = vweird.f32 %v4124_v24  ;;  %v1658_v0 = vadd.f32 %v4120_v28, %v1657_v60 }
 0x33e   :  { %v1631_v2 = vpop.f32.mrf.mxu2  ;;  %4127 = vpow2.f32 %v3811_v56  ;;  %v1663_v10 = vand.u32 2147483647, %v5871_v5  ;;  %vm1680_vm2 = vmor %vm1678_vm0, %vm1679_vm14 }
 0x33f   :  { %v1675_v36 = vsub.f32 1.0, %v1674_v6  ;;  %4129 = vrcp.f32 %v5878_v8  ;;  %v1665_v2 = vand.u32 2147483648, %v5871_v5  ;;  %v1662_v60 = vsel %vm5886_vm1, %v4120_v28, %v1658_v0 }
 0x340   :  { %v1722_v44 = vpop.f32.mrf.mxu0  ;;  %4131 = vtanh.f32 %v1648_v17  ;;  %vm1664_vm4 = vcmp.eq.f32.partialorder %v1663_v10, 8.507059e+37 }
 0x341   :  { %v1676_v11 = vmul.f32 %v4124_v24, %v1675_v36  ;;  %v1765_v4 = vadd.f32 %v1722_v44, %v152_v12  ;;  %v1666_v6 = vor.u32 1.1754944e-38, %v1665_v2 }
 0x343   :  { %v1677_v20 = vadd.f32 %v4124_v24, %v1676_v11  ;;  %v3809_v52 = vmul.f32 -1.442695, %v1765_v4  ;;  %v4126_v34 = vpop.eup %4125  ;;  %v1667_v36 = vsel %vm1664_vm4, %v1666_v6, %v1662_v60  ;;  %v7159_v6 = vld [vmem:[#allocation62_spill] sm:$0xff] }
 0x344   :  { %v4128_v35 = vpop.eup %4127  ;;  %v1692_v9 = vadd.f32 1.0, %v4126_v34 }
 0x345   :  { %v1681_v56 = vsel %vm1680_vm2, %v4124_v24, %v1677_v20  ;;  %v5893_v39 = vpop.eup %4129  ;;  %4133 = vpow2.f32 %v3809_v52  ;;  %v5898_v28 = vadd.f32 1.0, %v4128_v35 }
 0x346   :  { %v1686_v12 = vsel %vm1683_vm3, %v1685_v13, %v1681_v56  ;;  %4135 = vrcp.f32 %v1692_v9  ;;  %v1793_v17 = vmul.f32 %v5893_v39, %v5878_v8  ;;  %v4132_v4 = vpop.eup %4131  ;;  %v1704_v60 = vand.u32 2147483648, %v1692_v9 }
 0x347   :  { %v1708_v11 = vmul.f32 %v1686_v12, %v7158_v59  ;;  %v1709_v24 = vmul.f32 %v4132_v4, %v1667_v36  ;;  %4137 = vrcp.f32 %v5898_v28  ;;  %v1702_v56 = vand.u32 2147483647, %v1692_v9  ;;  %v7160_v12 = vld [vmem:[#allocation77_spill] sm:$0xff] }
 0x348   :  { %v1724_v44 = vpop.f32.mrf.mxu0  ;;  %v1794_v16 = vsub.f32 1.0, %v1793_v17  ;;  %v210_v36 = vadd.f32 %v7160_v12, %v7159_v6  ;;  %vm1698_vm6 = vweird.f32 %v1692_v9  ;;  %vm1798_vm7 = vweird.f32 %v5893_v39 }
 0x349   :  { %v5900_v2 = vadd.f32 %v1709_v24, %v1708_v11  ;;  %v1705_v24 = vor.u32 1.1754944e-38, %v1704_v60  ;;  %vm1703_vm9 = vcmp.eq.f32.partialorder %v1702_v56, 8.507059e+37  ;;  %vm5915_vm11 = vmor %vm1797_vm10, %vm1798_vm7  ;;  %vm1817_vm2 = vweird.f32 %v5898_v28 }
 0x34a   :  { %v1748_v5 = vpop.f32.mrf.mxu2  ;;  %v1795_v13 = vmul.f32 %v5893_v39, %v1794_v16 }
 0x34b   :  { %v4134_v26 = vpop.eup %4133  ;;  %v1767_v11 = vadd.f32 %v1748_v5, %v210_v36 }
 0x34c   :  { %v4136_v0 = vpop.eup %4135  ;;  %v1772_v20 = vadd.f32 1.0, %v4134_v26  ;;  %v1796_v4 = vadd.f32 %v5893_v39, %v1795_v13  ;;  %v1801_v13 = vand.u32 2147483647, %v5878_v8 }
 0x34d   :  { %v1694_v10 = vmul.f32 %v4136_v0, %v1692_v9  ;;  %vm1699_vm5 = vweird.f32 %v4136_v0  ;;  %v5907_v44 = vpop.eup %4137 }
 0x34e   :  { %4139 = vrcp.f32 %v1772_v20  ;;  %vm1700_vm8 = vmor %vm1698_vm6, %vm1699_vm5  ;;  %v1813_v9 = vmul.f32 %v5907_v44, %v5898_v28  ;;  %v1784_v12 = vand.u32 2147483648, %v1772_v20  ;;  %v1782_v36 = vand.u32 2147483647, %v1772_v20 }
 0x34f   :  { %v1695_v34 = vsub.f32 1.0, %v1694_v10  ;;  %4141 = vtanh.f32 %v5900_v2  ;;  %vm1778_vm13 = vweird.f32 %v1772_v20  ;;  %vm1802_vm14 = vcmp.eq.f32.partialorder %v1801_v13, 8.507059e+37 }
 0x350   :  { %4143 = vtanh.f32 %v1767_v11  ;;  %vm1783_vm0 = vcmp.eq.f32.partialorder %v1782_v36, 8.507059e+37  ;;  %vm1818_vm1 = vweird.f32 %v5907_v44  ;;  %v7167_v36 = vld [vmem:[#allocation37_spill] sm:$0xff] }
 0x351   :  { %v1696_v35 = vmul.f32 %v4136_v0, %v1695_v34  ;;  %vm1819_vm3 = vmor %vm1817_vm2, %vm1818_vm1 }
 0x352   :  { %v1750_v52 = vpop.f32.mrf.mxu2 }
 0x353   :  { %v1697_v17 = vadd.f32 %v4136_v0, %v1696_v35  ;;  %v1803_v52 = vand.u32 2147483648, %v5878_v8  ;;  %v1785_v8 = vor.u32 1.1754944e-38, %v1784_v12 }
 0x354   :  { %v4140_v59 = vpop.eup %4139 }
 0x355   :  { %v1774_v26 = vmul.f32 %v4140_v59, %v1772_v20  ;;  %v1701_v16 = vsel %vm1700_vm8, %v4136_v0, %v1697_v17  ;;  %v4142_v10 = vpop.eup %4141  ;;  %v1800_v0 = vsel %vm5915_vm11, %v5893_v39, %v1796_v4  ;;  %vm1779_vm12 = vweird.f32 %v4140_v59 }
 0x356   :  { %v1706_v34 = vsel %vm1703_vm9, %v1705_v24, %v1701_v16  ;;  %v1804_v6 = vor.u32 1.1754944e-38, %v1803_v52  ;;  %v1814_v24 = vsub.f32 1.0, %v1813_v9  ;;  %vm1780_vm15 = vmor %vm1778_vm13, %vm1779_vm12  ;;  %v4144_v11 = vpop.eup %4143 }
 0x357   :  { %v1775_v5 = vsub.f32 1.0, %v1774_v26  ;;  %v1712_v60 = vmul.f32 %v4142_v10, %v1706_v34  ;;  %v1821_v34 = vand.u32 2147483647, %v5898_v28 }
 0x358   :  { %v1805_v26 = vsel %vm1802_vm14, %v1804_v6, %v1800_v0  ;;  %v1815_v4 = vmul.f32 %v5907_v44, %v1814_v24  ;;  %v7165_v0 = vld [vmem:[#allocation18_spill] sm:$0xff]  ;;  %v7169_v24 = vld [vmem:[#allocation21_spill] sm:$0xff] }
 0x359   :  { %v1776_v56 = vmul.f32 %v4140_v59, %v1775_v5  ;;  %v1833_v17 = vpack.c.bf16 %v1712_v60, %v1712_v60  ;;  %v1827_v52 = vmul.f32 %v1805_v26, %v5766_v30  ;;  %vm1822_vm4 = vcmp.eq.f32.partialorder %v1821_v34, 8.507059e+37  ;;  %v7172_v26 = vld [vmem:[#allocation54_spill] sm:$0xff]  ;;  %v7181_v34 = vld [vmem:[#allocation47_spill] sm:$0xff] }
 0x35a   :  { %v1816_v6 = vadd.f32 %v5907_v44, %v1815_v4  ;;  %v7175_v4 = vld [vmem:[#allocation59_spill] sm:$0xff] }
 0x35b   :  { %v1777_v16 = vadd.f32 %v4140_v59, %v1776_v56  ;;  %1855 = vmatmul.bf16.vlgmr.msrb.gmra.mxu1 %v1833_v17  ;;  %1881 = vmatmul.bf16.vlgmr.msra.gmra.mxu3 %v1833_v17  ;;  %v7166_v56 = vld [vmem:[#allocation24_spill] sm:$0xff] }
 0x35c   :  { %2018 = vmatpush.bf16.msrb.mxu1 %v7015_v23  ;;  %2044 = vmatpush.bf16.msra.mxu3 %v7016_v21  ;;  %v1820_v30 = vsel %vm1819_vm3, %v5907_v44, %v1816_v6  ;;  %v7164_v44 = vld [vmem:[#allocation34_spill] sm:$0xff] }
 0x35d   :  { %v1781_v39 = vsel %vm1780_vm15, %v4140_v59, %v1777_v16  ;;  %v1823_v59 = vand.u32 2147483648, %v5898_v28  ;;  %v7163_v28 = vld [vmem:[#allocation33_spill] sm:$0xff]  ;;  %v7179_v6 = vld [vmem:[#allocation66_spill] sm:$0xff] }
 0x35e   :  { %v1786_v10 = vsel %vm1783_vm0, %v1785_v8, %v1781_v39  ;;  %v7170_v16 = vld [vmem:[#allocation25_spill] sm:$0xff] }
 0x35f   :  { %v1828_v9 = vmul.f32 %v4144_v11, %v1786_v10  ;;  %v1824_v35 = vor.u32 1.1754944e-38, %v1823_v59  ;;  %v7171_v8 = vld [vmem:[#allocation53_spill] sm:$0xff]  ;;  %v7174_v11 = vld [vmem:[#allocation42_spill] sm:$0xff]  ;;  %v7176_v10 = vld [vmem:[#allocation60_spill] sm:$0xff] }
 0x360   :  { %2019 = vmatpush.bf16.msrb.mxu1 %v7017_v32  ;;  %2045 = vmatpush.bf16.msra.mxu3 %v7018_v62  ;;  %v7173_v39 = vld [vmem:[#allocation41_spill] sm:$0xff] }
 0x361   :  { %v5929_v20 = vadd.f32 %v1828_v9, %v1827_v52  ;;  %v1825_v13 = vsel %vm1822_vm4, %v1824_v35, %v1820_v30  ;;  %v7177_v52 = vld [vmem:[#allocation43_spill] sm:$0xff]  ;;  %v7178_v9 = vld [vmem:[#allocation45_spill] sm:$0xff]  ;;  %v7182_v30 = vld [vmem:[#allocation48_spill] sm:$0xff] }
 0x362   :  { %v7180_v59 = vld [vmem:[#allocation69_spill] sm:$0xff] }
 0x363   :  { %4145 = vtanh.f32 %v5929_v20  ;;  %v7183_v35 = vld [vmem:[#allocation49_spill] sm:$0xff] }
 0x364   :  { %2020 = vmatpush.bf16.msrb.mxu1 %v7019_v45  ;;  %2046 = vmatpush.bf16.msra.mxu3 %v7020_v48 }
 0x368   :  { %2021 = vmatpush.bf16.msrb.mxu1 %v7021_v27  ;;  %2047 = vmatpush.bf16.msra.mxu3 %v7022_v63 }
 0x369   :  { %v4146_v5 = vpop.eup %4145 }
 0x36a   :  { %v1831_v60 = vmul.f32 %v4146_v5, %v1825_v13  ;;  %v7184_v5 = vld [vmem:[#allocation50_spill] sm:$0xff]  ;;  %v7185_v13 = vld [vmem:[#allocation73_spill] sm:$0xff] }
 0x36b   :  { %1907 = vmatmul.bf16.vlgmr.msra.gmra.mxu1 %v1833_v17  ;;  %1933 = vmatmul.bf16.vlgmr.msrb.gmra.mxu3 %v1833_v17  ;;  %v7168_v17 = vld [vmem:[#allocation38_spill] sm:$0xff] }
 0x36c   :  { %v1832_v12 = vpack.c.bf16 %v1831_v60, %v1831_v60  ;;  %2022 = vmatpush.bf16.msrb.mxu1 %v7023_v15  ;;  %2048 = vmatpush.bf16.msra.mxu3 %v7024_v55  ;;  %v7186_v60 = vld [vmem:[#allocation74_spill] sm:$0xff] }
 0x36e   :  { %1842 = vmatmul.bf16.vlgmr.msrb.gmra.mxu0 %v1832_v12  ;;  %1868 = vmatmul.bf16.vlgmr.msra.gmra.mxu2 %v1832_v12 }
 0x36f   :  { %2005 = vmatpush.bf16.msrb.mxu0 %v4421_v29  ;;  %2031 = vmatpush.bf16.msra.mxu2 %v4480_v49 }
 0x370   :  { %2023 = vmatpush.bf16.msrb.mxu1 %v7025_v54  ;;  %2049 = vmatpush.bf16.msra.mxu3 %v7026_v46 }
 0x373   :  { %2006 = vmatpush.bf16.msrb.mxu0 %v4461_v42  ;;  %2032 = vmatpush.bf16.msra.mxu2 %v4516_v61 }
 0x374   :  { %2024 = vmatpush.bf16.msrb.mxu1 %v7027_v38  ;;  %2050 = vmatpush.bf16.msra.mxu3 %v4682_v58 }
 0x377   :  { %2007 = vmatpush.bf16.msrb.mxu0 %v4494_v53  ;;  %2033 = vmatpush.bf16.msra.mxu2 %v4546_v7 }
 0x378   :  { %2025 = vmatpush.bf16.msrb.mxu1 %v4661_v51  ;;  %2051 = vmatpush.bf16.msra.mxu3 %v7028_v1 }
 0x37b   :  { %2008 = vmatpush.bf16.msrb.mxu0 %v6965_v19  ;;  %2026 = vmatmul.bf16.vlgmr.msrb.gmra.mxu1 %v1832_v12 }
 0x37c   :  { %2139 = vmatpush.bf16.msra.mxu1 %v7029_v31  ;;  %2165 = vmatpush.bf16.msrb.mxu3 %v4740_v22 }
 0x37d   :  { %2034 = vmatpush.bf16.msra.mxu2 %v6966_v47  ;;  %2052 = vmatmul.bf16.vlgmr.msra.gmra.mxu3 %v1832_v12 }
 0x37e   :  { %1894 = vmatmul.bf16.vlgmr.msra.gmra.mxu0 %v1832_v12  ;;  %1920 = vmatmul.bf16.vlgmr.msrb.gmra.mxu2 %v1832_v12 }
 0x37f   :  { %2009 = vmatpush.bf16.msrb.mxu0 %v6969_v43 }
 0x380   :  { %2140 = vmatpush.bf16.msra.mxu1 %v4763_v33  ;;  %2166 = vmatpush.bf16.msrb.mxu3 %v4771_v41 }
 0x381   :  { %2035 = vmatpush.bf16.msra.mxu2 %v6970_v40 }
 0x383   :  { %2010 = vmatpush.bf16.msrb.mxu0 %v6973_v25 }
 0x384   :  { %2141 = vmatpush.bf16.msra.mxu1 %v4787_v57  ;;  %2167 = vmatpush.bf16.msrb.mxu3 %v4797_v3 }
 0x385   :  { %2036 = vmatpush.bf16.msra.mxu2 %v6974_v50 }
 0x387   :  { %2011 = vmatpush.bf16.msrb.mxu0 %v7165_v0 }
 0x388   :  { %2142 = vmatpush.bf16.msra.mxu1 %v7163_v28  ;;  %2168 = vmatpush.bf16.msrb.mxu3 %v7164_v44 }
 0x389   :  { %2037 = vmatpush.bf16.msra.mxu2 %v7166_v56 }
 0x38b   :  { %2012 = vmatpush.bf16.msrb.mxu0 %v7169_v24 }
 0x38c   :  { %2143 = vmatpush.bf16.msra.mxu1 %v7167_v36  ;;  %2169 = vmatpush.bf16.msrb.mxu3 %v7168_v17  ;;  %v7227_v17 = vld [vmem:[#allocation58_spill] sm:$0xff] }
 0x38d   :  { %2038 = vmatpush.bf16.msra.mxu2 %v7170_v16 }
 0x38e   :  { %2013 = vmatmul.bf16.vlgmr.msrb.gmra.mxu0 %v1832_v12 }
 0x38f   :  { %2126 = vmatpush.bf16.msra.mxu0 %v7171_v8  ;;  %v7226_v8 = vld [vmem:[#allocation16_spill] sm:$0xff] }
 0x390   :  { %2144 = vmatpush.bf16.msra.mxu1 %v7173_v39  ;;  %2170 = vmatpush.bf16.msrb.mxu3 %v7174_v11 }
 0x391   :  { %2152 = vmatpush.bf16.msrb.mxu2 %v7172_v26 }
 0x392   :  { %2039 = vmatmul.bf16.vlgmr.msra.gmra.mxu2 %v1832_v12  ;;  %v7187_v12 = vld [vmem:[#allocation55_spill] sm:$0xff] }
 0x393   :  { %2127 = vmatpush.bf16.msra.mxu0 %v7175_v4 }
 0x394   :  { %2145 = vmatpush.bf16.msra.mxu1 %v7177_v52  ;;  %2171 = vmatpush.bf16.msrb.mxu3 %v7178_v9  ;;  %v7189_v9 = vld [vmem:[#allocation79_spill] sm:$0xff] }
 0x395   :  { %2153 = vmatpush.bf16.msrb.mxu2 %v7176_v10 }
 0x397   :  { %2128 = vmatpush.bf16.msra.mxu0 %v7179_v6  ;;  %v7190_v6 = vld [vmem:[#allocation80_spill] sm:$0xff] }
 0x398   :  { %2146 = vmatpush.bf16.msra.mxu1 %v7181_v34  ;;  %2172 = vmatpush.bf16.msrb.mxu3 %v7182_v30  ;;  %v7192_v34 = vld [vmem:[#allocation64_spill] sm:$0xff]  ;;  %v7193_v30 = vld [vmem:[#allocation83_spill] sm:$0xff] }
 0x399   :  { %2154 = vmatpush.bf16.msrb.mxu2 %v7180_v59  ;;  %v7191_v59 = vld [vmem:[#allocation61_spill] sm:$0xff] }
 0x39b   :  { %2129 = vmatpush.bf16.msra.mxu0 %v7185_v13  ;;  %v7196_v13 = vld [vmem:[#allocation72_spill] sm:$0xff] }
 0x39c   :  { %2191 = vmatpush.bf16.msrb.mxu1 %v7183_v35  ;;  %2217 = vmatpush.bf16.msra.mxu3 %v7184_v5  ;;  %v7194_v35 = vld [vmem:[#allocation84_spill] sm:$0xff]  ;;  %v7195_v5 = vld [vmem:[#allocation70_spill] sm:$0xff] }
 0x39d   :  { %2155 = vmatpush.bf16.msrb.mxu2 %v7186_v60  ;;  %v7197_v60 = vld [vmem:[#allocation89_spill] sm:$0xff] }
 0x39f   :  { %2130 = vmatpush.bf16.msra.mxu0 %v7189_v9  ;;  %v7200_v9 = vld [vmem:[#allocation76_spill] sm:$0xff] }
 0x3a0   :  { %2192 = vmatpush.bf16.msrb.mxu1 %v7187_v12  ;;  %2218 = vmatpush.bf16.msra.mxu3 %v7188_v18  ;;  %v7198_v12 = vld [vmem:[#allocation90_spill] sm:$0xff]  ;;  %v7199_v18 = vld [vmem:[#allocation75_spill] sm:$0xff] }
 0x3a1   :  { %2156 = vmatpush.bf16.msrb.mxu2 %v7190_v6  ;;  %v7201_v6 = vld [vmem:[#allocation93_spill] sm:$0xff] }
 0x3a3   :  { %2131 = vmatpush.bf16.msra.mxu0 %v7193_v30  ;;  %v7204_v30 = vld [vmem:[#allocation98_spill] sm:$0xff] }
 0x3a4   :  { %2193 = vmatpush.bf16.msrb.mxu1 %v7191_v59  ;;  %2219 = vmatpush.bf16.msra.mxu3 %v7192_v34  ;;  %v7202_v59 = vld [vmem:[#allocation94_spill] sm:$0xff]  ;;  %v7203_v34 = vld [vmem:[#allocation97_spill] sm:$0xff] }
 0x3a5   :  { %2157 = vmatpush.bf16.msrb.mxu2 %v7194_v35  ;;  %v7205_v35 = vld [vmem:[#allocation81_spill] sm:$0xff] }
 0x3a7   :  { %2132 = vmatpush.bf16.msra.mxu0 %v7197_v60  ;;  %v7208_v60 = vld [vmem:[#allocation100_spill] sm:$0xff] }
 0x3a8   :  { %2194 = vmatpush.bf16.msrb.mxu1 %v7195_v5  ;;  %2220 = vmatpush.bf16.msra.mxu3 %v7196_v13  ;;  %v7206_v5 = vld [vmem:[#allocation82_spill] sm:$0xff]  ;;  %v7207_v13 = vld [vmem:[#allocation99_spill] sm:$0xff] }
 0x3a9   :  { %2158 = vmatpush.bf16.msrb.mxu2 %v7198_v12  ;;  %v7209_v12 = vld [vmem:[#allocation85_spill] sm:$0xff] }
 0x3ab   :  { %2133 = vmatpush.bf16.msra.mxu0 %v7201_v6  ;;  %v7212_v6 = vld [vmem:[#allocation103_spill] sm:$0xff] }
 0x3ac   :  { %2195 = vmatpush.bf16.msrb.mxu1 %v7199_v18  ;;  %2221 = vmatpush.bf16.msra.mxu3 %v7200_v9  ;;  %v7210_v18 = vld [vmem:[#allocation86_spill] sm:$0xff] }
 0x3ad   :  { %2159 = vmatpush.bf16.msrb.mxu2 %v7202_v59  ;;  %v7211_v9 = vld [vmem:[#allocation102_spill] sm:$0xff]  ;;  %v7213_v59 = vld [vmem:[#allocation91_spill] sm:$0xff] }
 0x3af   :  { %2178 = vmatpush.bf16.msrb.mxu0 %v7203_v34  ;;  %v7214_v34 = vld [vmem:[#allocation92_spill] sm:$0xff] }
 0x3b0   :  { %2196 = vmatpush.bf16.msrb.mxu1 %v7205_v35  ;;  %2222 = vmatpush.bf16.msra.mxu3 %v7206_v5  ;;  %v7216_v35 = vld [vmem:[#allocation106_spill] sm:$0xff]  ;;  %v7217_v5 = vld [vmem:[#allocation109_spill] sm:$0xff] }
 0x3b1   :  { %2204 = vmatpush.bf16.msra.mxu2 %v7204_v30  ;;  %v7215_v30 = vld [vmem:[#allocation105_spill] sm:$0xff] }
 0x3b3   :  { %2179 = vmatpush.bf16.msrb.mxu0 %v7207_v13  ;;  %v7218_v13 = vld [vmem:[#allocation110_spill] sm:$0xff] }
 0x3b4   :  { %2197 = vmatpush.bf16.msrb.mxu1 %v7209_v12  ;;  %2223 = vmatpush.bf16.msra.mxu3 %v7210_v18  ;;  %v7220_v12 = vld [vmem:[#allocation112_spill] sm:$0xff]  ;;  %v7221_v18 = vld [vmem:[#allocation113_spill] sm:$0xff] }
 0x3b5   :  { %2205 = vmatpush.bf16.msra.mxu2 %v7208_v60  ;;  %v7219_v60 = vld [vmem:[#allocation111_spill] sm:$0xff] }
 0x3b7   :  { %2180 = vmatpush.bf16.msrb.mxu0 %v7211_v9  ;;  %v7222_v9 = vld [vmem:[#allocation114_spill] sm:$0xff] }
 0x3b8   :  { %2198 = vmatpush.bf16.msrb.mxu1 %v7213_v59  ;;  %2224 = vmatpush.bf16.msra.mxu3 %v7214_v34  ;;  %v7224_v59 = vld [vmem:[#allocation116_spill] sm:$0xff] }
 0x3b9   :  { %2206 = vmatpush.bf16.msra.mxu2 %v7212_v6  ;;  %v7223_v6 = vld [vmem:[#allocation115_spill] sm:$0xff] }
 0x3bb   :  { %2181 = vmatpush.bf16.msrb.mxu0 %v7215_v30 }
 0x3bd   :  { %2207 = vmatpush.bf16.msra.mxu2 %v7216_v35 }
 0x3bf   :  { %2182 = vmatpush.bf16.msrb.mxu0 %v7217_v5 }
 0x3c1   :  { %2208 = vmatpush.bf16.msra.mxu2 %v7218_v13  ;;  %v7225_v13 = vld [vmem:[#allocation8_spill] sm:$0xff] }
 0x3c3   :  { %2183 = vmatpush.bf16.msrb.mxu0 %v7219_v60 }
 0x3c5   :  { %2209 = vmatpush.bf16.msra.mxu2 %v7220_v12 }
 0x3c7   :  { %2184 = vmatpush.bf16.msrb.mxu0 %v7221_v18 }
 0x3c9   :  { %2210 = vmatpush.bf16.msra.mxu2 %v7222_v9 }
 0x3cb   :  { %2185 = vmatpush.bf16.msrb.mxu0 %v7223_v6 }
 0x3cd   :  { %2211 = vmatpush.bf16.msra.mxu2 %v7224_v59 }
 0x3d8   :  { %v1856_v34 = vpop.f32.mrf.mxu1 }
 0x3de   :  { %v1882_v30 = vpop.f32.mrf.mxu3 }
 0x3e0   :  { %v1858_v52 = vpop.f32.mrf.mxu1 }
 0x3e6   :  { %v1884_v35 = vpop.f32.mrf.mxu3 }
 0x3e8   :  { %v1908_v10 = vpop.f32.mrf.mxu1 }
 0x3eb   :  { %v1843_v5 = vpop.f32.mrf.mxu0 }
 0x3ec   :  { %v1857_v4 = vadd.f32 %v1856_v34, %v1843_v5 }
 0x3ee   :  { %v1938_v11 = vadd.f32 %v1857_v4, %v7225_v13  ;;  %v1934_v60 = vpop.f32.mrf.mxu3 }
 0x3f0   :  { %v3812_v39 = vmul.f32 -1.442695, %v1938_v11  ;;  %v1910_v12 = vpop.f32.mrf.mxu1 }
 0x3f1   :  { %v1869_v26 = vpop.f32.mrf.mxu2 }
 0x3f2   :  { %4147 = vpow2.f32 %v3812_v39  ;;  %v1883_v18 = vadd.f32 %v1882_v30, %v1869_v26 }
 0x3f3   :  { %v1845_v9 = vpop.f32.mrf.mxu0 }
 0x3f4   :  { %v1939_v6 = vadd.f32 %v1883_v18, %v7226_v8 }
 0x3f6   :  { %v3813_v16 = vmul.f32 -1.442695, %v1939_v6  ;;  %v1936_v59 = vpop.f32.mrf.mxu3 }
 0x3f7   :  { %v7228_v59 = vld [vmem:[#allocation88_spill] sm:$0xff] }
 0x3f8   :  { %v4148_v24 = vpop.eup %4147  ;;  %4149 = vpow2.f32 %v3813_v16  ;;  %v2027_v52 = vpop.f32.mrf.mxu1 }
 0x3f9   :  { %v6032_v35 = vadd.f32 1.0, %v4148_v24  ;;  %v2058_v34 = vadd.f32 %v2027_v52, %v7227_v17  ;;  %v1871_v5 = vpop.f32.mrf.mxu2 }
 0x3fb   :  { %4151 = vrcp.f32 %v6032_v35  ;;  %v3816_v11 = vmul.f32 -1.442695, %v2058_v34  ;;  %v1895_v4 = vpop.f32.mrf.mxu0  ;;  %vm1951_vm7 = vweird.f32 %v6032_v35 }
 0x3fc   :  { %v1909_v34 = vadd.f32 %v1908_v10, %v1895_v4 }
 0x3fd   :  { %4153 = vpow2.f32 %v3816_v11 }
 0x3fe   :  { %v4150_v12 = vpop.eup %4149 }
 0x3ff   :  { %v1964_v26 = vadd.f32 1.0, %v4150_v12 }
 0x400   :  { %v2053_v39 = vpop.f32.mrf.mxu3  ;;  %v2029_v9 = vpop.f32.mrf.mxu1 }
 0x401   :  { %v4152_v18 = vpop.eup %4151  ;;  %4155 = vrcp.f32 %v1964_v26  ;;  %v1921_v6 = vpop.f32.mrf.mxu2  ;;  %v2060_v24 = vadd.f32 %v2053_v39, %v7228_v59  ;;  %v1940_v39 = vadd.f32 %v1909_v34, %v7079_v37  ;;  %vm1970_vm8 = vweird.f32 %v1964_v26 }
 0x402   :  { %v1947_v16 = vmul.f32 %v4152_v18, %v6032_v35  ;;  %v1935_v30 = vadd.f32 %v1934_v60, %v1921_v6  ;;  %vm1952_vm5 = vweird.f32 %v4152_v18  ;;  %v1974_v60 = vand.u32 2147483647, %v1964_v26 }
 0x403   :  { %v1897_v8 = vpop.f32.mrf.mxu0  ;;  %v4154_v17 = vpop.eup %4153  ;;  %v3817_v13 = vmul.f32 -1.442695, %v2060_v24  ;;  %v1957_v24 = vand.u32 2147483648, %v6032_v35  ;;  %vm6046_vm9 = vmor %vm1951_vm7, %vm1952_vm5 }
 0x404   :  { %v1948_v52 = vsub.f32 1.0, %v1947_v16  ;;  %v1941_v5 = vadd.f32 %v1935_v30, %v7078_v14  ;;  %v6039_v11 = vadd.f32 1.0, %v4154_v17  ;;  %v1976_v8 = vand.u32 2147483648, %v1964_v26  ;;  %v7229_v16 = vld [vmem:[#allocation56_spill] sm:$0xff] }
 0x405   :  { %vm1975_vm11 = vcmp.eq.f32.partialorder %v1974_v60, 8.507059e+37 }
 0x406   :  { %v3814_v12 = vmul.f32 -1.442695, %v1941_v5  ;;  %v1949_v0 = vmul.f32 %v4152_v18, %v1948_v52  ;;  %vm2089_vm2 = vweird.f32 %v6039_v11 }
 0x407   :  { %v4156_v36 = vpop.eup %4155 }
 0x408   :  { %v2055_v9 = vpop.f32.mrf.mxu3  ;;  %v1966_v56 = vmul.f32 %v4156_v36, %v1964_v26  ;;  %4157 = vpow2.f32 %v3814_v12  ;;  %vm1971_vm6 = vweird.f32 %v4156_v36  ;;  %v1950_v6 = vadd.f32 %v4152_v18, %v1949_v0 }
 0x409   :  { %v1923_v44 = vpop.f32.mrf.mxu2  ;;  %4159 = vpow2.f32 %v3817_v13  ;;  %vm1972_vm10 = vmor %vm1970_vm8, %vm1971_vm6  ;;  %v1958_v12 = vor.u32 1.1754944e-38, %v1957_v24 }
 0x40a   :  { %v1967_v28 = vsub.f32 1.0, %v1966_v56  ;;  %4161 = vrcp.f32 %v6039_v11  ;;  %v1955_v56 = vand.u32 2147483647, %v6032_v35  ;;  %v1954_v52 = vsel %vm6046_vm9, %v4152_v18, %v1950_v6 }
 0x40b   :  { %v2014_v10 = vpop.f32.mrf.mxu0  ;;  %4163 = vtanh.f32 %v1940_v39 }
 0x40c   :  { %v1968_v4 = vmul.f32 %v4156_v36, %v1967_v28  ;;  %v2057_v59 = vadd.f32 %v2014_v10, %v7229_v16  ;;  %v1977_v28 = vor.u32 1.1754944e-38, %v1976_v8  ;;  %vm1956_vm12 = vcmp.eq.f32.partialorder %v1955_v56, 8.507059e+37 }
 0x40d   :  { %v1959_v10 = vsel %vm1956_vm12, %v1958_v12, %v1954_v52 }
 0x40e   :  { %v1969_v13 = vadd.f32 %v4156_v36, %v1968_v4  ;;  %v3815_v30 = vmul.f32 -1.442695, %v2057_v59  ;;  %v4158_v17 = vpop.eup %4157 }
 0x40f   :  { %v4160_v0 = vpop.eup %4159  ;;  %v1984_v34 = vadd.f32 1.0, %v4158_v17 }
 0x410   :  { %v1973_v5 = vsel %vm1972_vm10, %v4156_v36, %v1969_v13  ;;  %v6053_v26 = vpop.eup %4161  ;;  %4165 = vpow2.f32 %v3815_v30  ;;  %v6058_v18 = vadd.f32 1.0, %v4160_v0 }
 0x411   :  { %v1978_v9 = vsel %vm1975_vm11, %v1977_v28, %v1973_v5  ;;  %4167 = vrcp.f32 %v1984_v34  ;;  %v2085_v39 = vmul.f32 %v6053_v26, %v6039_v11  ;;  %v4164_v16 = vpop.eup %4163  ;;  %v1994_v0 = vand.u32 2147483647, %v1984_v34 }
 0x412   :  { %v2000_v8 = vmul.f32 %v1978_v9, %v5900_v2  ;;  %v2001_v36 = vmul.f32 %v4164_v16, %v1959_v10  ;;  %4169 = vrcp.f32 %v6058_v18  ;;  %v1996_v2 = vand.u32 2147483648, %v1984_v34  ;;  %v7232_v9 = vld [vmem:[#allocation87_spill] sm:$0xff] }
 0x413   :  { %v2016_v4 = vpop.f32.mrf.mxu0  ;;  %v2086_v59 = vsub.f32 1.0, %v2085_v39  ;;  %vm1990_vm14 = vweird.f32 %v1984_v34  ;;  %vm2090_vm15 = vweird.f32 %v6053_v26  ;;  %vm1995_vm1 = vcmp.eq.f32.partialorder %v1994_v0, 8.507059e+37 }
 0x414   :  { %v6060_v24 = vadd.f32 %v2001_v36, %v2000_v8  ;;  %v1997_v39 = vor.u32 1.1754944e-38, %v1996_v2  ;;  %vm6074_vm3 = vmor %vm2089_vm2, %vm2090_vm15  ;;  %vm2109_vm10 = vweird.f32 %v6058_v18 }
 0x415   :  { %v2040_v35 = vpop.f32.mrf.mxu2  ;;  %v2087_v17 = vmul.f32 %v6053_v26, %v2086_v59 }
 0x416   :  { %v4166_v60 = vpop.eup %4165  ;;  %v2059_v10 = vadd.f32 %v2040_v35, %v7232_v9 }
 0x417   :  { %v4168_v6 = vpop.eup %4167  ;;  %v2064_v44 = vadd.f32 1.0, %v4166_v60  ;;  %v2088_v4 = vadd.f32 %v6053_v26, %v2087_v17  ;;  %v2095_v60 = vand.u32 2147483648, %v6039_v11 }
 0x418   :  { %v1986_v56 = vmul.f32 %v4168_v6, %v1984_v34  ;;  %vm1991_vm13 = vweird.f32 %v4168_v6  ;;  %v6065_v52 = vpop.eup %4169 }
 0x419   :  { %4171 = vrcp.f32 %v2064_v44  ;;  %vm1992_vm0 = vmor %vm1990_vm14, %vm1991_vm13  ;;  %v2105_v34 = vmul.f32 %v6065_v52, %v6058_v18  ;;  %v2076_v17 = vand.u32 2147483648, %v2064_v44  ;;  %vm2070_vm5 = vweird.f32 %v2064_v44 }
 0x41a   :  { %v1987_v30 = vsub.f32 1.0, %v1986_v56  ;;  %4173 = vtanh.f32 %v6060_v24  ;;  %vm2110_vm9 = vweird.f32 %v6065_v52 }
 0x41b   :  { %4175 = vtanh.f32 %v2059_v10  ;;  %v2106_v9 = vsub.f32 1.0, %v2105_v34  ;;  %vm2111_vm11 = vmor %vm2109_vm10, %vm2110_vm9 }
 0x41c   :  { %v1988_v28 = vmul.f32 %v4168_v6, %v1987_v30 }
 0x41d   :  { %v2042_v13 = vpop.f32.mrf.mxu2 }
 0x41e   :  { %v1989_v5 = vadd.f32 %v4168_v6, %v1988_v28  ;;  %v2093_v13 = vand.u32 2147483647, %v6039_v11  ;;  %v2074_v28 = vand.u32 2147483647, %v2064_v44  ;;  %v2077_v11 = vor.u32 1.1754944e-38, %v2076_v17 }
 0x41f   :  { %v4172_v12 = vpop.eup %4171 }
 0x420   :  { %v2066_v8 = vmul.f32 %v4172_v12, %v2064_v44  ;;  %v1993_v16 = vsel %vm1992_vm0, %v4168_v6, %v1989_v5  ;;  %v4174_v36 = vpop.eup %4173  ;;  %v2092_v6 = vsel %vm6074_vm3, %v6053_v26, %v2088_v4  ;;  %vm2071_vm4 = vweird.f32 %v4172_v12 }
 0x421   :  { %v1998_v59 = vsel %vm1995_vm1, %v1997_v39, %v1993_v16  ;;  %v2096_v5 = vor.u32 1.1754944e-38, %v2095_v60  ;;  %vm2094_vm6 = vcmp.eq.f32.partialorder %v2093_v13, 8.507059e+37  ;;  %vm2072_vm7 = vmor %vm2070_vm5, %vm2071_vm4  ;;  %vm2075_vm8 = vcmp.eq.f32.partialorder %v2074_v28, 8.507059e+37  ;;  %v4176_v10 = vpop.eup %4175  ;;  %v7239_v28 = vld [vmem:[#allocation37_spill] sm:$0xff] }
 0x422   :  { %v2067_v35 = vsub.f32 1.0, %v2066_v8  ;;  %v2004_v30 = vmul.f32 %v4174_v36, %v1998_v59  ;;  %v2107_v4 = vmul.f32 %v6065_v52, %v2106_v9  ;;  %v2113_v59 = vand.u32 2147483647, %v6058_v18  ;;  %v7242_v9 = vld [vmem:[#allocation25_spill] sm:$0xff] }
 0x423   :  { %v2097_v8 = vsel %vm2094_vm6, %v2096_v5, %v2092_v6  ;;  %v7237_v6 = vld [vmem:[#allocation18_spill] sm:$0xff]  ;;  %v7241_v5 = vld [vmem:[#allocation21_spill] sm:$0xff] }
 0x424   :  { %v2068_v2 = vmul.f32 %v4172_v12, %v2067_v35  ;;  %v2125_v0 = vpack.c.bf16 %v2004_v30, %v2004_v30  ;;  %v2119_v36 = vmul.f32 %v2097_v8, %v5929_v20  ;;  %v2108_v34 = vadd.f32 %v6065_v52, %v2107_v4  ;;  %v7245_v8 = vld [vmem:[#allocation41_spill] sm:$0xff]  ;;  %v7248_v4 = vld [vmem:[#allocation60_spill] sm:$0xff] }
 0x425   :  { %vm2114_vm12 = vcmp.eq.f32.partialorder %v2113_v59, 8.507059e+37  ;;  %v7254_v59 = vld [vmem:[#allocation48_spill] sm:$0xff] }
 0x426   :  { %v2069_v39 = vadd.f32 %v4172_v12, %v2068_v2  ;;  %2147 = vmatmul.bf16.vlgmr.msra.gmra.mxu1 %v2125_v0  ;;  %2173 = vmatmul.bf16.vlgmr.msrb.gmra.mxu3 %v2125_v0  ;;  %v2112_v20 = vsel %vm2111_vm11, %v6065_v52, %v2108_v34  ;;  %v7236_v52 = vld [vmem:[#allocation34_spill] sm:$0xff]  ;;  %v7238_v2 = vld [vmem:[#allocation24_spill] sm:$0xff]  ;;  %v7252_v34 = vld [vmem:[#allocation69_spill] sm:$0xff] }
 0x427   :  { %2310 = vmatpush.bf16.msra.mxu1 %v7015_v23  ;;  %2336 = vmatpush.bf16.msrb.mxu3 %v7016_v21 }
 0x428   :  { %v2073_v26 = vsel %vm2072_vm7, %v4172_v12, %v2069_v39  ;;  %v2115_v12 = vand.u32 2147483648, %v6058_v18  ;;  %v7235_v18 = vld [vmem:[#allocation33_spill] sm:$0xff] }
 0x429   :  { %v2078_v16 = vsel %vm2075_vm8, %v2077_v11, %v2073_v26  ;;  %v7243_v39 = vld [vmem:[#allocation53_spill] sm:$0xff]  ;;  %v7244_v11 = vld [vmem:[#allocation54_spill] sm:$0xff] }
 0x42a   :  { %v2120_v60 = vmul.f32 %v4176_v10, %v2078_v16  ;;  %v2116_v56 = vor.u32 1.1754944e-38, %v2115_v12  ;;  %v7246_v26 = vld [vmem:[#allocation42_spill] sm:$0xff]  ;;  %v7247_v10 = vld [vmem:[#allocation59_spill] sm:$0xff] }
 0x42b   :  { %2311 = vmatpush.bf16.msra.mxu1 %v7017_v32  ;;  %2337 = vmatpush.bf16.msrb.mxu3 %v7018_v62  ;;  %v7249_v16 = vld [vmem:[#allocation43_spill] sm:$0xff] }
 0x42c   :  { %v6088_v44 = vadd.f32 %v2120_v60, %v2119_v36  ;;  %v2117_v13 = vsel %vm2114_vm12, %v2116_v56, %v2112_v20  ;;  %v7250_v36 = vld [vmem:[#allocation45_spill] sm:$0xff]  ;;  %v7251_v60 = vld [vmem:[#allocation66_spill] sm:$0xff]  ;;  %v7253_v12 = vld [vmem:[#allocation47_spill] sm:$0xff] }
 0x42d   :  { %v7255_v20 = vld [vmem:[#allocation49_spill] sm:$0xff]  ;;  %v7256_v56 = vld [vmem:[#allocation50_spill] sm:$0xff] }
 0x42e   :  { %4177 = vtanh.f32 %v6088_v44 }
 0x42f   :  { %2312 = vmatpush.bf16.msra.mxu1 %v7019_v45  ;;  %2338 = vmatpush.bf16.msrb.mxu3 %v7020_v48 }
 0x433   :  { %2313 = vmatpush.bf16.msra.mxu1 %v7021_v27  ;;  %2339 = vmatpush.bf16.msrb.mxu3 %v7022_v63 }
 0x434   :  { %v4178_v35 = vpop.eup %4177 }
 0x435   :  { %v2123_v30 = vmul.f32 %v4178_v35, %v2117_v13  ;;  %v7257_v35 = vld [vmem:[#allocation73_spill] sm:$0xff]  ;;  %v7258_v13 = vld [vmem:[#allocation74_spill] sm:$0xff] }
 0x436   :  { %2199 = vmatmul.bf16.vlgmr.msrb.gmra.mxu1 %v2125_v0  ;;  %2225 = vmatmul.bf16.vlgmr.msra.gmra.mxu3 %v2125_v0  ;;  %v7240_v0 = vld [vmem:[#allocation38_spill] sm:$0xff] }
 0x437   :  { %v2124_v17 = vpack.c.bf16 %v2123_v30, %v2123_v30  ;;  %2314 = vmatpush.bf16.msra.mxu1 %v7023_v15  ;;  %2340 = vmatpush.bf16.msrb.mxu3 %v7024_v55  ;;  %v7259_v30 = vld [vmem:[#allocation55_spill] sm:$0xff] }
 0x439   :  { %2134 = vmatmul.bf16.vlgmr.msra.gmra.mxu0 %v2124_v17  ;;  %2160 = vmatmul.bf16.vlgmr.msrb.gmra.mxu2 %v2124_v17 }
 0x43a   :  { %2297 = vmatpush.bf16.msra.mxu0 %v4421_v29  ;;  %2323 = vmatpush.bf16.msrb.mxu2 %v4480_v49 }
 0x43b   :  { %2315 = vmatpush.bf16.msra.mxu1 %v7025_v54  ;;  %2341 = vmatpush.bf16.msrb.mxu3 %v7026_v46 }
 0x43e   :  { %2298 = vmatpush.bf16.msra.mxu0 %v4461_v42  ;;  %2324 = vmatpush.bf16.msrb.mxu2 %v4516_v61 }
 0x43f   :  { %2316 = vmatpush.bf16.msra.mxu1 %v7027_v38  ;;  %2342 = vmatpush.bf16.msrb.mxu3 %v4682_v58 }
 0x442   :  { %2299 = vmatpush.bf16.msra.mxu0 %v4494_v53  ;;  %2325 = vmatpush.bf16.msrb.mxu2 %v4546_v7 }
 0x443   :  { %2317 = vmatpush.bf16.msra.mxu1 %v4661_v51  ;;  %2343 = vmatpush.bf16.msrb.mxu3 %v7028_v1 }
 0x446   :  { %2300 = vmatpush.bf16.msra.mxu0 %v6965_v19  ;;  %2318 = vmatmul.bf16.vlgmr.msra.gmra.mxu1 %v2124_v17 }
 0x447   :  { %2431 = vmatpush.bf16.msrb.mxu1 %v7029_v31  ;;  %2457 = vmatpush.bf16.msra.mxu3 %v4740_v22 }
 0x448   :  { %2326 = vmatpush.bf16.msrb.mxu2 %v6966_v47  ;;  %2344 = vmatmul.bf16.vlgmr.msrb.gmra.mxu3 %v2124_v17 }
 0x449   :  { %2186 = vmatmul.bf16.vlgmr.msrb.gmra.mxu0 %v2124_v17  ;;  %2212 = vmatmul.bf16.vlgmr.msra.gmra.mxu2 %v2124_v17 }
 0x44a   :  { %2301 = vmatpush.bf16.msra.mxu0 %v6969_v43 }
 0x44b   :  { %2432 = vmatpush.bf16.msrb.mxu1 %v4763_v33  ;;  %2458 = vmatpush.bf16.msra.mxu3 %v4771_v41 }
 0x44c   :  { %2327 = vmatpush.bf16.msrb.mxu2 %v6970_v40 }
 0x44e   :  { %2302 = vmatpush.bf16.msra.mxu0 %v6973_v25 }
 0x44f   :  { %2433 = vmatpush.bf16.msrb.mxu1 %v4787_v57  ;;  %2459 = vmatpush.bf16.msra.mxu3 %v4797_v3 }
 0x450   :  { %2328 = vmatpush.bf16.msrb.mxu2 %v6974_v50  ;;  %v7304_v50 = vld [vmem:[#allocation68_spill] sm:$0xff] }
 0x452   :  { %2303 = vmatpush.bf16.msra.mxu0 %v7237_v6 }
 0x453   :  { %2434 = vmatpush.bf16.msrb.mxu1 %v7235_v18  ;;  %2460 = vmatpush.bf16.msra.mxu3 %v7236_v52  ;;  %v7303_v18 = vld [vmem:[#allocation27_spill] sm:$0xff] }
 0x454   :  { %2329 = vmatpush.bf16.msrb.mxu2 %v7238_v2 }
 0x456   :  { %2304 = vmatpush.bf16.msra.mxu0 %v7241_v5  ;;  %v7299_v5 = vld [vmem:[#allocation28_spill] sm:$0xff] }
 0x457   :  { %2435 = vmatpush.bf16.msrb.mxu1 %v7239_v28  ;;  %2461 = vmatpush.bf16.msra.mxu3 %v7240_v0  ;;  %v7300_v0 = vld [vmem:[#allocation71_spill] sm:$0xff] }
 0x458   :  { %2330 = vmatpush.bf16.msrb.mxu2 %v7242_v9 }
 0x459   :  { %2305 = vmatmul.bf16.vlgmr.msra.gmra.mxu0 %v2124_v17 }
 0x45a   :  { %2418 = vmatpush.bf16.msrb.mxu0 %v7243_v39  ;;  %v7298_v39 = vld [vmem:[#allocation16_spill] sm:$0xff] }
 0x45b   :  { %2436 = vmatpush.bf16.msrb.mxu1 %v7245_v8  ;;  %2462 = vmatpush.bf16.msra.mxu3 %v7246_v26 }
 0x45c   :  { %2444 = vmatpush.bf16.msra.mxu2 %v7244_v11 }
 0x45d   :  { %2331 = vmatmul.bf16.vlgmr.msrb.gmra.mxu2 %v2124_v17  ;;  %v7260_v17 = vld [vmem:[#allocation57_spill] sm:$0xff] }
 0x45e   :  { %2419 = vmatpush.bf16.msrb.mxu0 %v7247_v10 }
 0x45f   :  { %2437 = vmatpush.bf16.msrb.mxu1 %v7249_v16  ;;  %2463 = vmatpush.bf16.msra.mxu3 %v7250_v36  ;;  %v7261_v36 = vld [vmem:[#allocation79_spill] sm:$0xff] }
 0x460   :  { %2445 = vmatpush.bf16.msra.mxu2 %v7248_v4 }
 0x462   :  { %2420 = vmatpush.bf16.msrb.mxu0 %v7251_v60  ;;  %v7262_v60 = vld [vmem:[#allocation80_spill] sm:$0xff] }
 0x463   :  { %2438 = vmatpush.bf16.msrb.mxu1 %v7253_v12  ;;  %2464 = vmatpush.bf16.msra.mxu3 %v7254_v59  ;;  %v7264_v12 = vld [vmem:[#allocation64_spill] sm:$0xff]  ;;  %v7265_v59 = vld [vmem:[#allocation83_spill] sm:$0xff] }
 0x464   :  { %2446 = vmatpush.bf16.msra.mxu2 %v7252_v34  ;;  %v7263_v34 = vld [vmem:[#allocation61_spill] sm:$0xff] }
 0x466   :  { %2421 = vmatpush.bf16.msrb.mxu0 %v7257_v35  ;;  %v7268_v35 = vld [vmem:[#allocation72_spill] sm:$0xff] }
 0x467   :  { %2483 = vmatpush.bf16.msra.mxu1 %v7255_v20  ;;  %2509 = vmatpush.bf16.msrb.mxu3 %v7256_v56  ;;  %v7266_v20 = vld [vmem:[#allocation84_spill] sm:$0xff]  ;;  %v7267_v56 = vld [vmem:[#allocation70_spill] sm:$0xff] }
 0x468   :  { %2447 = vmatpush.bf16.msra.mxu2 %v7258_v13  ;;  %v7269_v13 = vld [vmem:[#allocation89_spill] sm:$0xff] }
 0x46a   :  { %2422 = vmatpush.bf16.msrb.mxu0 %v7261_v36  ;;  %v7272_v36 = vld [vmem:[#allocation76_spill] sm:$0xff] }
 0x46b   :  { %2484 = vmatpush.bf16.msra.mxu1 %v7259_v30  ;;  %2510 = vmatpush.bf16.msrb.mxu3 %v7260_v17  ;;  %v7270_v30 = vld [vmem:[#allocation90_spill] sm:$0xff]  ;;  %v7271_v17 = vld [vmem:[#allocation75_spill] sm:$0xff] }
 0x46c   :  { %2448 = vmatpush.bf16.msra.mxu2 %v7262_v60  ;;  %v7273_v60 = vld [vmem:[#allocation93_spill] sm:$0xff] }
 0x46e   :  { %2423 = vmatpush.bf16.msrb.mxu0 %v7265_v59  ;;  %v7276_v59 = vld [vmem:[#allocation98_spill] sm:$0xff] }
 0x46f   :  { %2485 = vmatpush.bf16.msra.mxu1 %v7263_v34  ;;  %2511 = vmatpush.bf16.msrb.mxu3 %v7264_v12  ;;  %v7274_v34 = vld [vmem:[#allocation94_spill] sm:$0xff]  ;;  %v7275_v12 = vld [vmem:[#allocation97_spill] sm:$0xff] }
 0x470   :  { %2449 = vmatpush.bf16.msra.mxu2 %v7266_v20  ;;  %v7277_v20 = vld [vmem:[#allocation81_spill] sm:$0xff] }
 0x472   :  { %2424 = vmatpush.bf16.msrb.mxu0 %v7269_v13  ;;  %v7280_v13 = vld [vmem:[#allocation100_spill] sm:$0xff] }
 0x473   :  { %2486 = vmatpush.bf16.msra.mxu1 %v7267_v56  ;;  %2512 = vmatpush.bf16.msrb.mxu3 %v7268_v35  ;;  %v7278_v56 = vld [vmem:[#allocation82_spill] sm:$0xff]  ;;  %v7279_v35 = vld [vmem:[#allocation99_spill] sm:$0xff] }
 0x474   :  { %2450 = vmatpush.bf16.msra.mxu2 %v7270_v30  ;;  %v7281_v30 = vld [vmem:[#allocation85_spill] sm:$0xff] }
 0x476   :  { %2425 = vmatpush.bf16.msrb.mxu0 %v7273_v60  ;;  %v7284_v60 = vld [vmem:[#allocation103_spill] sm:$0xff] }
 0x477   :  { %2487 = vmatpush.bf16.msra.mxu1 %v7271_v17  ;;  %2513 = vmatpush.bf16.msrb.mxu3 %v7272_v36  ;;  %v7282_v17 = vld [vmem:[#allocation86_spill] sm:$0xff] }
 0x478   :  { %2451 = vmatpush.bf16.msra.mxu2 %v7274_v34  ;;  %v7283_v36 = vld [vmem:[#allocation102_spill] sm:$0xff]  ;;  %v7285_v34 = vld [vmem:[#allocation91_spill] sm:$0xff] }
 0x47a   :  { %2470 = vmatpush.bf16.msra.mxu0 %v7275_v12  ;;  %v7286_v12 = vld [vmem:[#allocation92_spill] sm:$0xff] }
 0x47b   :  { %2488 = vmatpush.bf16.msra.mxu1 %v7277_v20  ;;  %2514 = vmatpush.bf16.msrb.mxu3 %v7278_v56  ;;  %v7288_v20 = vld [vmem:[#allocation106_spill] sm:$0xff]  ;;  %v7289_v56 = vld [vmem:[#allocation109_spill] sm:$0xff] }
 0x47c   :  { %2496 = vmatpush.bf16.msrb.mxu2 %v7276_v59  ;;  %v7287_v59 = vld [vmem:[#allocation105_spill] sm:$0xff] }
 0x47e   :  { %2471 = vmatpush.bf16.msra.mxu0 %v7279_v35  ;;  %v7290_v35 = vld [vmem:[#allocation110_spill] sm:$0xff] }
 0x47f   :  { %2489 = vmatpush.bf16.msra.mxu1 %v7281_v30  ;;  %2515 = vmatpush.bf16.msrb.mxu3 %v7282_v17  ;;  %v7292_v30 = vld [vmem:[#allocation112_spill] sm:$0xff]  ;;  %v7293_v17 = vld [vmem:[#allocation113_spill] sm:$0xff] }
 0x480   :  { %2497 = vmatpush.bf16.msrb.mxu2 %v7280_v13  ;;  %v7291_v13 = vld [vmem:[#allocation111_spill] sm:$0xff] }
 0x482   :  { %2472 = vmatpush.bf16.msra.mxu0 %v7283_v36  ;;  %v7294_v36 = vld [vmem:[#allocation114_spill] sm:$0xff] }
 0x483   :  { %2490 = vmatpush.bf16.msra.mxu1 %v7285_v34  ;;  %2516 = vmatpush.bf16.msrb.mxu3 %v7286_v12  ;;  %v7296_v34 = vld [vmem:[#allocation116_spill] sm:$0xff] }
 0x484   :  { %2498 = vmatpush.bf16.msrb.mxu2 %v7284_v60  ;;  %v7295_v60 = vld [vmem:[#allocation115_spill] sm:$0xff] }
 0x486   :  { %2473 = vmatpush.bf16.msra.mxu0 %v7287_v59 }
 0x488   :  { %2499 = vmatpush.bf16.msrb.mxu2 %v7288_v20 }
 0x48a   :  { %2474 = vmatpush.bf16.msra.mxu0 %v7289_v56 }
 0x48c   :  { %2500 = vmatpush.bf16.msrb.mxu2 %v7290_v35  ;;  %v7297_v35 = vld [vmem:[#allocation8_spill] sm:$0xff] }
 0x48e   :  { %2475 = vmatpush.bf16.msra.mxu0 %v7291_v13 }
 0x490   :  { %2501 = vmatpush.bf16.msrb.mxu2 %v7292_v30 }
 0x492   :  { %2476 = vmatpush.bf16.msra.mxu0 %v7293_v17 }
 0x494   :  { %2502 = vmatpush.bf16.msrb.mxu2 %v7294_v36 }
 0x496   :  { %2477 = vmatpush.bf16.msra.mxu0 %v7295_v60 }
 0x498   :  { %2503 = vmatpush.bf16.msrb.mxu2 %v7296_v34 }
 0x4a3   :  { %v2148_v12 = vpop.f32.mrf.mxu1 }
 0x4a9   :  { %v2174_v59 = vpop.f32.mrf.mxu3 }
 0x4ab   :  { %v2150_v16 = vpop.f32.mrf.mxu1 }
 0x4ac   :  { %v186_v16 = vadd.f32 %v7300_v0, %v7299_v5 }
 0x4b1   :  { %v2176_v20 = vpop.f32.mrf.mxu3 }
 0x4b3   :  { %v2200_v4 = vpop.f32.mrf.mxu1 }
 0x4b6   :  { %v2135_v56 = vpop.f32.mrf.mxu0 }
 0x4b7   :  { %v2149_v10 = vadd.f32 %v2148_v12, %v2135_v56 }
 0x4b9   :  { %v2230_v26 = vadd.f32 %v2149_v10, %v7297_v35  ;;  %v2226_v13 = vpop.f32.mrf.mxu3 }
 0x4bb   :  { %v3818_v8 = vmul.f32 -1.442695, %v2230_v26  ;;  %v2202_v30 = vpop.f32.mrf.mxu1 }
 0x4bc   :  { %v2161_v11 = vpop.f32.mrf.mxu2 }
 0x4bd   :  { %4179 = vpow2.f32 %v3818_v8  ;;  %v2175_v17 = vadd.f32 %v2174_v59, %v2161_v11 }
 0x4be   :  { %v2137_v36 = vpop.f32.mrf.mxu0 }
 0x4bf   :  { %v2231_v60 = vadd.f32 %v2175_v17, %v7298_v39 }
 0x4c1   :  { %v3819_v9 = vmul.f32 -1.442695, %v2231_v60  ;;  %v2228_v34 = vpop.f32.mrf.mxu3  ;;  %v7301_v60 = vld [vmem:[#allocation63_spill] sm:$0xff] }
 0x4c2   :  { %v7302_v34 = vld [vmem:[#allocation96_spill] sm:$0xff] }
 0x4c3   :  { %v4180_v20 = vpop.eup %4179  ;;  %4181 = vpow2.f32 %v3819_v9  ;;  %v2319_v28 = vpop.f32.mrf.mxu1  ;;  %v244_v30 = vadd.f32 %v7302_v34, %v7301_v60 }
 0x4c4   :  { %v6193_v12 = vadd.f32 1.0, %v4180_v20  ;;  %v2350_v10 = vadd.f32 %v2319_v28, %v186_v16  ;;  %v2163_v56 = vpop.f32.mrf.mxu2 }
 0x4c6   :  { %4183 = vrcp.f32 %v6193_v12  ;;  %v3822_v26 = vmul.f32 -1.442695, %v2350_v10  ;;  %v2187_v8 = vpop.f32.mrf.mxu0  ;;  %vm2243_vm15 = vweird.f32 %v6193_v12 }
 0x4c7   :  { %v2201_v35 = vadd.f32 %v2200_v4, %v2187_v8 }
 0x4c8   :  { %4185 = vpow2.f32 %v3822_v26 }
 0x4c9   :  { %v4182_v11 = vpop.eup %4181 }
 0x4ca   :  { %v2256_v36 = vadd.f32 1.0, %v4182_v11 }
 0x4cb   :  { %v2345_v59 = vpop.f32.mrf.mxu3  ;;  %v2321_v17 = vpop.f32.mrf.mxu1 }
 0x4cc   :  { %v4184_v0 = vpop.eup %4183  ;;  %4187 = vrcp.f32 %v2256_v36  ;;  %v2213_v9 = vpop.f32.mrf.mxu2  ;;  %v2352_v5 = vadd.f32 %v2345_v59, %v244_v30  ;;  %v157_v59 = vadd.f32 %v7304_v50, %v7303_v18  ;;  %v2232_v30 = vadd.f32 %v2201_v35, %v7079_v37  ;;  %v7337_v18 = vld [vmem:[#allocation57_spill] sm:$0xff] }
 0x4cd   :  { %v2239_v20 = vmul.f32 %v4184_v0, %v6193_v12  ;;  %v2227_v28 = vadd.f32 %v2226_v13, %v2213_v9  ;;  %v2268_v9 = vand.u32 2147483648, %v2256_v36  ;;  %vm2244_vm13 = vweird.f32 %v4184_v0 }
 0x4ce   :  { %v2189_v16 = vpop.f32.mrf.mxu0  ;;  %v4186_v56 = vpop.eup %4185  ;;  %v3823_v26 = vmul.f32 -1.442695, %v2352_v5  ;;  %v2266_v5 = vand.u32 2147483647, %v2256_v36  ;;  %vm2262_vm0 = vweird.f32 %v2256_v36  ;;  %vm6208_vm1 = vmor %vm2243_vm15, %vm2244_vm13 }
 0x4cf   :  { %v2240_v39 = vsub.f32 1.0, %v2239_v20  ;;  %v2233_v10 = vadd.f32 %v2227_v28, %v7078_v14  ;;  %v6200_v2 = vadd.f32 1.0, %v4186_v56  ;;  %v2269_v56 = vor.u32 1.1754944e-38, %v2268_v9 }
 0x4d0   :  { %vm2267_vm3 = vcmp.eq.f32.partialorder %v2266_v5, 8.507059e+37 }
 0x4d1   :  { %v3820_v6 = vmul.f32 -1.442695, %v2233_v10  ;;  %v2241_v60 = vmul.f32 %v4184_v0, %v2240_v39  ;;  %vm2381_vm10 = vweird.f32 %v6200_v2 }
 0x4d2   :  { %v4188_v11 = vpop.eup %4187 }
 0x4d3   :  { %v2347_v34 = vpop.f32.mrf.mxu3  ;;  %v2258_v17 = vmul.f32 %v4188_v11, %v2256_v36  ;;  %4189 = vpow2.f32 %v3820_v6  ;;  %vm2263_vm14 = vweird.f32 %v4188_v11  ;;  %v2242_v20 = vadd.f32 %v4184_v0, %v2241_v60 }
 0x4d4   :  { %v2215_v52 = vpop.f32.mrf.mxu2  ;;  %4191 = vpow2.f32 %v3823_v26  ;;  %v2247_v6 = vand.u32 2147483647, %v6193_v12  ;;  %vm2264_vm2 = vmor %vm2262_vm0, %vm2263_vm14 }
 0x4d5   :  { %v2259_v13 = vsub.f32 1.0, %v2258_v17  ;;  %4193 = vrcp.f32 %v6200_v2  ;;  %v2249_v52 = vand.u32 2147483648, %v6193_v12  ;;  %v2246_v60 = vsel %vm6208_vm1, %v4184_v0, %v2242_v20 }
 0x4d6   :  { %v2306_v4 = vpop.f32.mrf.mxu0  ;;  %4195 = vtanh.f32 %v2232_v30  ;;  %vm2248_vm4 = vcmp.eq.f32.partialorder %v2247_v6, 8.507059e+37 }
 0x4d7   :  { %v2260_v8 = vmul.f32 %v4188_v11, %v2259_v13  ;;  %v2349_v28 = vadd.f32 %v2306_v4, %v157_v59  ;;  %v2250_v17 = vor.u32 1.1754944e-38, %v2249_v52 }
 0x4d9   :  { %v2261_v39 = vadd.f32 %v4188_v11, %v2260_v8  ;;  %v3821_v35 = vmul.f32 -1.442695, %v2349_v28  ;;  %v4190_v16 = vpop.eup %4189  ;;  %v2251_v13 = vsel %vm2248_vm4, %v2250_v17, %v2246_v60  ;;  %v7307_v60 = vld [vmem:[#allocation62_spill] sm:$0xff] }
 0x4da   :  { %v4192_v10 = vpop.eup %4191  ;;  %v2276_v34 = vadd.f32 1.0, %v4190_v16 }
 0x4db   :  { %v2265_v26 = vsel %vm2264_vm2, %v4188_v11, %v2261_v39  ;;  %v6215_v36 = vpop.eup %4193  ;;  %4197 = vpow2.f32 %v3821_v35  ;;  %v6220_v0 = vadd.f32 1.0, %v4192_v10 }
 0x4dc   :  { %v2270_v59 = vsel %vm2267_vm3, %v2269_v56, %v2265_v26  ;;  %4199 = vrcp.f32 %v2276_v34  ;;  %v2377_v30 = vmul.f32 %v6215_v36, %v6200_v2  ;;  %v4196_v8 = vpop.eup %4195  ;;  %v2286_v10 = vand.u32 2147483647, %v2276_v34  ;;  %v7308_v26 = vld [vmem:[#allocation95_spill] sm:$0xff] }
 0x4dd   :  { %v2292_v9 = vmul.f32 %v2270_v59, %v6060_v24  ;;  %v2293_v11 = vmul.f32 %v4196_v8, %v2251_v13  ;;  %4201 = vrcp.f32 %v6220_v0  ;;  %v2288_v24 = vand.u32 2147483648, %v2276_v34 }
 0x4de   :  { %v2308_v4 = vpop.f32.mrf.mxu0  ;;  %v2378_v28 = vsub.f32 1.0, %v2377_v30  ;;  %v215_v17 = vadd.f32 %v7308_v26, %v7307_v60  ;;  %vm2282_vm6 = vweird.f32 %v2276_v34  ;;  %vm2382_vm7 = vweird.f32 %v6215_v36  ;;  %v7336_v60 = vld [vmem:[#allocation55_spill] sm:$0xff] }
 0x4df   :  { %v6222_v52 = vadd.f32 %v2293_v11, %v2292_v9  ;;  %v2289_v8 = vor.u32 1.1754944e-38, %v2288_v24  ;;  %vm2287_vm9 = vcmp.eq.f32.partialorder %v2286_v10, 8.507059e+37  ;;  %vm6237_vm11 = vmor %vm2381_vm10, %vm2382_vm7  ;;  %vm2401_vm2 = vweird.f32 %v6220_v0 }
 0x4e0   :  { %v2332_v12 = vpop.f32.mrf.mxu2  ;;  %v2379_v16 = vmul.f32 %v6215_v36, %v2378_v28 }
 0x4e1   :  { %v4198_v5 = vpop.eup %4197  ;;  %v2351_v30 = vadd.f32 %v2332_v12, %v215_v17 }
 0x4e2   :  { %v4200_v20 = vpop.eup %4199  ;;  %v2356_v50 = vadd.f32 1.0, %v4198_v5  ;;  %v2380_v9 = vadd.f32 %v6215_v36, %v2379_v16  ;;  %v2385_v16 = vand.u32 2147483647, %v6200_v2 }
 0x4e3   :  { %v2278_v6 = vmul.f32 %v4200_v20, %v2276_v34  ;;  %vm2283_vm5 = vweird.f32 %v4200_v20  ;;  %v6229_v59 = vpop.eup %4201 }
 0x4e4   :  { %4203 = vrcp.f32 %v2356_v50  ;;  %vm2284_vm8 = vmor %vm2282_vm6, %vm2283_vm5  ;;  %v2397_v34 = vmul.f32 %v6229_v59, %v6220_v0  ;;  %v2366_v26 = vand.u32 2147483647, %v2356_v50  ;;  %vm2362_vm13 = vweird.f32 %v2356_v50 }
 0x4e5   :  { %v2279_v35 = vsub.f32 1.0, %v2278_v6  ;;  %4205 = vtanh.f32 %v6222_v52  ;;  %v2387_v6 = vand.u32 2147483648, %v6200_v2  ;;  %vm2386_vm14 = vcmp.eq.f32.partialorder %v2385_v16, 8.507059e+37 }
 0x4e6   :  { %4207 = vtanh.f32 %v2351_v30  ;;  %vm2367_vm0 = vcmp.eq.f32.partialorder %v2366_v26, 8.507059e+37  ;;  %vm2402_vm1 = vweird.f32 %v6229_v59  ;;  %v7314_v26 = vld [vmem:[#allocation18_spill] sm:$0xff] }
 0x4e7   :  { %v2280_v56 = vmul.f32 %v4200_v20, %v2279_v35  ;;  %v2405_v35 = vand.u32 2147483647, %v6220_v0  ;;  %vm2403_vm3 = vmor %vm2401_vm2, %vm2402_vm1 }
 0x4e8   :  { %v2334_v39 = vpop.f32.mrf.mxu2 }
 0x4e9   :  { %v2281_v13 = vadd.f32 %v4200_v20, %v2280_v56  ;;  %v2368_v56 = vand.u32 2147483648, %v2356_v50  ;;  %vm2406_vm4 = vcmp.eq.f32.partialorder %v2405_v35, 8.507059e+37  ;;  %v7329_v35 = vld [vmem:[#allocation69_spill] sm:$0xff] }
 0x4ea   :  { %v4204_v4 = vpop.eup %4203 }
 0x4eb   :  { %v2358_v11 = vmul.f32 %v4204_v4, %v2356_v50  ;;  %v2285_v5 = vsel %vm2284_vm8, %v4200_v20, %v2281_v13  ;;  %v4206_v28 = vpop.eup %4205  ;;  %v2384_v20 = vsel %vm6237_vm11, %v6215_v36, %v2380_v9  ;;  %vm2363_vm12 = vweird.f32 %v4204_v4 }
 0x4ec   :  { %v2290_v39 = vsel %vm2287_vm9, %v2289_v8, %v2285_v5  ;;  %v2388_v13 = vor.u32 1.1754944e-38, %v2387_v6  ;;  %v2398_v8 = vsub.f32 1.0, %v2397_v34  ;;  %vm2364_vm15 = vmor %vm2362_vm13, %vm2363_vm12  ;;  %v2369_v2 = vor.u32 1.1754944e-38, %v2368_v56  ;;  %v4208_v30 = vpop.eup %4207 }
 0x4ed   :  { %v2359_v12 = vsub.f32 1.0, %v2358_v11  ;;  %v2296_v24 = vmul.f32 %v4206_v28, %v2290_v39 }
 0x4ee   :  { %v2389_v11 = vsel %vm2386_vm14, %v2388_v13, %v2384_v20  ;;  %v2399_v9 = vmul.f32 %v6229_v59, %v2398_v8  ;;  %v7316_v13 = vld [vmem:[#allocation37_spill] sm:$0xff]  ;;  %v7317_v8 = vld [vmem:[#allocation38_spill] sm:$0xff] }
 0x4ef   :  { %v2360_v10 = vmul.f32 %v4204_v4, %v2359_v12  ;;  %v2417_v17 = vpack.c.bf16 %v2296_v24, %v2296_v24  ;;  %v2411_v6 = vmul.f32 %v2389_v11, %v6088_v44  ;;  %v7320_v11 = vld [vmem:[#allocation53_spill] sm:$0xff] }
 0x4f0   :  { %v2400_v39 = vadd.f32 %v6229_v59, %v2399_v9  ;;  %v7323_v9 = vld [vmem:[#allocation42_spill] sm:$0xff] }
 0x4f1   :  { %v2361_v5 = vadd.f32 %v4204_v4, %v2360_v10  ;;  %2439 = vmatmul.bf16.vlgmr.msrb.gmra.mxu1 %v2417_v17  ;;  %2465 = vmatmul.bf16.vlgmr.msra.gmra.mxu3 %v2417_v17  ;;  %v7313_v10 = vld [vmem:[#allocation34_spill] sm:$0xff] }
 0x4f2   :  { %2602 = vmatpush.bf16.msrb.mxu1 %v7015_v23  ;;  %2628 = vmatpush.bf16.msra.mxu3 %v7016_v21  ;;  %v2404_v44 = vsel %vm2403_vm3, %v6229_v59, %v2400_v39  ;;  %v7312_v59 = vld [vmem:[#allocation33_spill] sm:$0xff] }
 0x4f3   :  { %v2365_v36 = vsel %vm2364_vm15, %v4204_v4, %v2361_v5  ;;  %v2407_v4 = vand.u32 2147483648, %v6220_v0  ;;  %v7311_v0 = vld [vmem:[#allocation22_spill] sm:$0xff]  ;;  %v7318_v5 = vld [vmem:[#allocation21_spill] sm:$0xff] }
 0x4f4   :  { %v2370_v28 = vsel %vm2367_vm0, %v2369_v2, %v2365_v36  ;;  %v7319_v2 = vld [vmem:[#allocation25_spill] sm:$0xff]  ;;  %v7321_v36 = vld [vmem:[#allocation54_spill] sm:$0xff] }
 0x4f5   :  { %v2412_v34 = vmul.f32 %v4208_v30, %v2370_v28  ;;  %v2408_v12 = vor.u32 1.1754944e-38, %v2407_v4  ;;  %v7322_v30 = vld [vmem:[#allocation41_spill] sm:$0xff]  ;;  %v7324_v28 = vld [vmem:[#allocation59_spill] sm:$0xff]  ;;  %v7328_v4 = vld [vmem:[#allocation66_spill] sm:$0xff] }
 0x4f6   :  { %2603 = vmatpush.bf16.msrb.mxu1 %v7017_v32  ;;  %2629 = vmatpush.bf16.msra.mxu3 %v7018_v62  ;;  %v7327_v39 = vld [vmem:[#allocation45_spill] sm:$0xff] }
 0x4f7   :  { %v6251_v50 = vadd.f32 %v2412_v34, %v2411_v6  ;;  %v2409_v24 = vsel %vm2406_vm4, %v2408_v12, %v2404_v44  ;;  %v7325_v6 = vld [vmem:[#allocation60_spill] sm:$0xff]  ;;  %v7326_v34 = vld [vmem:[#allocation43_spill] sm:$0xff] }
 0x4f8   :  { %v7330_v44 = vld [vmem:[#allocation47_spill] sm:$0xff]  ;;  %v7331_v12 = vld [vmem:[#allocation48_spill] sm:$0xff] }
 0x4f9   :  { %4209 = vtanh.f32 %v6251_v50 }
 0x4fa   :  { %2604 = vmatpush.bf16.msrb.mxu1 %v7019_v45  ;;  %2630 = vmatpush.bf16.msra.mxu3 %v7020_v48 }
 0x4fe   :  { %2605 = vmatpush.bf16.msrb.mxu1 %v7021_v27  ;;  %2631 = vmatpush.bf16.msra.mxu3 %v7022_v63 }
 0x4ff   :  { %v4210_v16 = vpop.eup %4209 }
 0x500   :  { %v2415_v56 = vmul.f32 %v4210_v16, %v2409_v24  ;;  %v7332_v16 = vld [vmem:[#allocation49_spill] sm:$0xff]  ;;  %v7333_v24 = vld [vmem:[#allocation50_spill] sm:$0xff] }
 0x501   :  { %2491 = vmatmul.bf16.vlgmr.msra.gmra.mxu1 %v2417_v17  ;;  %2517 = vmatmul.bf16.vlgmr.msrb.gmra.mxu3 %v2417_v17  ;;  %v7315_v17 = vld [vmem:[#allocation24_spill] sm:$0xff] }
 0x502   :  { %v2416_v20 = vpack.c.bf16 %v2415_v56, %v2415_v56  ;;  %2606 = vmatpush.bf16.msrb.mxu1 %v7023_v15  ;;  %2632 = vmatpush.bf16.msra.mxu3 %v7024_v55  ;;  %v7334_v56 = vld [vmem:[#allocation73_spill] sm:$0xff] }
 0x504   :  { %2426 = vmatmul.bf16.vlgmr.msrb.gmra.mxu0 %v2416_v20  ;;  %2452 = vmatmul.bf16.vlgmr.msra.gmra.mxu2 %v2416_v20 }
 0x505   :  { %2589 = vmatpush.bf16.msrb.mxu0 %v4421_v29  ;;  %2615 = vmatpush.bf16.msra.mxu2 %v4480_v49 }
 0x506   :  { %2607 = vmatpush.bf16.msrb.mxu1 %v7025_v54  ;;  %2633 = vmatpush.bf16.msra.mxu3 %v7026_v46 }
 0x509   :  { %2590 = vmatpush.bf16.msrb.mxu0 %v4461_v42  ;;  %2616 = vmatpush.bf16.msra.mxu2 %v4516_v61 }
 0x50a   :  { %2608 = vmatpush.bf16.msrb.mxu1 %v7027_v38  ;;  %2634 = vmatpush.bf16.msra.mxu3 %v4682_v58 }
 0x50d   :  { %2591 = vmatpush.bf16.msrb.mxu0 %v4494_v53  ;;  %2617 = vmatpush.bf16.msra.mxu2 %v4546_v7 }
 0x50e   :  { %2609 = vmatpush.bf16.msrb.mxu1 %v4661_v51  ;;  %2635 = vmatpush.bf16.msra.mxu3 %v7028_v1 }
 0x511   :  { %2592 = vmatpush.bf16.msrb.mxu0 %v6965_v19  ;;  %2610 = vmatmul.bf16.vlgmr.msrb.gmra.mxu1 %v2416_v20 }
 0x512   :  { %2723 = vmatpush.bf16.msra.mxu1 %v7029_v31  ;;  %2749 = vmatpush.bf16.msrb.mxu3 %v4740_v22 }
 0x513   :  { %2618 = vmatpush.bf16.msra.mxu2 %v6966_v47  ;;  %2636 = vmatmul.bf16.vlgmr.msra.gmra.mxu3 %v2416_v20 }
 0x514   :  { %2478 = vmatmul.bf16.vlgmr.msra.gmra.mxu0 %v2416_v20  ;;  %2504 = vmatmul.bf16.vlgmr.msrb.gmra.mxu2 %v2416_v20 }
 0x515   :  { %2593 = vmatpush.bf16.msrb.mxu0 %v6969_v43 }
 0x516   :  { %2724 = vmatpush.bf16.msra.mxu1 %v4763_v33  ;;  %2750 = vmatpush.bf16.msrb.mxu3 %v4771_v41 }
 0x517   :  { %2619 = vmatpush.bf16.msra.mxu2 %v6970_v40 }
 0x519   :  { %2594 = vmatpush.bf16.msrb.mxu0 %v6973_v25 }
 0x51a   :  { %2725 = vmatpush.bf16.msra.mxu1 %v4787_v57  ;;  %2751 = vmatpush.bf16.msrb.mxu3 %v4797_v3 }
 0x51b   :  { %2620 = vmatpush.bf16.msra.mxu2 %v7311_v0 }
 0x51d   :  { %2595 = vmatpush.bf16.msrb.mxu0 %v7314_v26 }
 0x51e   :  { %2726 = vmatpush.bf16.msra.mxu1 %v7312_v59  ;;  %2752 = vmatpush.bf16.msrb.mxu3 %v7313_v10 }
 0x51f   :  { %2621 = vmatpush.bf16.msra.mxu2 %v7315_v17 }
 0x521   :  { %2596 = vmatpush.bf16.msrb.mxu0 %v7318_v5 }
 0x522   :  { %2727 = vmatpush.bf16.msra.mxu1 %v7316_v13  ;;  %2753 = vmatpush.bf16.msrb.mxu3 %v7317_v8  ;;  %v7376_v8 = vld [vmem:[#allocation30_spill] sm:$0xff] }
 0x523   :  { %2622 = vmatpush.bf16.msra.mxu2 %v7319_v2 }
 0x524   :  { %2597 = vmatmul.bf16.vlgmr.msrb.gmra.mxu0 %v2416_v20 }
 0x525   :  { %2710 = vmatpush.bf16.msra.mxu0 %v7320_v11  ;;  %v7375_v11 = vld [vmem:[#allocation16_spill] sm:$0xff] }
 0x526   :  { %2728 = vmatpush.bf16.msra.mxu1 %v7322_v30  ;;  %2754 = vmatpush.bf16.msrb.mxu3 %v7323_v9 }
 0x527   :  { %2736 = vmatpush.bf16.msrb.mxu2 %v7321_v36 }
 0x528   :  { %2623 = vmatmul.bf16.vlgmr.msra.gmra.mxu2 %v2416_v20  ;;  %v7335_v20 = vld [vmem:[#allocation74_spill] sm:$0xff] }
 0x529   :  { %2711 = vmatpush.bf16.msra.mxu0 %v7324_v28 }
 0x52a   :  { %2729 = vmatpush.bf16.msra.mxu1 %v7326_v34  ;;  %2755 = vmatpush.bf16.msrb.mxu3 %v7327_v39  ;;  %v7338_v39 = vld [vmem:[#allocation79_spill] sm:$0xff] }
 0x52b   :  { %2737 = vmatpush.bf16.msrb.mxu2 %v7325_v6 }
 0x52d   :  { %2712 = vmatpush.bf16.msra.mxu0 %v7328_v4  ;;  %v7339_v4 = vld [vmem:[#allocation80_spill] sm:$0xff] }
 0x52e   :  { %2730 = vmatpush.bf16.msra.mxu1 %v7330_v44  ;;  %2756 = vmatpush.bf16.msrb.mxu3 %v7331_v12  ;;  %v7341_v44 = vld [vmem:[#allocation64_spill] sm:$0xff]  ;;  %v7342_v12 = vld [vmem:[#allocation83_spill] sm:$0xff] }
 0x52f   :  { %2738 = vmatpush.bf16.msrb.mxu2 %v7329_v35  ;;  %v7340_v35 = vld [vmem:[#allocation61_spill] sm:$0xff] }
 0x531   :  { %2713 = vmatpush.bf16.msra.mxu0 %v7334_v56  ;;  %v7345_v56 = vld [vmem:[#allocation72_spill] sm:$0xff] }
 0x532   :  { %2775 = vmatpush.bf16.msrb.mxu1 %v7332_v16  ;;  %2801 = vmatpush.bf16.msra.mxu3 %v7333_v24  ;;  %v7343_v16 = vld [vmem:[#allocation84_spill] sm:$0xff]  ;;  %v7344_v24 = vld [vmem:[#allocation70_spill] sm:$0xff] }
 0x533   :  { %2739 = vmatpush.bf16.msrb.mxu2 %v7335_v20  ;;  %v7346_v20 = vld [vmem:[#allocation89_spill] sm:$0xff] }
 0x535   :  { %2714 = vmatpush.bf16.msra.mxu0 %v7338_v39  ;;  %v7349_v39 = vld [vmem:[#allocation76_spill] sm:$0xff] }
 0x536   :  { %2776 = vmatpush.bf16.msrb.mxu1 %v7336_v60  ;;  %2802 = vmatpush.bf16.msra.mxu3 %v7337_v18  ;;  %v7347_v60 = vld [vmem:[#allocation90_spill] sm:$0xff]  ;;  %v7348_v18 = vld [vmem:[#allocation75_spill] sm:$0xff] }
 0x537   :  { %2740 = vmatpush.bf16.msrb.mxu2 %v7339_v4  ;;  %v7350_v4 = vld [vmem:[#allocation93_spill] sm:$0xff] }
 0x539   :  { %2715 = vmatpush.bf16.msra.mxu0 %v7342_v12  ;;  %v7353_v12 = vld [vmem:[#allocation98_spill] sm:$0xff] }
 0x53a   :  { %2777 = vmatpush.bf16.msrb.mxu1 %v7340_v35  ;;  %2803 = vmatpush.bf16.msra.mxu3 %v7341_v44  ;;  %v7351_v35 = vld [vmem:[#allocation94_spill] sm:$0xff]  ;;  %v7352_v44 = vld [vmem:[#allocation97_spill] sm:$0xff] }
 0x53b   :  { %2741 = vmatpush.bf16.msrb.mxu2 %v7343_v16  ;;  %v7354_v16 = vld [vmem:[#allocation81_spill] sm:$0xff] }
 0x53d   :  { %2716 = vmatpush.bf16.msra.mxu0 %v7346_v20  ;;  %v7357_v20 = vld [vmem:[#allocation100_spill] sm:$0xff] }
 0x53e   :  { %2778 = vmatpush.bf16.msrb.mxu1 %v7344_v24  ;;  %2804 = vmatpush.bf16.msra.mxu3 %v7345_v56  ;;  %v7355_v24 = vld [vmem:[#allocation82_spill] sm:$0xff]  ;;  %v7356_v56 = vld [vmem:[#allocation99_spill] sm:$0xff] }
 0x53f   :  { %2742 = vmatpush.bf16.msrb.mxu2 %v7347_v60  ;;  %v7358_v60 = vld [vmem:[#allocation85_spill] sm:$0xff] }
 0x541   :  { %2717 = vmatpush.bf16.msra.mxu0 %v7350_v4  ;;  %v7361_v4 = vld [vmem:[#allocation103_spill] sm:$0xff] }
 0x542   :  { %2779 = vmatpush.bf16.msrb.mxu1 %v7348_v18  ;;  %2805 = vmatpush.bf16.msra.mxu3 %v7349_v39  ;;  %v7359_v18 = vld [vmem:[#allocation86_spill] sm:$0xff] }
 0x543   :  { %2743 = vmatpush.bf16.msrb.mxu2 %v7351_v35  ;;  %v7360_v39 = vld [vmem:[#allocation102_spill] sm:$0xff]  ;;  %v7362_v35 = vld [vmem:[#allocation91_spill] sm:$0xff] }
 0x545   :  { %2762 = vmatpush.bf16.msrb.mxu0 %v7352_v44  ;;  %v7363_v44 = vld [vmem:[#allocation92_spill] sm:$0xff] }
 0x546   :  { %2780 = vmatpush.bf16.msrb.mxu1 %v7354_v16  ;;  %2806 = vmatpush.bf16.msra.mxu3 %v7355_v24  ;;  %v7365_v16 = vld [vmem:[#allocation106_spill] sm:$0xff]  ;;  %v7366_v24 = vld [vmem:[#allocation109_spill] sm:$0xff] }
 0x547   :  { %2788 = vmatpush.bf16.msra.mxu2 %v7353_v12  ;;  %v7364_v12 = vld [vmem:[#allocation105_spill] sm:$0xff] }
 0x549   :  { %2763 = vmatpush.bf16.msrb.mxu0 %v7356_v56  ;;  %v7367_v56 = vld [vmem:[#allocation110_spill] sm:$0xff] }
 0x54a   :  { %2781 = vmatpush.bf16.msrb.mxu1 %v7358_v60  ;;  %2807 = vmatpush.bf16.msra.mxu3 %v7359_v18  ;;  %v7369_v60 = vld [vmem:[#allocation112_spill] sm:$0xff]  ;;  %v7370_v18 = vld [vmem:[#allocation113_spill] sm:$0xff] }
 0x54b   :  { %2789 = vmatpush.bf16.msra.mxu2 %v7357_v20  ;;  %v7368_v20 = vld [vmem:[#allocation111_spill] sm:$0xff] }
 0x54d   :  { %2764 = vmatpush.bf16.msrb.mxu0 %v7360_v39  ;;  %v7371_v39 = vld [vmem:[#allocation114_spill] sm:$0xff] }
 0x54e   :  { %2782 = vmatpush.bf16.msrb.mxu1 %v7362_v35  ;;  %2808 = vmatpush.bf16.msra.mxu3 %v7363_v44  ;;  %v7373_v35 = vld [vmem:[#allocation116_spill] sm:$0xff] }
 0x54f   :  { %2790 = vmatpush.bf16.msra.mxu2 %v7361_v4  ;;  %v7372_v4 = vld [vmem:[#allocation115_spill] sm:$0xff] }
 0x551   :  { %2765 = vmatpush.bf16.msrb.mxu0 %v7364_v12 }
 0x553   :  { %2791 = vmatpush.bf16.msra.mxu2 %v7365_v16 }
 0x555   :  { %2766 = vmatpush.bf16.msrb.mxu0 %v7366_v24 }
 0x557   :  { %2792 = vmatpush.bf16.msra.mxu2 %v7367_v56  ;;  %v7374_v56 = vld [vmem:[#allocation8_spill] sm:$0xff] }
 0x559   :  { %2767 = vmatpush.bf16.msrb.mxu0 %v7368_v20 }
 0x55b   :  { %2793 = vmatpush.bf16.msra.mxu2 %v7369_v60 }
 0x55d   :  { %2768 = vmatpush.bf16.msrb.mxu0 %v7370_v18 }
 0x55f   :  { %2794 = vmatpush.bf16.msra.mxu2 %v7371_v39 }
 0x561   :  { %2769 = vmatpush.bf16.msrb.mxu0 %v7372_v4 }
 0x563   :  { %2795 = vmatpush.bf16.msra.mxu2 %v7373_v35 }
 0x56e   :  { %v2440_v44 = vpop.f32.mrf.mxu1 }
 0x574   :  { %v2466_v12 = vpop.f32.mrf.mxu3 }
 0x576   :  { %v2442_v34 = vpop.f32.mrf.mxu1 }
 0x57c   :  { %v2468_v16 = vpop.f32.mrf.mxu3 }
 0x57e   :  { %v2492_v6 = vpop.f32.mrf.mxu1 }
 0x581   :  { %v2427_v24 = vpop.f32.mrf.mxu0 }
 0x582   :  { %v2441_v28 = vadd.f32 %v2440_v44, %v2427_v24 }
 0x584   :  { %v2522_v9 = vadd.f32 %v2441_v28, %v7374_v56  ;;  %v2518_v20 = vpop.f32.mrf.mxu3 }
 0x586   :  { %v3824_v30 = vmul.f32 -1.442695, %v2522_v9  ;;  %v2494_v60 = vpop.f32.mrf.mxu1 }
 0x587   :  { %v2453_v36 = vpop.f32.mrf.mxu2 }
 0x588   :  { %4211 = vpow2.f32 %v3824_v30  ;;  %v2467_v18 = vadd.f32 %v2466_v12, %v2453_v36 }
 0x589   :  { %v2429_v39 = vpop.f32.mrf.mxu0 }
 0x58a   :  { %v2523_v4 = vadd.f32 %v2467_v18, %v7375_v11 }
 0x58c   :  { %v3825_v2 = vmul.f32 -1.442695, %v2523_v4  ;;  %v2520_v35 = vpop.f32.mrf.mxu3 }
 0x58d   :  { %v7377_v35 = vld [vmem:[#allocation104_spill] sm:$0xff] }
 0x58e   :  { %v4212_v5 = vpop.eup %4211  ;;  %4213 = vpow2.f32 %v3825_v2  ;;  %v2611_v34 = vpop.f32.mrf.mxu1 }
 0x58f   :  { %v6354_v16 = vadd.f32 1.0, %v4212_v5  ;;  %v2642_v44 = vadd.f32 %v2611_v34, %v7376_v8  ;;  %v2455_v24 = vpop.f32.mrf.mxu2 }
 0x591   :  { %4215 = vrcp.f32 %v6354_v16  ;;  %v3828_v9 = vmul.f32 -1.442695, %v2642_v44  ;;  %v2479_v60 = vpop.f32.mrf.mxu0  ;;  %vm2535_vm7 = vweird.f32 %v6354_v16 }
 0x592   :  { %v2493_v44 = vadd.f32 %v2492_v6, %v2479_v60 }
 0x593   :  { %4217 = vpow2.f32 %v3828_v9 }
 0x594   :  { %v4214_v28 = vpop.eup %4213 }
 0x595   :  { %v2548_v36 = vadd.f32 1.0, %v4214_v28 }
 0x596   :  { %v2637_v30 = vpop.f32.mrf.mxu3  ;;  %v2613_v39 = vpop.f32.mrf.mxu1 }
 0x597   :  { %v4216_v18 = vpop.eup %4215  ;;  %4219 = vrcp.f32 %v2548_v36  ;;  %v2505_v4 = vpop.f32.mrf.mxu2  ;;  %v2644_v5 = vadd.f32 %v2637_v30, %v7377_v35  ;;  %v2524_v30 = vadd.f32 %v2493_v44, %v7079_v37  ;;  %vm2554_vm8 = vweird.f32 %v2548_v36 }
 0x598   :  { %v2531_v2 = vmul.f32 %v4216_v18, %v6354_v16  ;;  %v2519_v12 = vadd.f32 %v2518_v20, %v2505_v4  ;;  %vm2536_vm5 = vweird.f32 %v4216_v18  ;;  %v2558_v20 = vand.u32 2147483647, %v2548_v36 }
 0x599   :  { %v2481_v11 = vpop.f32.mrf.mxu0  ;;  %v4218_v8 = vpop.eup %4217  ;;  %v3829_v56 = vmul.f32 -1.442695, %v2644_v5  ;;  %v2541_v5 = vand.u32 2147483648, %v6354_v16  ;;  %vm6368_vm9 = vmor %vm2535_vm7, %vm2536_vm5 }
 0x59a   :  { %v2532_v34 = vsub.f32 1.0, %v2531_v2  ;;  %v2525_v24 = vadd.f32 %v2519_v12, %v7078_v14  ;;  %v6361_v9 = vadd.f32 1.0, %v4218_v8  ;;  %v2560_v11 = vand.u32 2147483648, %v2548_v36  ;;  %v7378_v2 = vld [vmem:[#allocation29_spill] sm:$0xff] }
 0x59b   :  { %vm2559_vm11 = vcmp.eq.f32.partialorder %v2558_v20, 8.507059e+37 }
 0x59c   :  { %v3826_v28 = vmul.f32 -1.442695, %v2525_v24  ;;  %v2533_v26 = vmul.f32 %v4216_v18, %v2532_v34  ;;  %vm2673_vm2 = vweird.f32 %v6361_v9 }
 0x59d   :  { %v4220_v13 = vpop.eup %4219 }
 0x59e   :  { %v2639_v39 = vpop.f32.mrf.mxu3  ;;  %v2550_v17 = vmul.f32 %v4220_v13, %v2548_v36  ;;  %4221 = vpow2.f32 %v3826_v28  ;;  %vm2555_vm6 = vweird.f32 %v4220_v13  ;;  %v2534_v4 = vadd.f32 %v4216_v18, %v2533_v26 }
 0x59f   :  { %v2507_v10 = vpop.f32.mrf.mxu2  ;;  %4223 = vpow2.f32 %v3829_v56  ;;  %vm2556_vm10 = vmor %vm2554_vm8, %vm2555_vm6  ;;  %v2542_v28 = vor.u32 1.1754944e-38, %v2541_v5 }
 0x5a0   :  { %v2551_v59 = vsub.f32 1.0, %v2550_v17  ;;  %4225 = vrcp.f32 %v6361_v9  ;;  %v2539_v17 = vand.u32 2147483647, %v6354_v16  ;;  %v2538_v34 = vsel %vm6368_vm9, %v4216_v18, %v2534_v4 }
 0x5a1   :  { %v2598_v6 = vpop.f32.mrf.mxu0  ;;  %4227 = vtanh.f32 %v2524_v30 }
 0x5a2   :  { %v2552_v60 = vmul.f32 %v4220_v13, %v2551_v59  ;;  %v2641_v35 = vadd.f32 %v2598_v6, %v7378_v2  ;;  %v2561_v59 = vor.u32 1.1754944e-38, %v2560_v11  ;;  %vm2540_vm12 = vcmp.eq.f32.partialorder %v2539_v17, 8.507059e+37 }
 0x5a3   :  { %v2543_v6 = vsel %vm2540_vm12, %v2542_v28, %v2538_v34 }
 0x5a4   :  { %v2553_v56 = vadd.f32 %v4220_v13, %v2552_v60  ;;  %v3827_v12 = vmul.f32 -1.442695, %v2641_v35  ;;  %v4222_v8 = vpop.eup %4221 }
 0x5a5   :  { %v4224_v26 = vpop.eup %4223  ;;  %v2568_v44 = vadd.f32 1.0, %v4222_v8 }
 0x5a6   :  { %v2557_v24 = vsel %vm2556_vm10, %v4220_v13, %v2553_v56  ;;  %v6375_v36 = vpop.eup %4225  ;;  %4229 = vpow2.f32 %v3827_v12  ;;  %v6380_v18 = vadd.f32 1.0, %v4224_v26 }
 0x5a7   :  { %v2562_v39 = vsel %vm2559_vm11, %v2561_v59, %v2557_v24  ;;  %4231 = vrcp.f32 %v2568_v44  ;;  %v2669_v30 = vmul.f32 %v6375_v36, %v6361_v9  ;;  %v4228_v2 = vpop.eup %4227  ;;  %v2578_v26 = vand.u32 2147483647, %v2568_v44 }
 0x5a8   :  { %v2584_v11 = vmul.f32 %v2562_v39, %v6222_v52  ;;  %v2585_v13 = vmul.f32 %v4228_v2, %v2543_v6  ;;  %4233 = vrcp.f32 %v6380_v18  ;;  %v2580_v52 = vand.u32 2147483648, %v2568_v44  ;;  %v7381_v39 = vld [vmem:[#allocation101_spill] sm:$0xff] }
 0x5a9   :  { %v2600_v60 = vpop.f32.mrf.mxu0  ;;  %v2670_v35 = vsub.f32 1.0, %v2669_v30  ;;  %vm2574_vm14 = vweird.f32 %v2568_v44  ;;  %vm2674_vm15 = vweird.f32 %v6375_v36  ;;  %vm2579_vm1 = vcmp.eq.f32.partialorder %v2578_v26, 8.507059e+37 }
 0x5aa   :  { %v6382_v5 = vadd.f32 %v2585_v13, %v2584_v11  ;;  %v2581_v30 = vor.u32 1.1754944e-38, %v2580_v52  ;;  %vm6396_vm3 = vmor %vm2673_vm2, %vm2674_vm15  ;;  %vm2693_vm10 = vweird.f32 %v6380_v18 }
 0x5ab   :  { %v2624_v16 = vpop.f32.mrf.mxu2  ;;  %v2671_v8 = vmul.f32 %v6375_v36, %v2670_v35 }
 0x5ac   :  { %v4230_v20 = vpop.eup %4229  ;;  %v2643_v6 = vadd.f32 %v2624_v16, %v7381_v39 }
 0x5ad   :  { %v4232_v4 = vpop.eup %4231  ;;  %v2648_v10 = vadd.f32 1.0, %v4230_v20  ;;  %v2672_v60 = vadd.f32 %v6375_v36, %v2671_v8  ;;  %v2679_v20 = vand.u32 2147483648, %v6361_v9 }
 0x5ae   :  { %v2570_v17 = vmul.f32 %v4232_v4, %v2568_v44  ;;  %vm2575_vm13 = vweird.f32 %v4232_v4  ;;  %v6387_v34 = vpop.eup %4233 }
 0x5af   :  { %4235 = vrcp.f32 %v2648_v10  ;;  %vm2576_vm0 = vmor %vm2574_vm14, %vm2575_vm13  ;;  %v2689_v44 = vmul.f32 %v6387_v34, %v6380_v18  ;;  %v2660_v8 = vand.u32 2147483648, %v2648_v10  ;;  %vm2654_vm5 = vweird.f32 %v2648_v10 }
 0x5b0   :  { %v2571_v12 = vsub.f32 1.0, %v2570_v17  ;;  %4237 = vtanh.f32 %v6382_v5  ;;  %vm2694_vm9 = vweird.f32 %v6387_v34 }
 0x5b1   :  { %4239 = vtanh.f32 %v2643_v6  ;;  %v2690_v39 = vsub.f32 1.0, %v2689_v44  ;;  %vm2695_vm11 = vmor %vm2693_vm10, %vm2694_vm9 }
 0x5b2   :  { %v2572_v59 = vmul.f32 %v4232_v4, %v2571_v12 }
 0x5b3   :  { %v2626_v56 = vpop.f32.mrf.mxu2 }
 0x5b4   :  { %v2573_v24 = vadd.f32 %v4232_v4, %v2572_v59  ;;  %v2677_v56 = vand.u32 2147483647, %v6361_v9  ;;  %v2658_v59 = vand.u32 2147483647, %v2648_v10  ;;  %v2661_v9 = vor.u32 1.1754944e-38, %v2660_v8  ;;  %v7419_v8 = vld [vmem:[#allocation90_spill] sm:$0xff] }
 0x5b5   :  { %v4236_v28 = vpop.eup %4235 }
 0x5b6   :  { %v2650_v11 = vmul.f32 %v4236_v28, %v2648_v10  ;;  %v2577_v2 = vsel %vm2576_vm0, %v4232_v4, %v2573_v24  ;;  %v4238_v13 = vpop.eup %4237  ;;  %v2676_v4 = vsel %vm6396_vm3, %v6375_v36, %v2672_v60  ;;  %vm2655_vm4 = vweird.f32 %v4236_v28 }
 0x5b7   :  { %v2582_v35 = vsel %vm2579_vm1, %v2581_v30, %v2577_v2  ;;  %v2680_v24 = vor.u32 1.1754944e-38, %v2679_v20  ;;  %vm2678_vm6 = vcmp.eq.f32.partialorder %v2677_v56, 8.507059e+37  ;;  %vm2656_vm7 = vmor %vm2654_vm5, %vm2655_vm4  ;;  %vm2659_vm8 = vcmp.eq.f32.partialorder %v2658_v59, 8.507059e+37  ;;  %v4240_v6 = vpop.eup %4239  ;;  %v7417_v56 = vld [vmem:[#allocation72_spill] sm:$0xff]  ;;  %v7422_v59 = vld [vmem:[#allocation93_spill] sm:$0xff] }
 0x5b8   :  { %v2651_v16 = vsub.f32 1.0, %v2650_v11  ;;  %v2588_v12 = vmul.f32 %v4238_v13, %v2582_v35  ;;  %v2691_v60 = vmul.f32 %v6387_v34, %v2690_v39  ;;  %v7425_v39 = vld [vmem:[#allocation98_spill] sm:$0xff] }
 0x5b9   :  { %v2681_v11 = vsel %vm2678_vm6, %v2680_v24, %v2676_v4  ;;  %v7420_v4 = vld [vmem:[#allocation75_spill] sm:$0xff]  ;;  %v7424_v24 = vld [vmem:[#allocation97_spill] sm:$0xff] }
 0x5ba   :  { %v2652_v52 = vmul.f32 %v4236_v28, %v2651_v16  ;;  %v2709_v26 = vpack.c.bf16 %v2588_v12, %v2588_v12  ;;  %v2703_v13 = vmul.f32 %v2681_v11, %v6251_v50  ;;  %v2692_v44 = vadd.f32 %v6387_v34, %v2691_v60  ;;  %v7416_v16 = vld [vmem:[#allocation70_spill] sm:$0xff]  ;;  %v7418_v12 = vld [vmem:[#allocation89_spill] sm:$0xff]  ;;  %v7428_v11 = vld [vmem:[#allocation99_spill] sm:$0xff] }
 0x5bb   :  { %v7431_v60 = vld [vmem:[#allocation86_spill] sm:$0xff] }
 0x5bc   :  { %v2653_v30 = vadd.f32 %v4236_v28, %v2652_v52  ;;  %2731 = vmatmul.bf16.vlgmr.msra.gmra.mxu1 %v2709_v26  ;;  %2757 = vmatmul.bf16.vlgmr.msrb.gmra.mxu3 %v2709_v26  ;;  %v7421_v52 = vld [vmem:[#allocation76_spill] sm:$0xff] }
 0x5bd   :  { %2894 = vmatpush.bf16.msra.mxu1 %v7015_v23  ;;  %2920 = vmatpush.bf16.msrb.mxu3 %v7016_v21  ;;  %v2699_v23 = vand.u32 2147483648, %v6380_v18  ;;  %v2697_v21 = vand.u32 2147483647, %v6380_v18  ;;  %v7414_v18 = vld [vmem:[#allocation83_spill] sm:$0xff] }
 0x5be   :  { %v2657_v36 = vsel %vm2656_vm7, %v4236_v28, %v2653_v30  ;;  %v7426_v30 = vld [vmem:[#allocation81_spill] sm:$0xff] }
 0x5bf   :  { %v2662_v2 = vsel %vm2659_vm8, %v2661_v9, %v2657_v36  ;;  %vm2698_vm12 = vcmp.eq.f32.partialorder %v2697_v21, 8.507059e+37  ;;  %v7427_v9 = vld [vmem:[#allocation82_spill] sm:$0xff]  ;;  %v7429_v36 = vld [vmem:[#allocation100_spill] sm:$0xff] }
 0x5c0   :  { %v2704_v20 = vmul.f32 %v4240_v6, %v2662_v2  ;;  %v7430_v6 = vld [vmem:[#allocation85_spill] sm:$0xff]  ;;  %v7432_v2 = vld [vmem:[#allocation102_spill] sm:$0xff] }
 0x5c1   :  { %2895 = vmatpush.bf16.msra.mxu1 %v7017_v32  ;;  %2921 = vmatpush.bf16.msrb.mxu3 %v7018_v62  ;;  %v2696_v32 = vsel %vm2695_vm11, %v6387_v34, %v2692_v44  ;;  %v2700_v62 = vor.u32 1.1754944e-38, %v2699_v23  ;;  %v7415_v34 = vld [vmem:[#allocation84_spill] sm:$0xff]  ;;  %v7436_v23 = vld [vmem:[#allocation105_spill] sm:$0xff]  ;;  %v7437_v21 = vld [vmem:[#allocation106_spill] sm:$0xff] }
 0x5c2   :  { %v6410_v10 = vadd.f32 %v2704_v20, %v2703_v13  ;;  %v7433_v13 = vld [vmem:[#allocation103_spill] sm:$0xff]  ;;  %v7435_v44 = vld [vmem:[#allocation92_spill] sm:$0xff] }
 0x5c3   :  { %v2701_v28 = vsel %vm2698_vm12, %v2700_v62, %v2696_v32  ;;  %v7434_v20 = vld [vmem:[#allocation91_spill] sm:$0xff]  ;;  %v7438_v32 = vld [vmem:[#allocation109_spill] sm:$0xff]  ;;  %v7439_v62 = vld [vmem:[#allocation110_spill] sm:$0xff] }
 0x5c4   :  { %4241 = vtanh.f32 %v6410_v10 }
 0x5c5   :  { %2896 = vmatpush.bf16.msra.mxu1 %v7019_v45  ;;  %2922 = vmatpush.bf16.msrb.mxu3 %v7020_v48  ;;  %v7402_v45 = vld [vmem:[#allocation47_spill] sm:$0xff]  ;;  %v7403_v48 = vld [vmem:[#allocation48_spill] sm:$0xff] }
 0x5c9   :  { %2897 = vmatpush.bf16.msra.mxu1 %v7021_v27  ;;  %2923 = vmatpush.bf16.msrb.mxu3 %v7022_v63  ;;  %v7404_v27 = vld [vmem:[#allocation49_spill] sm:$0xff]  ;;  %v7405_v63 = vld [vmem:[#allocation50_spill] sm:$0xff] }
 0x5ca   :  { %v4242_v50 = vpop.eup %4241 }
 0x5cb   :  { %v2707_v35 = vmul.f32 %v4242_v50, %v2701_v28  ;;  %v7440_v50 = vld [vmem:[#allocation111_spill] sm:$0xff]  ;;  %v7441_v28 = vld [vmem:[#allocation112_spill] sm:$0xff] }
 0x5cc   :  { %2783 = vmatmul.bf16.vlgmr.msrb.gmra.mxu1 %v2709_v26  ;;  %2809 = vmatmul.bf16.vlgmr.msra.gmra.mxu3 %v2709_v26  ;;  %v7423_v26 = vld [vmem:[#allocation94_spill] sm:$0xff] }
 0x5cd   :  { %v2708_v17 = vpack.c.bf16 %v2707_v35, %v2707_v35  ;;  %2898 = vmatpush.bf16.msra.mxu1 %v7023_v15  ;;  %2924 = vmatpush.bf16.msrb.mxu3 %v7024_v55  ;;  %v7406_v15 = vld [vmem:[#allocation73_spill] sm:$0xff]  ;;  %v7407_v55 = vld [vmem:[#allocation74_spill] sm:$0xff] }
 0x5ce   :  { %v7442_v35 = vld [vmem:[#allocation113_spill] sm:$0xff] }
 0x5cf   :  { %2718 = vmatmul.bf16.vlgmr.msra.gmra.mxu0 %v2708_v17  ;;  %2744 = vmatmul.bf16.vlgmr.msrb.gmra.mxu2 %v2708_v17 }
 0x5d0   :  { %2881 = vmatpush.bf16.msra.mxu0 %v4421_v29  ;;  %2907 = vmatpush.bf16.msrb.mxu2 %v4480_v49  ;;  %v7384_v29 = vld [vmem:[#allocation33_spill] sm:$0xff]  ;;  %v7386_v49 = vld [vmem:[#allocation18_spill] sm:$0xff] }
 0x5d1   :  { %2899 = vmatpush.bf16.msra.mxu1 %v7025_v54  ;;  %2925 = vmatpush.bf16.msrb.mxu3 %v7026_v46  ;;  %v7408_v54 = vld [vmem:[#allocation55_spill] sm:$0xff]  ;;  %v7409_v46 = vld [vmem:[#allocation57_spill] sm:$0xff] }
 0x5d4   :  { %2882 = vmatpush.bf16.msra.mxu0 %v4461_v42  ;;  %2908 = vmatpush.bf16.msrb.mxu2 %v4516_v61  ;;  %v7385_v42 = vld [vmem:[#allocation34_spill] sm:$0xff]  ;;  %v7388_v61 = vld [vmem:[#allocation37_spill] sm:$0xff] }
 0x5d5   :  { %2900 = vmatpush.bf16.msra.mxu1 %v7027_v38  ;;  %2926 = vmatpush.bf16.msrb.mxu3 %v4682_v58  ;;  %v7391_v58 = vld [vmem:[#allocation25_spill] sm:$0xff]  ;;  %v7410_v38 = vld [vmem:[#allocation79_spill] sm:$0xff] }
 0x5d8   :  { %2883 = vmatpush.bf16.msra.mxu0 %v4494_v53  ;;  %2909 = vmatpush.bf16.msrb.mxu2 %v4546_v7  ;;  %v7387_v53 = vld [vmem:[#allocation24_spill] sm:$0xff]  ;;  %v7389_v7 = vld [vmem:[#allocation38_spill] sm:$0xff] }
 0x5d9   :  { %2901 = vmatpush.bf16.msra.mxu1 %v4661_v51  ;;  %2927 = vmatpush.bf16.msrb.mxu3 %v7028_v1  ;;  %v7390_v51 = vld [vmem:[#allocation21_spill] sm:$0xff]  ;;  %v7411_v1 = vld [vmem:[#allocation80_spill] sm:$0xff] }
 0x5dc   :  { %2884 = vmatpush.bf16.msra.mxu0 %v6965_v19  ;;  %2902 = vmatmul.bf16.vlgmr.msra.gmra.mxu1 %v2708_v17  ;;  %v7397_v19 = vld [vmem:[#allocation60_spill] sm:$0xff] }
 0x5dd   :  { %3015 = vmatpush.bf16.msrb.mxu1 %v7029_v31  ;;  %3041 = vmatpush.bf16.msra.mxu3 %v4740_v22  ;;  %v7392_v22 = vld [vmem:[#allocation53_spill] sm:$0xff] }
 0x5de   :  { %2910 = vmatpush.bf16.msrb.mxu2 %v6966_v47  ;;  %2928 = vmatmul.bf16.vlgmr.msrb.gmra.mxu3 %v2708_v17  ;;  %v7398_v47 = vld [vmem:[#allocation43_spill] sm:$0xff]  ;;  %v7412_v31 = vld [vmem:[#allocation61_spill] sm:$0xff] }
 0x5df   :  { %2770 = vmatmul.bf16.vlgmr.msrb.gmra.mxu0 %v2708_v17  ;;  %2796 = vmatmul.bf16.vlgmr.msra.gmra.mxu2 %v2708_v17 }
 0x5e0   :  { %2885 = vmatpush.bf16.msra.mxu0 %v6969_v43  ;;  %v7399_v43 = vld [vmem:[#allocation45_spill] sm:$0xff] }
 0x5e1   :  { %3016 = vmatpush.bf16.msrb.mxu1 %v4763_v33  ;;  %3042 = vmatpush.bf16.msra.mxu3 %v4771_v41  ;;  %v7393_v33 = vld [vmem:[#allocation54_spill] sm:$0xff]  ;;  %v7394_v41 = vld [vmem:[#allocation41_spill] sm:$0xff] }
 0x5e2   :  { %2911 = vmatpush.bf16.msrb.mxu2 %v6970_v40  ;;  %v7400_v40 = vld [vmem:[#allocation66_spill] sm:$0xff] }
 0x5e4   :  { %2886 = vmatpush.bf16.msra.mxu0 %v6973_v25  ;;  %v7401_v25 = vld [vmem:[#allocation69_spill] sm:$0xff] }
 0x5e5   :  { %3017 = vmatpush.bf16.msrb.mxu1 %v4787_v57  ;;  %3043 = vmatpush.bf16.msra.mxu3 %v4797_v3  ;;  %v7395_v57 = vld [vmem:[#allocation42_spill] sm:$0xff]  ;;  %v7396_v3 = vld [vmem:[#allocation59_spill] sm:$0xff] }
 0x5e6   :  { %2912 = vmatpush.bf16.msrb.mxu2 %v7311_v0  ;;  %v7413_v0 = vld [vmem:[#allocation64_spill] sm:$0xff] }
 0x5e8   :  { %2887 = vmatpush.bf16.msra.mxu0 %v7386_v49 }
 0x5e9   :  { %3018 = vmatpush.bf16.msrb.mxu1 %v7384_v29  ;;  %3044 = vmatpush.bf16.msra.mxu3 %v7385_v42  ;;  %v7444_v29 = vld [vmem:[#allocation115_spill] sm:$0xff]  ;;  %v7445_v42 = vld [vmem:[#allocation116_spill] sm:$0xff] }
 0x5ea   :  { %2913 = vmatpush.bf16.msrb.mxu2 %v7387_v53 }
 0x5ec   :  { %2888 = vmatpush.bf16.msra.mxu0 %v7390_v51 }
 0x5ed   :  { %3019 = vmatpush.bf16.msrb.mxu1 %v7388_v61  ;;  %3045 = vmatpush.bf16.msra.mxu3 %v7389_v7 }
 0x5ee   :  { %2914 = vmatpush.bf16.msrb.mxu2 %v7391_v58 }
 0x5ef   :  { %2889 = vmatmul.bf16.vlgmr.msra.gmra.mxu0 %v2708_v17 }
 0x5f0   :  { %3002 = vmatpush.bf16.msrb.mxu0 %v7392_v22 }
 0x5f1   :  { %3020 = vmatpush.bf16.msrb.mxu1 %v7394_v41  ;;  %3046 = vmatpush.bf16.msra.mxu3 %v7395_v57 }
 0x5f2   :  { %3028 = vmatpush.bf16.msra.mxu2 %v7393_v33  ;;  %v7446_v33 = vld [vmem:[#allocation8_spill] sm:$0xff] }
 0x5f3   :  { %2915 = vmatmul.bf16.vlgmr.msrb.gmra.mxu2 %v2708_v17  ;;  %v7443_v17 = vld [vmem:[#allocation114_spill] sm:$0xff] }
 0x5f4   :  { %3003 = vmatpush.bf16.msrb.mxu0 %v7396_v3 }
 0x5f5   :  { %3021 = vmatpush.bf16.msrb.mxu1 %v7398_v47  ;;  %3047 = vmatpush.bf16.msra.mxu3 %v7399_v43 }
 0x5f6   :  { %3029 = vmatpush.bf16.msra.mxu2 %v7397_v19 }
 0x5f8   :  { %3004 = vmatpush.bf16.msrb.mxu0 %v7400_v40 }
 0x5f9   :  { %3022 = vmatpush.bf16.msrb.mxu1 %v7402_v45  ;;  %3048 = vmatpush.bf16.msra.mxu3 %v7403_v48 }
 0x5fa   :  { %3030 = vmatpush.bf16.msra.mxu2 %v7401_v25  ;;  %v7447_v25 = vld [vmem:[#allocation16_spill] sm:$0xff] }
 0x5fc   :  { %3005 = vmatpush.bf16.msrb.mxu0 %v7406_v15  ;;  %v7449_v15 = vld [vmem:[#allocation36_spill] sm:$0xff] }
 0x5fd   :  { %3067 = vmatpush.bf16.msra.mxu1 %v7404_v27  ;;  %3093 = vmatpush.bf16.msrb.mxu3 %v7405_v63  ;;  %v7448_v63 = vld [vmem:[#allocation28_spill] sm:$0xff] }
 0x5fe   :  { %3031 = vmatpush.bf16.msra.mxu2 %v7407_v55  ;;  %v191_v55 = vadd.f32 %v7449_v15, %v7448_v63 }
 0x600   :  { %3006 = vmatpush.bf16.msrb.mxu0 %v7410_v38 }
 0x601   :  { %3068 = vmatpush.bf16.msra.mxu1 %v7408_v54  ;;  %3094 = vmatpush.bf16.msrb.mxu3 %v7409_v46 }
 0x602   :  { %3032 = vmatpush.bf16.msra.mxu2 %v7411_v1 }
 0x604   :  { %3007 = vmatpush.bf16.msrb.mxu0 %v7414_v18 }
 0x605   :  { %3069 = vmatpush.bf16.msra.mxu1 %v7412_v31  ;;  %3095 = vmatpush.bf16.msrb.mxu3 %v7413_v0 }
 0x606   :  { %3033 = vmatpush.bf16.msra.mxu2 %v7415_v34 }
 0x608   :  { %3008 = vmatpush.bf16.msrb.mxu0 %v7418_v12  ;;  %v7450_v12 = vld [vmem:[#allocation63_spill] sm:$0xff] }
 0x609   :  { %3070 = vmatpush.bf16.msra.mxu1 %v7416_v16  ;;  %3096 = vmatpush.bf16.msrb.mxu3 %v7417_v56 }
 0x60a   :  { %3034 = vmatpush.bf16.msra.mxu2 %v7419_v8  ;;  %v7451_v8 = vld [vmem:[#allocation108_spill] sm:$0xff] }
 0x60c   :  { %3009 = vmatpush.bf16.msrb.mxu0 %v7422_v59 }
 0x60d   :  { %3071 = vmatpush.bf16.msra.mxu1 %v7420_v4  ;;  %3097 = vmatpush.bf16.msrb.mxu3 %v7421_v52  ;;  %v249_v4 = vadd.f32 %v7451_v8, %v7450_v12 }
 0x60e   :  { %3035 = vmatpush.bf16.msra.mxu2 %v7423_v26 }
 0x610   :  { %3054 = vmatpush.bf16.msra.mxu0 %v7424_v24 }
 0x611   :  { %3072 = vmatpush.bf16.msra.mxu1 %v7426_v30  ;;  %3098 = vmatpush.bf16.msrb.mxu3 %v7427_v9 }
 0x612   :  { %3080 = vmatpush.bf16.msrb.mxu2 %v7425_v39 }
 0x614   :  { %3055 = vmatpush.bf16.msra.mxu0 %v7428_v11 }
 0x615   :  { %3073 = vmatpush.bf16.msra.mxu1 %v7430_v6  ;;  %3099 = vmatpush.bf16.msrb.mxu3 %v7431_v60 }
 0x616   :  { %3081 = vmatpush.bf16.msrb.mxu2 %v7429_v36 }
 0x618   :  { %3056 = vmatpush.bf16.msra.mxu0 %v7432_v2 }
 0x619   :  { %3074 = vmatpush.bf16.msra.mxu1 %v7434_v20  ;;  %3100 = vmatpush.bf16.msrb.mxu3 %v7435_v44 }
 0x61a   :  { %3082 = vmatpush.bf16.msrb.mxu2 %v7433_v13 }
 0x61c   :  { %3057 = vmatpush.bf16.msra.mxu0 %v7436_v23 }
 0x61e   :  { %3083 = vmatpush.bf16.msrb.mxu2 %v7437_v21 }
 0x620   :  { %3058 = vmatpush.bf16.msra.mxu0 %v7438_v32 }
 0x622   :  { %3084 = vmatpush.bf16.msrb.mxu2 %v7439_v62 }
 0x624   :  { %3059 = vmatpush.bf16.msra.mxu0 %v7440_v50  ;;  %v7452_v50 = vld [vmem:[#allocation27_spill] sm:$0xff] }
 0x626   :  { %3085 = vmatpush.bf16.msrb.mxu2 %v7441_v28  ;;  %v7453_v28 = vld [vmem:[#allocation35_spill] sm:$0xff] }
 0x628   :  { %3060 = vmatpush.bf16.msra.mxu0 %v7442_v35  ;;  %v162_v35 = vadd.f32 %v7453_v28, %v7452_v50 }
 0x62a   :  { %3086 = vmatpush.bf16.msrb.mxu2 %v7443_v17 }
 0x62c   :  { %3061 = vmatpush.bf16.msra.mxu0 %v7444_v29 }
 0x62e   :  { %3087 = vmatpush.bf16.msrb.mxu2 %v7445_v42 }
 0x639   :  { %v2732_v49 = vpop.f32.mrf.mxu1 }
 0x63f   :  { %v2758_v53 = vpop.f32.mrf.mxu3 }
 0x641   :  { %v2734_v61 = vpop.f32.mrf.mxu1 }
 0x647   :  { %v2760_v7 = vpop.f32.mrf.mxu3 }
 0x649   :  { %v2784_v51 = vpop.f32.mrf.mxu1 }
 0x64c   :  { %v2719_v58 = vpop.f32.mrf.mxu0 }
 0x64d   :  { %v2733_v22 = vadd.f32 %v2732_v49, %v2719_v58 }
 0x64f   :  { %v2814_v41 = vadd.f32 %v2733_v22, %v7446_v33  ;;  %v2810_v57 = vpop.f32.mrf.mxu3 }
 0x651   :  { %v3830_v3 = vmul.f32 -1.442695, %v2814_v41  ;;  %v2786_v19 = vpop.f32.mrf.mxu1 }
 0x652   :  { %v2745_v47 = vpop.f32.mrf.mxu2 }
 0x653   :  { %4243 = vpow2.f32 %v3830_v3  ;;  %v2759_v43 = vadd.f32 %v2758_v53, %v2745_v47 }
 0x654   :  { %v2721_v40 = vpop.f32.mrf.mxu0 }
 0x655   :  { %v2815_v45 = vadd.f32 %v2759_v43, %v7447_v25 }
 0x657   :  { %v3831_v48 = vmul.f32 -1.442695, %v2815_v45  ;;  %v2812_v27 = vpop.f32.mrf.mxu3 }
 0x659   :  { %v4244_v54 = vpop.eup %4243  ;;  %4245 = vpow2.f32 %v3831_v48  ;;  %v2903_v46 = vpop.f32.mrf.mxu1 }
 0x65a   :  { %v6515_v38 = vadd.f32 1.0, %v4244_v54  ;;  %v2934_v1 = vadd.f32 %v2903_v46, %v191_v55  ;;  %v2747_v31 = vpop.f32.mrf.mxu2 }
 0x65c   :  { %4247 = vrcp.f32 %v6515_v38  ;;  %v3834_v0 = vmul.f32 -1.442695, %v2934_v1  ;;  %v2771_v18 = vpop.f32.mrf.mxu0  ;;  %vm2827_vm15 = vweird.f32 %v6515_v38  ;;  %v2833_v58 = vand.u32 2147483648, %v6515_v38 }
 0x65d   :  { %v2785_v60 = vadd.f32 %v2784_v51, %v2771_v18  ;;  %v2831_v41 = vand.u32 2147483647, %v6515_v38 }
 0x65e   :  { %4249 = vpow2.f32 %v3834_v0  ;;  %v2834_v63 = vor.u32 1.1754944e-38, %v2833_v58 }
 0x65f   :  { %v4246_v34 = vpop.eup %4245  ;;  %v2816_v29 = vadd.f32 %v2785_v60, %v7079_v37  ;;  %vm2832_vm4 = vcmp.eq.f32.partialorder %v2831_v41, 8.507059e+37 }
 0x660   :  { %v2840_v16 = vadd.f32 1.0, %v4246_v34 }
 0x661   :  { %v2929_v56 = vpop.f32.mrf.mxu3  ;;  %v2905_v52 = vpop.f32.mrf.mxu1 }
 0x662   :  { %v4248_v59 = vpop.eup %4247  ;;  %4251 = vrcp.f32 %v2840_v16  ;;  %v2797_v26 = vpop.f32.mrf.mxu2  ;;  %v2936_v39 = vadd.f32 %v2929_v56, %v249_v4  ;;  %v2852_v42 = vand.u32 2147483648, %v2840_v16  ;;  %v2850_v49 = vand.u32 2147483647, %v2840_v16 }
 0x663   :  { %v2823_v24 = vmul.f32 %v4248_v59, %v6515_v38  ;;  %v2811_v30 = vadd.f32 %v2810_v57, %v2797_v26  ;;  %vm2828_vm13 = vweird.f32 %v4248_v59  ;;  %vm2846_vm0 = vweird.f32 %v2840_v16 }
 0x664   :  { %v2773_v9 = vpop.f32.mrf.mxu0  ;;  %v4250_v11 = vpop.eup %4249  ;;  %v3835_v2 = vmul.f32 -1.442695, %v2936_v39  ;;  %vm6530_vm1 = vmor %vm2827_vm15, %vm2828_vm13  ;;  %v2853_v47 = vor.u32 1.1754944e-38, %v2852_v42  ;;  %vm2851_vm3 = vcmp.eq.f32.partialorder %v2850_v49, 8.507059e+37  ;;  %v7457_v39 = vld [vmem:[#allocation107_spill] sm:$0xff] }
 0x665   :  { %v2824_v36 = vsub.f32 1.0, %v2823_v24  ;;  %v2817_v6 = vadd.f32 %v2811_v30, %v7078_v14  ;;  %v6522_v20 = vadd.f32 1.0, %v4250_v11  ;;  %v7456_v24 = vld [vmem:[#allocation62_spill] sm:$0xff] }
 0x666   :  { %v220_v30 = vadd.f32 %v7457_v39, %v7456_v24  ;;  %v4016_v24 = vld [vmem:[%s6643_s6 + $0x28] sm:$0xff] }
 0x667   :  { %v3832_v44 = vmul.f32 -1.442695, %v2817_v6  ;;  %v2825_v32 = vmul.f32 %v4248_v59, %v2824_v36  ;;  %vm2965_vm10 = vweird.f32 %v6522_v20 }
 0x668   :  { %v4252_v13 = vpop.eup %4251 }
 0x669   :  { %v2931_v23 = vpop.f32.mrf.mxu3  ;;  %v2842_v21 = vmul.f32 %v4252_v13, %v2840_v16  ;;  %4253 = vpow2.f32 %v3832_v44  ;;  %vm2847_vm14 = vweird.f32 %v4252_v13  ;;  %v2826_v7 = vadd.f32 %v4248_v59, %v2825_v32 }
 0x66a   :  { %v2799_v62 = vpop.f32.mrf.mxu2  ;;  %4255 = vpow2.f32 %v3835_v2  ;;  %vm2848_vm2 = vmor %vm2846_vm0, %vm2847_vm14 }
 0x66b   :  { %v2843_v17 = vsub.f32 1.0, %v2842_v21  ;;  %4257 = vrcp.f32 %v6522_v20  ;;  %v2830_v40 = vsel %vm6530_vm1, %v4248_v59, %v2826_v7  ;;  %v2971_v21 = vand.u32 2147483648, %v6522_v20 }
 0x66c   :  { %v2890_v53 = vpop.f32.mrf.mxu0  ;;  %4259 = vtanh.f32 %v2816_v29  ;;  %v2835_v54 = vsel %vm2832_vm4, %v2834_v63, %v2830_v40 }
 0x66d   :  { %v2844_v61 = vmul.f32 %v4252_v13, %v2843_v17  ;;  %v2933_v51 = vadd.f32 %v2890_v53, %v162_v35  ;;  %v2969_v35 = vand.u32 2147483647, %v6522_v20 }
 0x66f   :  { %v2845_v57 = vadd.f32 %v4252_v13, %v2844_v61  ;;  %v3833_v3 = vmul.f32 -1.442695, %v2933_v51  ;;  %v4254_v19 = vpop.eup %4253  ;;  %v2972_v51 = vor.u32 1.1754944e-38, %v2971_v21  ;;  %vm2970_vm14 = vcmp.eq.f32.partialorder %v2969_v35, 8.507059e+37 }
 0x670   :  { %v4256_v43 = vpop.eup %4255  ;;  %v2860_v48 = vadd.f32 1.0, %v4254_v19 }
 0x671   :  { %v2849_v45 = vsel %vm2848_vm2, %v4252_v13, %v2845_v57  ;;  %4261 = vpow2.f32 %v3833_v3  ;;  %v6537_v27 = vpop.eup %4257  ;;  %v6542_v31 = vadd.f32 1.0, %v4256_v43 }
 0x672   :  { %v2854_v15 = vsel %vm2851_vm3, %v2853_v47, %v2849_v45  ;;  %4263 = vrcp.f32 %v2860_v48  ;;  %v2961_v38 = vmul.f32 %v6537_v27, %v6522_v20  ;;  %v4260_v0 = vpop.eup %4259  ;;  %v2870_v11 = vand.u32 2147483647, %v2860_v48 }
 0x673   :  { %v2876_v1 = vmul.f32 %v2854_v15, %v6382_v5  ;;  %v2877_v34 = vmul.f32 %v4260_v0, %v2835_v54  ;;  %4265 = vrcp.f32 %v6542_v31  ;;  %v2872_v5 = vand.u32 2147483648, %v2860_v48 }
 0x674   :  { %v2892_v46 = vpop.f32.mrf.mxu0  ;;  %v2962_v12 = vsub.f32 1.0, %v2961_v38  ;;  %vm2866_vm6 = vweird.f32 %v2860_v48  ;;  %vm2966_vm7 = vweird.f32 %v6537_v27  ;;  %vm2871_vm9 = vcmp.eq.f32.partialorder %v2870_v11, 8.507059e+37 }
 0x675   :  { %v6544_v8 = vadd.f32 %v2877_v34, %v2876_v1  ;;  %v2873_v23 = vor.u32 1.1754944e-38, %v2872_v5  ;;  %vm6557_vm11 = vmor %vm2965_vm10, %vm2966_vm7  ;;  %v2991_v63 = vand.u32 2147483648, %v6542_v31  ;;  %vm2985_vm2 = vweird.f32 %v6542_v31 }
 0x676   :  { %v2916_v55 = vpop.f32.mrf.mxu2  ;;  %v2963_v26 = vmul.f32 %v6537_v27, %v2962_v12  ;;  %v2989_v15 = vand.u32 2147483647, %v6542_v31 }
 0x677   :  { %v4262_v18 = vpop.eup %4261  ;;  %v2935_v60 = vadd.f32 %v2916_v55, %v220_v30  ;;  %v2992_v54 = vor.u32 1.1754944e-38, %v2991_v63 }
 0x678   :  { %v2940_v16 = vadd.f32 1.0, %v4262_v18  ;;  %v4264_v56 = vpop.eup %4263  ;;  %v2964_v44 = vadd.f32 %v6537_v27, %v2963_v26  ;;  %vm2990_vm4 = vcmp.eq.f32.partialorder %v2989_v15, 8.507059e+37 }
 0x679   :  { %v2862_v4 = vmul.f32 %v4264_v56, %v2860_v48  ;;  %vm2867_vm5 = vweird.f32 %v4264_v56  ;;  %v4266_v36 = vpop.eup %4265 }
 0x67a   :  { %4267 = vrcp.f32 %v2940_v16  ;;  %vm2868_vm8 = vmor %vm2866_vm6, %vm2867_vm5  ;;  %v2981_v32 = vmul.f32 %v4266_v36, %v6542_v31  ;;  %v2952_v42 = vand.u32 2147483648, %v2940_v16  ;;  %v2950_v61 = vand.u32 2147483647, %v2940_v16  ;;  %v4018_v31 = vld [vmem:[%s6643_s6 + $0x38] sm:$0xff] }
 0x67b   :  { %v2863_v59 = vsub.f32 1.0, %v2862_v4  ;;  %4269 = vtanh.f32 %v6544_v8  ;;  %v2968_v7 = vsel %vm6557_vm11, %v6537_v27, %v2964_v44  ;;  %vm2946_vm13 = vweird.f32 %v2940_v16 }
 0x67c   :  { %4271 = vtanh.f32 %v2935_v60  ;;  %v2982_v58 = vsub.f32 1.0, %v2981_v32  ;;  %v2953_v20 = vor.u32 1.1754944e-38, %v2952_v42  ;;  %v2973_v57 = vsel %vm2970_vm14, %v2972_v51, %v2968_v7  ;;  %v4011_v42 = vld [vmem:[%s6643_s6] sm:$0xff] }
 0x67d   :  { %v2864_v9 = vmul.f32 %v4264_v56, %v2863_v59  ;;  %vm2951_vm0 = vcmp.eq.f32.partialorder %v2950_v61, 8.507059e+37  ;;  %v2995_v40 = vmul.f32 %v2973_v57, %v6410_v10  ;;  %vm2986_vm1 = vweird.f32 %v4266_v36  ;;  %v4025_v57 = vld [vmem:[%s6644_s8 + $0x30] sm:$0xff] }
 0x67e   :  { %v2918_v52 = vpop.f32.mrf.mxu2  ;;  %v2983_v47 = vmul.f32 %v4266_v36, %v2982_v58  ;;  %vm2987_vm3 = vmor %vm2985_vm2, %vm2986_vm1  ;;  %v4026_v58 = vld [vmem:[%s6644_s8 + $0x38] sm:$0xff] }
 0x67f   :  { %v2865_v2 = vadd.f32 %v4264_v56, %v2864_v9  ;;  %v4017_v52 = vld [vmem:[%s6643_s6 + $0x30] sm:$0xff] }
 0x680   :  { %v4268_v6 = vpop.eup %4267  ;;  %v2984_v27 = vadd.f32 %v4266_v36, %v2983_v47 }
 0x681   :  { %v2942_v13 = vmul.f32 %v4268_v6, %v2940_v16  ;;  %v2869_v62 = vsel %vm2868_vm8, %v4264_v56, %v2865_v2  ;;  %v4270_v50 = vpop.eup %4269  ;;  %vm2947_vm12 = vweird.f32 %v4268_v6 }
 0x682   :  { %v2874_v17 = vsel %vm2871_vm9, %v2873_v23, %v2869_v62  ;;  %vm2948_vm15 = vmor %vm2946_vm13, %vm2947_vm12  ;;  %v4272_v19 = vpop.eup %4271  ;;  %v2988_v55 = vsel %vm2987_vm3, %v4266_v36, %v2984_v27  ;;  %v4012_v62 = vld [vmem:[%s6643_s6 + $0x8] sm:$0xff] }
 0x683   :  { %v2943_v28 = vsub.f32 1.0, %v2942_v13  ;;  %v2880_v49 = vmul.f32 %v4270_v50, %v2874_v17  ;;  %v2993_v38 = vsel %vm2990_vm4, %v2992_v54, %v2988_v55  ;;  %v4014_v13 = vld [vmem:[%s6643_s6 + $0x18] sm:$0xff]  ;;  %v4024_v27 = vld [vmem:[%s6644_s8 + $0x28] sm:$0xff] }
 0x685   :  { %v2944_v53 = vmul.f32 %v4268_v6, %v2943_v28  ;;  %v3001_v22 = vpack.c.bf16 %v2880_v49, %v2880_v49 }
 0x687   :  { %v2945_v41 = vadd.f32 %v4268_v6, %v2944_v53  ;;  %3023 = vmatmul.bf16.vlgmr.msrb.gmra.mxu1 %v3001_v22  ;;  %3049 = vmatmul.bf16.vlgmr.msra.gmra.mxu3 %v3001_v22 }
 0x688   :  { %3325 = vmatpush.bf16.msrb.mxu1 %v4026_v58 }
 0x689   :  { %v2949_v3 = vsel %vm2948_vm15, %v4268_v6, %v2945_v41  ;;  %v4015_v6 = vld [vmem:[%s6643_s6 + $0x20] sm:$0xff] }
 0x68a   :  { %v2954_v43 = vsel %vm2951_vm0, %v2953_v20, %v2949_v3 }
 0x68b   :  { %v2996_v45 = vmul.f32 %v4272_v19, %v2954_v43 }
 0x68c   :  { %3326 = vmatpush.bf16.msrb.mxu1 %v4025_v57 }
 0x68d   :  { %v2997_v48 = vadd.f32 %v2996_v45, %v2995_v40 }
 0x68f   :  { %4273 = vtanh.f32 %v2997_v48 }
 0x690   :  { %3327 = vmatpush.bf16.msrb.mxu1 %v4024_v27 }
 0x695   :  { %v4274_v46 = vpop.eup %4273 }
 0x696   :  { %v2999_v1 = vmul.f32 %v4274_v46, %v2993_v38 }
 0x697   :  { %3075 = vmatmul.bf16.vlgmr.msra.gmra.mxu1 %v3001_v22  ;;  %3101 = vmatmul.bf16.vlgmr.msrb.gmra.mxu3 %v3001_v22 }
 0x698   :  { %v3000_v10 = vpack.c.bf16 %v2999_v1, %v2999_v1 }
 0x69a   :  { %3010 = vmatmul.bf16.vlgmr.msrb.gmra.mxu0 %v3000_v10  ;;  %3036 = vmatmul.bf16.vlgmr.msra.gmra.mxu2 %v3000_v10 }
 0x69b   :  { %3242 = vmatpush.bf16.msrb.mxu0 %v4018_v31 }
 0x69f   :  { %3243 = vmatpush.bf16.msrb.mxu0 %v4017_v52 }
 0x6a3   :  { %3244 = vmatpush.bf16.msrb.mxu0 %v4016_v24 }
 0x6a7   :  { %3245 = vmatpush.bf16.msrb.mxu0 %v4015_v6 }
 0x6aa   :  { %3062 = vmatmul.bf16.vlgmr.msra.gmra.mxu0 %v3000_v10  ;;  %3088 = vmatmul.bf16.vlgmr.msrb.gmra.mxu2 %v3000_v10 }
 0x6ab   :  { %3246 = vmatpush.bf16.msrb.mxu0 %v4014_v13  ;;  %v4019_v13 = vld [vmem:[%s6644_s8] sm:$0xff] }
 0x704   :  { %v3024_v0 = vpop.f32.mrf.mxu1 }
 0x70a   :  { %v3050_v18 = vpop.f32.mrf.mxu3 }
 0x70c   :  { %v3026_v34 = vpop.f32.mrf.mxu1 }
 0x712   :  { %v3052_v16 = vpop.f32.mrf.mxu3 }
 0x714   :  { %v3076_v56 = vpop.f32.mrf.mxu1 }
 0x717   :  { %v3011_v12 = vpop.f32.mrf.mxu0 }
 0x718   :  { %v3025_v4 = vadd.f32 %v3024_v0, %v3011_v12  ;;  %v4023_v0 = vld [vmem:[%s6644_s8 + $0x20] sm:$0xff] }
 0x719   :  { %3328 = vmatpush.bf16.msrb.mxu1 %v4023_v0 }
 0x71a   :  { %v3106_v59 = vadd.f32 %v3025_v4, %v7446_v33  ;;  %v3102_v26 = vpop.f32.mrf.mxu3 }
 0x71c   :  { %v3836_v5 = vmul.f32 -1.442695, %v3106_v59  ;;  %v3078_v39 = vpop.f32.mrf.mxu1 }
 0x71d   :  { %v3037_v30 = vpop.f32.mrf.mxu2 }
 0x71e   :  { %4275 = vpow2.f32 %v3836_v5  ;;  %v3051_v9 = vadd.f32 %v3050_v18, %v3037_v30 }
 0x71f   :  { %v3013_v11 = vpop.f32.mrf.mxu0 }
 0x720   :  { %v3107_v36 = vadd.f32 %v3051_v9, %v7447_v25  ;;  %v4013_v25 = vld [vmem:[%s6643_s6 + $0x10] sm:$0xff] }
 0x721   :  { %3247 = vmatpush.bf16.msrb.mxu0 %v4013_v25 }
 0x722   :  { %v3837_v33 = vmul.f32 -1.442695, %v3107_v36  ;;  %v3104_v60 = vpop.f32.mrf.mxu3 }
 0x724   :  { %v4276_v2 = vpop.eup %4275  ;;  %4277 = vpow2.f32 %v3837_v33 }
 0x725   :  { %v3113_v44 = vadd.f32 1.0, %v4276_v2  ;;  %v3039_v23 = vpop.f32.mrf.mxu2  ;;  %3248 = vmatpush.bf16.msrb.mxu0 %v4012_v62  ;;  %v4020_v2 = vld [vmem:[%s6644_s8 + $0x8] sm:$0xff] }
 0x727   :  { %4279 = vrcp.f32 %v3113_v44  ;;  %v3063_v21 = vpop.f32.mrf.mxu0  ;;  %v3125_v45 = vand.u32 2147483648, %v3113_v44  ;;  %vm3119_vm7 = vweird.f32 %v3113_v44  ;;  %v3123_v63 = vand.u32 2147483647, %v3113_v44 }
 0x728   :  { %v3077_v7 = vadd.f32 %v3076_v56, %v3063_v21  ;;  %v4022_v56 = vld [vmem:[%s6644_s8 + $0x18] sm:$0xff] }
 0x729   :  { %3249 = vmatpush.bf16.msrb.mxu0 %v4011_v42  ;;  %v3126_v1 = vor.u32 1.1754944e-38, %v3125_v45  ;;  %vm3124_vm12 = vcmp.eq.f32.partialorder %v3123_v63, 8.507059e+37  ;;  %3329 = vmatpush.bf16.msrb.mxu1 %v4022_v56 }
 0x72a   :  { %v4278_v32 = vpop.eup %4277 }
 0x72b   :  { %v3132_v50 = vadd.f32 1.0, %v4278_v32 }
 0x72d   :  { %v4280_v28 = vpop.eup %4279  ;;  %4281 = vrcp.f32 %v3132_v50  ;;  %v3089_v35 = vpop.f32.mrf.mxu2  ;;  %v3144_v47 = vand.u32 2147483648, %v3132_v50  ;;  %v3142_v48 = vand.u32 2147483647, %v3132_v50  ;;  %vm3138_vm8 = vweird.f32 %v3132_v50 }
 0x72e   :  { %v3115_v17 = vmul.f32 %v4280_v28, %v3113_v44  ;;  %v3103_v29 = vadd.f32 %v3102_v26, %v3089_v35  ;;  %vm3120_vm5 = vweird.f32 %v4280_v28  ;;  %v4021_v26 = vld [vmem:[%s6644_s8 + $0x10] sm:$0xff]  ;;  %v4033_v44 = vld [vmem:[%s6642_s7] ss:$0 sm:$0xff] }
 0x72f   :  { %v3065_v49 = vpop.f32.mrf.mxu0  ;;  %vm6605_vm9 = vmor %vm3119_vm7, %vm3120_vm5  ;;  %v3145_v54 = vor.u32 1.1754944e-38, %v3144_v47  ;;  %vm3143_vm11 = vcmp.eq.f32.partialorder %v3142_v48, 8.507059e+37  ;;  %3330 = vmatpush.bf16.msrb.mxu1 %v4021_v26 }
 0x730   :  { %v3116_v53 = vsub.f32 1.0, %v3115_v17  ;;  %v3109_v61 = vadd.f32 %v3103_v29, %v7078_v14  ;;  %v3108_v14 = vadd.f32 %v3077_v7, %v7079_v37 }
 0x732   :  { %v3838_v51 = vmul.f32 -1.442695, %v3109_v61  ;;  %v3117_v41 = vmul.f32 %v4280_v28, %v3116_v53 }
 0x733   :  { %v4282_v22 = vpop.eup %4281  ;;  %3331 = vmatpush.bf16.msrb.mxu1 %v4020_v2 }
 0x734   :  { %v3134_v20 = vmul.f32 %v4282_v22, %v3132_v50  ;;  %4283 = vpow2.f32 %v3838_v51  ;;  %v3118_v43 = vadd.f32 %v4280_v28, %v3117_v41  ;;  %vm3139_vm6 = vweird.f32 %v4282_v22  ;;  %v4034_v50 = vld [vmem:[%s6645_s9] ss:$0 sm:$0xff] }
 0x735   :  { %v3091_v3 = vpop.f32.mrf.mxu2  ;;  %4285 = vtanh.f32 %v3108_v14  ;;  %vm3140_vm10 = vmor %vm3138_vm8, %vm3139_vm6 }
 0x736   :  { %v3135_v19 = vsub.f32 1.0, %v3134_v20  ;;  %v3122_v46 = vsel %vm6605_vm9, %v4280_v28, %v3118_v43 }
 0x737   :  { %v3127_v34 = vsel %vm3124_vm12, %v3126_v1, %v3122_v46  ;;  %3332 = vmatpush.bf16.msrb.mxu1 %v4019_v13 }
 0x738   :  { %v3136_v40 = vmul.f32 %v4282_v22, %v3135_v19 }
 0x73a   :  { %v4284_v15 = vpop.eup %4283  ;;  %v3137_v37 = vadd.f32 %v4282_v22, %v3136_v40 }
 0x73b   :  { %v3152_v38 = vadd.f32 1.0, %v4284_v15  ;;  %v4286_v31 = vpop.eup %4285 }
 0x73c   :  { %v3141_v10 = vsel %vm3140_vm10, %v4282_v22, %v3137_v37  ;;  %v3169_v12 = vmul.f32 %v4286_v31, %v3127_v34 }
 0x73d   :  { %v3146_v18 = vsel %vm3143_vm11, %v3145_v54, %v3141_v10  ;;  %4287 = vrcp.f32 %v3152_v38  ;;  %v3164_v24 = vand.u32 2147483648, %v3152_v38  ;;  %vm3158_vm14 = vweird.f32 %v3152_v38 }
 0x73e   :  { %v3168_v16 = vmul.f32 %v3146_v18, %v6544_v8  ;;  %v3162_v8 = vand.u32 2147483647, %v3152_v38 }
 0x73f   :  { %v3165_v9 = vor.u32 1.1754944e-38, %v3164_v24 }
 0x740   :  { %v3170_v52 = vadd.f32 %v3169_v12, %v3168_v16  ;;  %vm3163_vm0 = vcmp.eq.f32.partialorder %v3162_v8, 8.507059e+37 }
 0x742   :  { %4289 = vtanh.f32 %v3170_v52 }
 0x743   :  { %v4288_v4 = vpop.eup %4287 }
 0x744   :  { %v3154_v59 = vmul.f32 %v4288_v4, %v3152_v38  ;;  %vm3159_vm13 = vweird.f32 %v4288_v4 }
 0x745   :  { %vm3160_vm15 = vmor %vm3158_vm14, %vm3159_vm13 }
 0x746   :  { %v3155_v5 = vsub.f32 1.0, %v3154_v59 }
 0x748   :  { %v3156_v39 = vmul.f32 %v4288_v4, %v3155_v5  ;;  %v4290_v36 = vpop.eup %4289 }
 0x74a   :  { %v3157_v30 = vadd.f32 %v4288_v4, %v3156_v39 }
 0x74c   :  { %v3161_v11 = vsel %vm3160_vm15, %v4288_v4, %v3157_v30 }
 0x74d   :  { %v3166_v6 = vsel %vm3163_vm0, %v3165_v9, %v3161_v11 }
 0x74e   :  { %v3172_v33 = vmul.f32 %v4290_v36, %v3166_v6 }
 0x750   :  { %v3173_v60 = vpack.c.bf16 %v3172_v33, %v3172_v33 }
 0x752   :  { %3250 = vmatmul.bf16.vlgmr.msrb.gmra.mxu0 %v3173_v60 }
 0x7cf   :  { %v3251_v23 = vpop.f32.mrf.mxu0 }
 0x7d0   :  { %v3252_v21 = vadd.f32 %v4033_v44, %v3251_v23 }
 0x7d2   :  { %v3255_v25 = vmax.f32 %v3252_v21, 0.0 }
 0x7d4   :  { %v3256_v32 = vpack.c.bf16 %v3255_v25, %v3255_v25 }
 0x7d6   :  { %3333 = vmatmul.bf16.vlgmr.msrb.gmra.mxu1 %v3256_v32 }
 0x7d7   :  { %v3253_v62 = vpop.f32.mrf.mxu0 }
 0x853   :  { %v3334_v28 = vpop.f32.mrf.mxu1 }
 0x854   :  { %v3335_v35 = vadd.f32 %v4034_v50, %v3334_v28 }
 0x856   :  { %3338 = vst [vmem:[%s6646_s10] sm:$0xff] %v3335_v35 }
 0x85b   :  { %v3336_v17 = vpop.f32.mrf.mxu1 }

</bundles_post_ra>
